<compile_context>
chip_gen: v6e
topology: v6e:2x2x1
jax: 0.10.0
libtpu: 0.0.40
codegen_flags: <defaults>
</compile_context>

<pallas_src>
import math
from functools import partial

import jax
import jax.numpy as jnp
from jax.experimental import pallas as pl
from jax.experimental.pallas import tpu as pltpu

Z_DIM = 40
EMBED_DIM = 128
N_HEADS = 8
N_LAYERS = 3
NC = 10                          # sequence length
FF_HIDDEN = 512
KEY_DIM = EMBED_DIM // N_HEADS   # 16 (== val_dim)
NORM_FACTOR = 1.0 / math.sqrt(KEY_DIM)


def _full_sum(a):
    """(m, n) -> (1, 1): lane reduce then sublane reduce (stays 2-D throughout)."""
    return jnp.sum(jnp.sum(a, axis=1, keepdims=True), axis=0, keepdims=True)


def transmodel_kernel(x_ref, emb_w_ref, pe_ref, qkv_w_ref, wo_ref,
                      ff_w1_ref, ff_b1_ref, ff_w2_ref, ff_b2_ref,
                      bias_ref, dec_w_ref, dec_b_ref, out_ref, *, block_b):
    S, D = pe_ref.shape
    K = KEY_DIM
    bf = jnp.bfloat16

    # ---- flatten the block_b sequences into stacked rows (block_b*S, z_dim) ----
    xrows = jnp.concatenate([x_ref[b] for b in range(block_b)], axis=0)

    # ---- init_embed + positional encoding (emb_b pre-folded into pe_ref) ----
    h = jnp.dot(xrows.astype(bf), emb_w_ref[...], preferred_element_type=jnp.float32)
    pe = pe_ref[...]
    if block_b > 1:
        pe = jnp.concatenate([pe] * block_b, axis=0)
    h = h + pe                                                     # (R, D) f32

    # ---- 3 encoder layers (Normalization(None) == identity) ----
    for l in range(N_LAYERS):
        # fused QKV projection: one lane-dense (R,128)x(128,384) bf16 matmul per layer
        qkv = jnp.dot(h.astype(bf), qkv_w_ref[l], preferred_element_type=jnp.float32)

        for hd in range(N_HEADS):
            q = qkv[:, hd * K:(hd + 1) * K]                # 1/sqrt(K) folded into Wq
            k = qkv[:, D + hd * K:D + (hd + 1) * K]
            v = qkv[:, 2 * D + hd * K:2 * D + (hd + 1) * K]
            s = jnp.einsum('ik,jk->ij', q, k, preferred_element_type=jnp.float32)
            s = s + bias_ref[...]                          # block-diag mask (0 if block_b==1)
            m = jnp.max(s, axis=-1, keepdims=True)
            e = jnp.exp(s - m)
            p = e * pl.reciprocal(jnp.sum(e, axis=-1, keepdims=True), approx=True)
            ctx = jnp.dot(p, v, preferred_element_type=jnp.float32)    # (R, K) in registers
            # per-head output projection accumulated straight into the residual stream
            h = h + jnp.dot(ctx.astype(bf), wo_ref[l, hd],
                            preferred_element_type=jnp.float32)

        # feed-forward (Linear -> ReLU -> Linear) + residual
        ff = jnp.dot(h.astype(bf), ff_w1_ref[l],
                     preferred_element_type=jnp.float32) + ff_b1_ref[l]
        ff = jnp.maximum(ff, 0.0)
        h = h + jnp.dot(ff.astype(bf), ff_w2_ref[l],
                        preferred_element_type=jnp.float32) + ff_b2_ref[l]

    # ---- decoder_1 o decoder_2 (folded wrapper-side into dec_w: (2, S, D)) ----
    dec_b = dec_b_ref[...]                                         # (1, 2) f32
    rows = []
    for b in range(block_b):
        hb = h[b * S:(b + 1) * S, :]
        r0 = _full_sum(hb * dec_w_ref[0])                          # (1, 1)
        r1 = _full_sum(hb * dec_w_ref[1])                          # (1, 1)
        rows.append(jnp.concatenate([r0, r1], axis=1) + dec_b)     # (1, 2)
    # single lane-contiguous writeback per grid step
    out_ref[...] = jnp.concatenate(rows, axis=1).reshape(1, 1, 2 * block_b)


def positional_encoding(seq_len, d_model):
    position = jnp.arange(seq_len, dtype=jnp.float32)[:, None]
    div_term = jnp.exp(jnp.arange(0, d_model, 2, dtype=jnp.float32)
                       * (-math.log(10000.0) / d_model))
    pe = jnp.zeros((seq_len, d_model), jnp.float32)
    pe = pe.at[:, 0::2].set(jnp.sin(position * div_term))
    pe = pe.at[:, 1::2].set(jnp.cos(position * div_term))
    return pe


def init_params(key):
    """Parameters in the original (PyTorch-like) per-head layout, f32."""
    keys = jax.random.split(key, 14)
    ki = iter(keys)

    def u(shape, bound):
        return jax.random.uniform(next(ki), shape, jnp.float32, -bound, bound)

    D, K, L, H = EMBED_DIM, KEY_DIM, N_LAYERS, N_HEADS
    p = {}
    p['emb_w'] = u((Z_DIM, D), 1.0 / math.sqrt(Z_DIM))
    p['emb_b'] = u((D,), 1.0 / math.sqrt(Z_DIM))
    p['wq'] = u((L, H, D, K), 1.0 / math.sqrt(K))
    p['wk'] = u((L, H, D, K), 1.0 / math.sqrt(K))
    p['wv'] = u((L, H, D, K), 1.0 / math.sqrt(K))
    p['wo'] = u((L, H, K, D), 1.0 / math.sqrt(D))
    p['ff_w1'] = u((L, D, FF_HIDDEN), 1.0 / math.sqrt(D))
    p['ff_b1'] = u((L, FF_HIDDEN), 1.0 / math.sqrt(D))
    p['ff_w2'] = u((L, FF_HIDDEN, D), 1.0 / math.sqrt(FF_HIDDEN))
    p['ff_b2'] = u((L, D), 1.0 / math.sqrt(FF_HIDDEN))
    p['dec1_w'] = u((NC * D, Z_DIM), 1.0 / math.sqrt(NC * D))
    p['dec1_b'] = u((Z_DIM,), 1.0 / math.sqrt(NC * D))
    p['dec2_w'] = u((Z_DIM, 2), 1.0 / math.sqrt(Z_DIM))
    p['dec2_b'] = u((2,), 1.0 / math.sqrt(Z_DIM))
    return p


def pack_params(p, seq_len):
    """One-time, outside-the-jit repacking: fused heads, fused QKV (with 1/sqrt(K) folded),
    emb_b folded into PE, folded decoders, bf16 matmul weights."""
    L, H, D, K = N_LAYERS, N_HEADS, EMBED_DIM, KEY_DIM
    bf = jnp.bfloat16
    # heads concatenated on the lane axis; Q/K/V fused -> (L, D, 3D); norm factor into Wq
    wq = jnp.transpose(p['wq'], (0, 2, 1, 3)).reshape(L, D, H * K) * NORM_FACTOR
    wk = jnp.transpose(p['wk'], (0, 2, 1, 3)).reshape(L, D, H * K)
    wv = jnp.transpose(p['wv'], (0, 2, 1, 3)).reshape(L, D, H * K)
    qkv_w = jnp.concatenate([wq, wk, wv], axis=-1).astype(bf)           # (L, D, 3D) bf16
    # fold decoder_2 into decoder_1: out = (z_flat @ W1 + b1) @ W2 + b2
    w12 = p['dec1_w'] @ p['dec2_w']                                     # (S*D, 2)
    dec_w = jnp.transpose(w12.reshape(seq_len, D, 2), (2, 0, 1))        # (2, S, D) f32
    dec_b = (p['dec1_b'] @ p['dec2_w'] + p['dec2_b']).reshape(1, 2)     # (1, 2)  f32
    pe_b = positional_encoding(seq_len, D) + p['emb_b'][None, :]        # (S, D)  f32
    return dict(
        emb_w=p['emb_w'].astype(bf),
        pe_b=pe_b.astype(jnp.float32),
        qkv_w=qkv_w,
        wo=p['wo'].astype(bf),                                          # (L, H, K, D) bf16
        ff_w1=p['ff_w1'].astype(bf), ff_b1=p['ff_b1'].reshape(L, 1, FF_HIDDEN),
        ff_w2=p['ff_w2'].astype(bf), ff_b2=p['ff_b2'].reshape(L, 1, D),
        dec_w=dec_w, dec_b=dec_b)


@partial(jax.jit, static_argnames=("block_b",))
def transmodel_forward(x, packed, block_b=1):
    """x: (B, S, z_dim); packed: output of pack_params (computed once at init).
    block_b sequences are processed per grid step (choose block_b*S ~128 rows on v5e,
    ~256 on v6e; keep >= 2 grid steps on v7x so both TensorCores are used)."""
    B, S, Zd = x.shape
    if B % block_b != 0:
        raise ValueError(f"batch {B} must be divisible by block_b {block_b}")
    nsteps = B // block_b
    R = block_b * S

    # block-diagonal additive attention bias for packed sequences (all zeros if block_b==1);
    # built from static shapes only -> constant-folded at compile time.
    seq_id = jnp.arange(R, dtype=jnp.int32) // S
    attn_bias = jnp.where(seq_id[:, None] == seq_id[None, :], 0.0, -1e30)
    attn_bias = attn_bias.astype(jnp.float32)

    def wspec(a):
        # full-array block, constant index_map -> stays VMEM-resident across the grid
        return pl.BlockSpec(a.shape, lambda i, _nd=a.ndim: (0,) * _nd)

    args = (x, packed['emb_w'], packed['pe_b'], packed['qkv_w'], packed['wo'],
            packed['ff_w1'], packed['ff_b1'], packed['ff_w2'], packed['ff_b2'],
            attn_bias, packed['dec_w'], packed['dec_b'])
    in_specs = ([pl.BlockSpec((block_b, S, Zd), lambda i: (i, 0, 0))]
                + [wspec(a) for a in args[1:]])

    out = pl.pallas_call(
        partial(transmodel_kernel, block_b=block_b),
        out_shape=jax.ShapeDtypeStruct((nsteps, 1, 2 * block_b), jnp.float32),
        grid=(nsteps,),
        in_specs=in_specs,
        out_specs=pl.BlockSpec((1, 1, 2 * block_b), lambda i: (i, 0, 0)),
        compiler_params=pltpu.CompilerParams(
            dimension_semantics=("parallel",),
            vmem_limit_bytes=32 << 20),
    )(*args)
    return out.reshape(B, 2)


def reference_forward(x, p):
    """Pure-JAX f32 reference matching the PyTorch forward semantics (original layout)."""
    pe = positional_encoding(x.shape[1], EMBED_DIM)
    z = jnp.einsum('bsz,zd->bsd', x, p['emb_w']) + p['emb_b']
    z = z + pe
    for l in range(N_LAYERS):
        q = jnp.einsum('bsd,hdk->hbsk', z, p['wq'][l])
        k = jnp.einsum('bsd,hdk->hbsk', z, p['wk'][l])
        v = jnp.einsum('bsd,hdk->hbsk', z, p['wv'][l])
        sc = NORM_FACTOR * jnp.einsum('hbqk,hbsk->hbqs', q, k)
        a = jax.nn.softmax(sc, axis=-1)
        heads = jnp.einsum('hbqs,hbsk->hbqk', a, v)
        z = z + jnp.einsum('hbqk,hkd->bqd', heads, p['wo'][l])
        ff = jax.nn.relu(jnp.einsum('bsd,df->bsf', z, p['ff_w1'][l]) + p['ff_b1'][l])
        z = z + jnp.einsum('bsf,fd->bsd', ff, p['ff_w2'][l]) + p['ff_b2'][l]
    zf = z.reshape(z.shape[0], -1)
    d1 = zf @ p['dec1_w'] + p['dec1_b']
    return d1 @ p['dec2_w'] + p['dec2_b']


if __name__ == "__main__":
    key = jax.random.PRNGKey(0)
    pkey, xkey = jax.random.split(key)
    params = init_params(pkey)
    packed = pack_params(params, NC)       # one-time packing, hoisted out of the jitted forward

    # tolerance covers bf16 MXU inputs (f32 accumulate), approx-reciprocal softmax and
    # reordered (fused) accumulation vs. the pure-f32 reference.
    RTOL = ATOL = 3e-2

    # (1) one sequence per grid step (2 steps -> both v7x TensorCores active)
    x = jax.random.normal(xkey, (2, NC, Z_DIM), jnp.float32)   # (batch, nc, z_dim)
    out = jax.block_until_ready(transmodel_forward(x, packed, block_b=1))
    ref = reference_forward(x, params)
    assert out.shape == (2, 2), out.shape
    assert jnp.allclose(out, ref, rtol=RTOL, atol=ATOL), (out, ref)

    # (2) multiple sequences per grid step (block-diagonal masked attention path)
    xb = jax.random.normal(jax.random.PRNGKey(1), (8, NC, Z_DIM), jnp.float32)
    outb = jax.block_until_ready(transmodel_forward(xb, packed, block_b=4))
    refb = reference_forward(xb, params)
    assert outb.shape == (8, 2), outb.shape
    assert jnp.allclose(outb, refb, rtol=RTOL, atol=ATOL), (outb, refb)

    print("KERNEL_OK")
</pallas_src>

<mosaic_0001>
module attributes {stable_mosaic.version = 11 : i64} {
  func.func @transmodel_kernel(%arg0: i32, %arg1: memref<1x10x40xf32, #tpu.memory_space<vmem>>, %arg2: memref<40x128xbf16, #tpu.memory_space<vmem>>, %arg3: memref<10x128xf32, #tpu.memory_space<vmem>>, %arg4: memref<3x128x384xbf16, #tpu.memory_space<vmem>>, %arg5: memref<3x8x16x128xbf16, #tpu.memory_space<vmem>>, %arg6: memref<3x128x512xbf16, #tpu.memory_space<vmem>>, %arg7: memref<3x1x512xf32, #tpu.memory_space<vmem>>, %arg8: memref<3x512x128xbf16, #tpu.memory_space<vmem>>, %arg9: memref<3x1x128xf32, #tpu.memory_space<vmem>>, %arg10: memref<10x10xf32, #tpu.memory_space<vmem>>, %arg11: memref<2x10x128xf32, #tpu.memory_space<vmem>>, %arg12: memref<1x2xf32, #tpu.memory_space<vmem>>, %arg13: memref<1x1x2xf32, #tpu.memory_space<vmem>>) attributes {dimension_semantics = [#tpu.dimension_semantics<parallel>], iteration_bounds = array<i64: 2>, scalar_prefetch = 0 : i64, scratch_operands = 0 : i64, tpu.core_type = #tpu.core_type<tc>, window_params = [{transform_indices = @transform_0, window_bounds = array<i64: 1, 10, 40>}, {pipeline_mode = #tpu.pipeline_mode<synchronous>, transform_indices = @transform_1, window_bounds = array<i64: 40, 128>}, {pipeline_mode = #tpu.pipeline_mode<synchronous>, transform_indices = @transform_2, window_bounds = array<i64: 10, 128>}, {pipeline_mode = #tpu.pipeline_mode<synchronous>, transform_indices = @transform_3, window_bounds = array<i64: 3, 128, 384>}, {pipeline_mode = #tpu.pipeline_mode<synchronous>, transform_indices = @transform_4, window_bounds = array<i64: 3, 8, 16, 128>}, {pipeline_mode = #tpu.pipeline_mode<synchronous>, transform_indices = @transform_5, window_bounds = array<i64: 3, 128, 512>}, {pipeline_mode = #tpu.pipeline_mode<synchronous>, transform_indices = @transform_6, window_bounds = array<i64: 3, 1, 512>}, {pipeline_mode = #tpu.pipeline_mode<synchronous>, transform_indices = @transform_7, window_bounds = array<i64: 3, 512, 128>}, {pipeline_mode = #tpu.pipeline_mode<synchronous>, transform_indices = @transform_8, window_bounds = array<i64: 3, 1, 128>}, {pipeline_mode = #tpu.pipeline_mode<synchronous>, transform_indices = @transform_9, window_bounds = array<i64: 10, 10>}, {pipeline_mode = #tpu.pipeline_mode<synchronous>, transform_indices = @transform_10, window_bounds = array<i64: 2, 10, 128>}, {pipeline_mode = #tpu.pipeline_mode<synchronous>, transform_indices = @transform_11, window_bounds = array<i64: 1, 2>}, {transform_indices = @transform_12, window_bounds = array<i64: 1, 1, 2>}]} {
    %c0 = arith.constant 0 : index
    %c0_0 = arith.constant 0 : index
    %c0_1 = arith.constant 0 : index
    %0 = vector.load %arg1[%c0, %c0_0, %c0_1] : memref<1x10x40xf32, #tpu.memory_space<vmem>>, vector<1x10x40xf32>
    %1 = vector.shape_cast %0 : vector<1x10x40xf32> to vector<10x40xf32>
    %2 = arith.truncf %1 : vector<10x40xf32> to vector<10x40xbf16>
    %c0_2 = arith.constant 0 : index
    %c0_3 = arith.constant 0 : index
    %3 = vector.load %arg2[%c0_2, %c0_3] : memref<40x128xbf16, #tpu.memory_space<vmem>>, vector<40x128xbf16>
    %cst = arith.constant dense<0.000000e+00> : vector<10x128xf32>
    %4 = tpu.matmul %2, %3, %cst {dimension_numbers = #tpu.dot_dimension_numbers<[1], [0], [0], [1], [0, 0, 1, 1], [], []>} : vector<10x40xbf16>, vector<40x128xbf16>, vector<10x128xf32> -> vector<10x128xf32>
    %c0_4 = arith.constant 0 : index
    %c0_5 = arith.constant 0 : index
    %5 = vector.load %arg3[%c0_4, %c0_5] : memref<10x128xf32, #tpu.memory_space<vmem>>, vector<10x128xf32>
    %6 = arith.addf %4, %5 : vector<10x128xf32>
    %7 = arith.truncf %6 : vector<10x128xf32> to vector<10x128xbf16>
    %c0_6 = arith.constant 0 : index
    %c0_7 = arith.constant 0 : index
    %c0_8 = arith.constant 0 : index
    %8 = vector.load %arg4[%c0_6, %c0_7, %c0_8] : memref<3x128x384xbf16, #tpu.memory_space<vmem>>, vector<1x128x384xbf16>
    %9 = vector.shape_cast %8 : vector<1x128x384xbf16> to vector<128x384xbf16>
    %cst_9 = arith.constant dense<0.000000e+00> : vector<10x384xf32>
    %10 = tpu.matmul %7, %9, %cst_9 {dimension_numbers = #tpu.dot_dimension_numbers<[1], [0], [0], [1], [0, 0, 1, 1], [], []>} : vector<10x128xbf16>, vector<128x384xbf16>, vector<10x384xf32> -> vector<10x384xf32>
    %11 = vector.extract_strided_slice %10 {offsets = [0, 0], sizes = [10, 16], strides = [1, 1]} : vector<10x384xf32> to vector<10x16xf32>
    %12 = vector.extract_strided_slice %10 {offsets = [0, 128], sizes = [10, 16], strides = [1, 1]} : vector<10x384xf32> to vector<10x16xf32>
    %13 = vector.extract_strided_slice %10 {offsets = [0, 256], sizes = [10, 16], strides = [1, 1]} : vector<10x384xf32> to vector<10x16xf32>
    "tpu.trace_start"() <{level = 10 : i32, message = "ik,jk->ij"}> : () -> ()
    %cst_10 = arith.constant dense<0.000000e+00> : vector<10x10xf32>
    %14 = tpu.matmul %11, %12, %cst_10 {dimension_numbers = #tpu.dot_dimension_numbers<[1], [1], [0], [0], [0, 0, 1, 0], [], []>} : vector<10x16xf32>, vector<10x16xf32>, vector<10x10xf32> -> vector<10x10xf32>
    "tpu.trace_stop"() : () -> ()
    %c0_11 = arith.constant 0 : index
    %c0_12 = arith.constant 0 : index
    %15 = vector.load %arg10[%c0_11, %c0_12] : memref<10x10xf32, #tpu.memory_space<vmem>>, vector<10x10xf32>
    %16 = arith.addf %14, %15 : vector<10x10xf32>
    %cst_13 = arith.constant dense<0xFF800000> : vector<10xf32>
    %17 = vector.multi_reduction <maximumf>, %16, %cst_13 [1] : vector<10x10xf32> to vector<10xf32>
    %18 = vector.shape_cast %17 : vector<10xf32> to vector<10x1xf32>
    %19 = vector.broadcast %18 : vector<10x1xf32> to vector<10x10xf32>
    %20 = arith.subf %16, %19 : vector<10x10xf32>
    %21 = math.exp %20 : vector<10x10xf32>
    %cst_14 = arith.constant dense<0.000000e+00> : vector<10xf32>
    %22 = vector.multi_reduction <add>, %21, %cst_14 [1] : vector<10x10xf32> to vector<10xf32>
    %23 = vector.shape_cast %22 : vector<10xf32> to vector<10x1xf32>
    %24 = tpu.reciprocal %23 {approx = true} : vector<10x1xf32> -> vector<10x1xf32>
    %25 = vector.broadcast %24 : vector<10x1xf32> to vector<10x10xf32>
    %26 = arith.mulf %21, %25 : vector<10x10xf32>
    %cst_15 = arith.constant dense<0.000000e+00> : vector<10x16xf32>
    %27 = tpu.matmul %26, %13, %cst_15 {dimension_numbers = #tpu.dot_dimension_numbers<[1], [0], [0], [1], [0, 0, 1, 1], [], []>} : vector<10x10xf32>, vector<10x16xf32>, vector<10x16xf32> -> vector<10x16xf32>
    %28 = arith.truncf %27 : vector<10x16xf32> to vector<10x16xbf16>
    %c0_16 = arith.constant 0 : index
    %c0_17 = arith.constant 0 : index
    %c0_18 = arith.constant 0 : index
    %c0_19 = arith.constant 0 : index
    %29 = vector.load %arg5[%c0_16, %c0_17, %c0_18, %c0_19] : memref<3x8x16x128xbf16, #tpu.memory_space<vmem>>, vector<1x1x16x128xbf16>
    %30 = vector.shape_cast %29 : vector<1x1x16x128xbf16> to vector<16x128xbf16>
    %cst_20 = arith.constant dense<0.000000e+00> : vector<10x128xf32>
    %31 = tpu.matmul %28, %30, %cst_20 {dimension_numbers = #tpu.dot_dimension_numbers<[1], [0], [0], [1], [0, 0, 1, 1], [], []>} : vector<10x16xbf16>, vector<16x128xbf16>, vector<10x128xf32> -> vector<10x128xf32>
    %32 = arith.addf %6, %31 : vector<10x128xf32>
    %33 = vector.extract_strided_slice %10 {offsets = [0, 16], sizes = [10, 16], strides = [1, 1]} : vector<10x384xf32> to vector<10x16xf32>
    %34 = vector.extract_strided_slice %10 {offsets = [0, 144], sizes = [10, 16], strides = [1, 1]} : vector<10x384xf32> to vector<10x16xf32>
    %35 = vector.extract_strided_slice %10 {offsets = [0, 272], sizes = [10, 16], strides = [1, 1]} : vector<10x384xf32> to vector<10x16xf32>
    "tpu.trace_start"() <{level = 10 : i32, message = "ik,jk->ij"}> : () -> ()
    %cst_21 = arith.constant dense<0.000000e+00> : vector<10x10xf32>
    %36 = tpu.matmul %33, %34, %cst_21 {dimension_numbers = #tpu.dot_dimension_numbers<[1], [1], [0], [0], [0, 0, 1, 0], [], []>} : vector<10x16xf32>, vector<10x16xf32>, vector<10x10xf32> -> vector<10x10xf32>
    "tpu.trace_stop"() : () -> ()
    %c0_22 = arith.constant 0 : index
    %c0_23 = arith.constant 0 : index
    %37 = vector.load %arg10[%c0_22, %c0_23] : memref<10x10xf32, #tpu.memory_space<vmem>>, vector<10x10xf32>
    %38 = arith.addf %36, %37 : vector<10x10xf32>
    %cst_24 = arith.constant dense<0xFF800000> : vector<10xf32>
    %39 = vector.multi_reduction <maximumf>, %38, %cst_24 [1] : vector<10x10xf32> to vector<10xf32>
    %40 = vector.shape_cast %39 : vector<10xf32> to vector<10x1xf32>
    %41 = vector.broadcast %40 : vector<10x1xf32> to vector<10x10xf32>
    %42 = arith.subf %38, %41 : vector<10x10xf32>
    %43 = math.exp %42 : vector<10x10xf32>
    %cst_25 = arith.constant dense<0.000000e+00> : vector<10xf32>
    %44 = vector.multi_reduction <add>, %43, %cst_25 [1] : vector<10x10xf32> to vector<10xf32>
    %45 = vector.shape_cast %44 : vector<10xf32> to vector<10x1xf32>
    %46 = tpu.reciprocal %45 {approx = true} : vector<10x1xf32> -> vector<10x1xf32>
    %47 = vector.broadcast %46 : vector<10x1xf32> to vector<10x10xf32>
    %48 = arith.mulf %43, %47 : vector<10x10xf32>
    %cst_26 = arith.constant dense<0.000000e+00> : vector<10x16xf32>
    %49 = tpu.matmul %48, %35, %cst_26 {dimension_numbers = #tpu.dot_dimension_numbers<[1], [0], [0], [1], [0, 0, 1, 1], [], []>} : vector<10x10xf32>, vector<10x16xf32>, vector<10x16xf32> -> vector<10x16xf32>
    %50 = arith.truncf %49 : vector<10x16xf32> to vector<10x16xbf16>
    %c0_27 = arith.constant 0 : index
    %c1 = arith.constant 1 : index
    %c0_28 = arith.constant 0 : index
    %c0_29 = arith.constant 0 : index
    %51 = vector.load %arg5[%c0_27, %c1, %c0_28, %c0_29] : memref<3x8x16x128xbf16, #tpu.memory_space<vmem>>, vector<1x1x16x128xbf16>
    %52 = vector.shape_cast %51 : vector<1x1x16x128xbf16> to vector<16x128xbf16>
    %cst_30 = arith.constant dense<0.000000e+00> : vector<10x128xf32>
    %53 = tpu.matmul %50, %52, %cst_30 {dimension_numbers = #tpu.dot_dimension_numbers<[1], [0], [0], [1], [0, 0, 1, 1], [], []>} : vector<10x16xbf16>, vector<16x128xbf16>, vector<10x128xf32> -> vector<10x128xf32>
    %54 = arith.addf %32, %53 : vector<10x128xf32>
    %55 = vector.extract_strided_slice %10 {offsets = [0, 32], sizes = [10, 16], strides = [1, 1]} : vector<10x384xf32> to vector<10x16xf32>
    %56 = vector.extract_strided_slice %10 {offsets = [0, 160], sizes = [10, 16], strides = [1, 1]} : vector<10x384xf32> to vector<10x16xf32>
    %57 = vector.extract_strided_slice %10 {offsets = [0, 288], sizes = [10, 16], strides = [1, 1]} : vector<10x384xf32> to vector<10x16xf32>
    "tpu.trace_start"() <{level = 10 : i32, message = "ik,jk->ij"}> : () -> ()
    %cst_31 = arith.constant dense<0.000000e+00> : vector<10x10xf32>
    %58 = tpu.matmul %55, %56, %cst_31 {dimension_numbers = #tpu.dot_dimension_numbers<[1], [1], [0], [0], [0, 0, 1, 0], [], []>} : vector<10x16xf32>, vector<10x16xf32>, vector<10x10xf32> -> vector<10x10xf32>
    "tpu.trace_stop"() : () -> ()
    %c0_32 = arith.constant 0 : index
    %c0_33 = arith.constant 0 : index
    %59 = vector.load %arg10[%c0_32, %c0_33] : memref<10x10xf32, #tpu.memory_space<vmem>>, vector<10x10xf32>
    %60 = arith.addf %58, %59 : vector<10x10xf32>
    %cst_34 = arith.constant dense<0xFF800000> : vector<10xf32>
    %61 = vector.multi_reduction <maximumf>, %60, %cst_34 [1] : vector<10x10xf32> to vector<10xf32>
    %62 = vector.shape_cast %61 : vector<10xf32> to vector<10x1xf32>
    %63 = vector.broadcast %62 : vector<10x1xf32> to vector<10x10xf32>
    %64 = arith.subf %60, %63 : vector<10x10xf32>
    %65 = math.exp %64 : vector<10x10xf32>
    %cst_35 = arith.constant dense<0.000000e+00> : vector<10xf32>
    %66 = vector.multi_reduction <add>, %65, %cst_35 [1] : vector<10x10xf32> to vector<10xf32>
    %67 = vector.shape_cast %66 : vector<10xf32> to vector<10x1xf32>
    %68 = tpu.reciprocal %67 {approx = true} : vector<10x1xf32> -> vector<10x1xf32>
    %69 = vector.broadcast %68 : vector<10x1xf32> to vector<10x10xf32>
    %70 = arith.mulf %65, %69 : vector<10x10xf32>
    %cst_36 = arith.constant dense<0.000000e+00> : vector<10x16xf32>
    %71 = tpu.matmul %70, %57, %cst_36 {dimension_numbers = #tpu.dot_dimension_numbers<[1], [0], [0], [1], [0, 0, 1, 1], [], []>} : vector<10x10xf32>, vector<10x16xf32>, vector<10x16xf32> -> vector<10x16xf32>
    %72 = arith.truncf %71 : vector<10x16xf32> to vector<10x16xbf16>
    %c0_37 = arith.constant 0 : index
    %c2 = arith.constant 2 : index
    %c0_38 = arith.constant 0 : index
    %c0_39 = arith.constant 0 : index
    %73 = vector.load %arg5[%c0_37, %c2, %c0_38, %c0_39] : memref<3x8x16x128xbf16, #tpu.memory_space<vmem>>, vector<1x1x16x128xbf16>
    %74 = vector.shape_cast %73 : vector<1x1x16x128xbf16> to vector<16x128xbf16>
    %cst_40 = arith.constant dense<0.000000e+00> : vector<10x128xf32>
    %75 = tpu.matmul %72, %74, %cst_40 {dimension_numbers = #tpu.dot_dimension_numbers<[1], [0], [0], [1], [0, 0, 1, 1], [], []>} : vector<10x16xbf16>, vector<16x128xbf16>, vector<10x128xf32> -> vector<10x128xf32>
    %76 = arith.addf %54, %75 : vector<10x128xf32>
    %77 = vector.extract_strided_slice %10 {offsets = [0, 48], sizes = [10, 16], strides = [1, 1]} : vector<10x384xf32> to vector<10x16xf32>
    %78 = vector.extract_strided_slice %10 {offsets = [0, 176], sizes = [10, 16], strides = [1, 1]} : vector<10x384xf32> to vector<10x16xf32>
    %79 = vector.extract_strided_slice %10 {offsets = [0, 304], sizes = [10, 16], strides = [1, 1]} : vector<10x384xf32> to vector<10x16xf32>
    "tpu.trace_start"() <{level = 10 : i32, message = "ik,jk->ij"}> : () -> ()
    %cst_41 = arith.constant dense<0.000000e+00> : vector<10x10xf32>
    %80 = tpu.matmul %77, %78, %cst_41 {dimension_numbers = #tpu.dot_dimension_numbers<[1], [1], [0], [0], [0, 0, 1, 0], [], []>} : vector<10x16xf32>, vector<10x16xf32>, vector<10x10xf32> -> vector<10x10xf32>
    "tpu.trace_stop"() : () -> ()
    %c0_42 = arith.constant 0 : index
    %c0_43 = arith.constant 0 : index
    %81 = vector.load %arg10[%c0_42, %c0_43] : memref<10x10xf32, #tpu.memory_space<vmem>>, vector<10x10xf32>
    %82 = arith.addf %80, %81 : vector<10x10xf32>
    %cst_44 = arith.constant dense<0xFF800000> : vector<10xf32>
    %83 = vector.multi_reduction <maximumf>, %82, %cst_44 [1] : vector<10x10xf32> to vector<10xf32>
    %84 = vector.shape_cast %83 : vector<10xf32> to vector<10x1xf32>
    %85 = vector.broadcast %84 : vector<10x1xf32> to vector<10x10xf32>
    %86 = arith.subf %82, %85 : vector<10x10xf32>
    %87 = math.exp %86 : vector<10x10xf32>
    %cst_45 = arith.constant dense<0.000000e+00> : vector<10xf32>
    %88 = vector.multi_reduction <add>, %87, %cst_45 [1] : vector<10x10xf32> to vector<10xf32>
    %89 = vector.shape_cast %88 : vector<10xf32> to vector<10x1xf32>
    %90 = tpu.reciprocal %89 {approx = true} : vector<10x1xf32> -> vector<10x1xf32>
    %91 = vector.broadcast %90 : vector<10x1xf32> to vector<10x10xf32>
    %92 = arith.mulf %87, %91 : vector<10x10xf32>
    %cst_46 = arith.constant dense<0.000000e+00> : vector<10x16xf32>
    %93 = tpu.matmul %92, %79, %cst_46 {dimension_numbers = #tpu.dot_dimension_numbers<[1], [0], [0], [1], [0, 0, 1, 1], [], []>} : vector<10x10xf32>, vector<10x16xf32>, vector<10x16xf32> -> vector<10x16xf32>
    %94 = arith.truncf %93 : vector<10x16xf32> to vector<10x16xbf16>
    %c0_47 = arith.constant 0 : index
    %c3 = arith.constant 3 : index
    %c0_48 = arith.constant 0 : index
    %c0_49 = arith.constant 0 : index
    %95 = vector.load %arg5[%c0_47, %c3, %c0_48, %c0_49] : memref<3x8x16x128xbf16, #tpu.memory_space<vmem>>, vector<1x1x16x128xbf16>
    %96 = vector.shape_cast %95 : vector<1x1x16x128xbf16> to vector<16x128xbf16>
    %cst_50 = arith.constant dense<0.000000e+00> : vector<10x128xf32>
    %97 = tpu.matmul %94, %96, %cst_50 {dimension_numbers = #tpu.dot_dimension_numbers<[1], [0], [0], [1], [0, 0, 1, 1], [], []>} : vector<10x16xbf16>, vector<16x128xbf16>, vector<10x128xf32> -> vector<10x128xf32>
    %98 = arith.addf %76, %97 : vector<10x128xf32>
    %99 = vector.extract_strided_slice %10 {offsets = [0, 64], sizes = [10, 16], strides = [1, 1]} : vector<10x384xf32> to vector<10x16xf32>
    %100 = vector.extract_strided_slice %10 {offsets = [0, 192], sizes = [10, 16], strides = [1, 1]} : vector<10x384xf32> to vector<10x16xf32>
    %101 = vector.extract_strided_slice %10 {offsets = [0, 320], sizes = [10, 16], strides = [1, 1]} : vector<10x384xf32> to vector<10x16xf32>
    "tpu.trace_start"() <{level = 10 : i32, message = "ik,jk->ij"}> : () -> ()
    %cst_51 = arith.constant dense<0.000000e+00> : vector<10x10xf32>
    %102 = tpu.matmul %99, %100, %cst_51 {dimension_numbers = #tpu.dot_dimension_numbers<[1], [1], [0], [0], [0, 0, 1, 0], [], []>} : vector<10x16xf32>, vector<10x16xf32>, vector<10x10xf32> -> vector<10x10xf32>
    "tpu.trace_stop"() : () -> ()
    %c0_52 = arith.constant 0 : index
    %c0_53 = arith.constant 0 : index
    %103 = vector.load %arg10[%c0_52, %c0_53] : memref<10x10xf32, #tpu.memory_space<vmem>>, vector<10x10xf32>
    %104 = arith.addf %102, %103 : vector<10x10xf32>
    %cst_54 = arith.constant dense<0xFF800000> : vector<10xf32>
    %105 = vector.multi_reduction <maximumf>, %104, %cst_54 [1] : vector<10x10xf32> to vector<10xf32>
    %106 = vector.shape_cast %105 : vector<10xf32> to vector<10x1xf32>
    %107 = vector.broadcast %106 : vector<10x1xf32> to vector<10x10xf32>
    %108 = arith.subf %104, %107 : vector<10x10xf32>
    %109 = math.exp %108 : vector<10x10xf32>
    %cst_55 = arith.constant dense<0.000000e+00> : vector<10xf32>
    %110 = vector.multi_reduction <add>, %109, %cst_55 [1] : vector<10x10xf32> to vector<10xf32>
    %111 = vector.shape_cast %110 : vector<10xf32> to vector<10x1xf32>
    %112 = tpu.reciprocal %111 {approx = true} : vector<10x1xf32> -> vector<10x1xf32>
    %113 = vector.broadcast %112 : vector<10x1xf32> to vector<10x10xf32>
    %114 = arith.mulf %109, %113 : vector<10x10xf32>
    %cst_56 = arith.constant dense<0.000000e+00> : vector<10x16xf32>
    %115 = tpu.matmul %114, %101, %cst_56 {dimension_numbers = #tpu.dot_dimension_numbers<[1], [0], [0], [1], [0, 0, 1, 1], [], []>} : vector<10x10xf32>, vector<10x16xf32>, vector<10x16xf32> -> vector<10x16xf32>
    %116 = arith.truncf %115 : vector<10x16xf32> to vector<10x16xbf16>
    %c0_57 = arith.constant 0 : index
    %c4 = arith.constant 4 : index
    %c0_58 = arith.constant 0 : index
    %c0_59 = arith.constant 0 : index
    %117 = vector.load %arg5[%c0_57, %c4, %c0_58, %c0_59] : memref<3x8x16x128xbf16, #tpu.memory_space<vmem>>, vector<1x1x16x128xbf16>
    %118 = vector.shape_cast %117 : vector<1x1x16x128xbf16> to vector<16x128xbf16>
    %cst_60 = arith.constant dense<0.000000e+00> : vector<10x128xf32>
    %119 = tpu.matmul %116, %118, %cst_60 {dimension_numbers = #tpu.dot_dimension_numbers<[1], [0], [0], [1], [0, 0, 1, 1], [], []>} : vector<10x16xbf16>, vector<16x128xbf16>, vector<10x128xf32> -> vector<10x128xf32>
    %120 = arith.addf %98, %119 : vector<10x128xf32>
    %121 = vector.extract_strided_slice %10 {offsets = [0, 80], sizes = [10, 16], strides = [1, 1]} : vector<10x384xf32> to vector<10x16xf32>
    %122 = vector.extract_strided_slice %10 {offsets = [0, 208], sizes = [10, 16], strides = [1, 1]} : vector<10x384xf32> to vector<10x16xf32>
    %123 = vector.extract_strided_slice %10 {offsets = [0, 336], sizes = [10, 16], strides = [1, 1]} : vector<10x384xf32> to vector<10x16xf32>
    "tpu.trace_start"() <{level = 10 : i32, message = "ik,jk->ij"}> : () -> ()
    %cst_61 = arith.constant dense<0.000000e+00> : vector<10x10xf32>
    %124 = tpu.matmul %121, %122, %cst_61 {dimension_numbers = #tpu.dot_dimension_numbers<[1], [1], [0], [0], [0, 0, 1, 0], [], []>} : vector<10x16xf32>, vector<10x16xf32>, vector<10x10xf32> -> vector<10x10xf32>
    "tpu.trace_stop"() : () -> ()
    %c0_62 = arith.constant 0 : index
    %c0_63 = arith.constant 0 : index
    %125 = vector.load %arg10[%c0_62, %c0_63] : memref<10x10xf32, #tpu.memory_space<vmem>>, vector<10x10xf32>
    %126 = arith.addf %124, %125 : vector<10x10xf32>
    %cst_64 = arith.constant dense<0xFF800000> : vector<10xf32>
    %127 = vector.multi_reduction <maximumf>, %126, %cst_64 [1] : vector<10x10xf32> to vector<10xf32>
    %128 = vector.shape_cast %127 : vector<10xf32> to vector<10x1xf32>
    %129 = vector.broadcast %128 : vector<10x1xf32> to vector<10x10xf32>
    %130 = arith.subf %126, %129 : vector<10x10xf32>
    %131 = math.exp %130 : vector<10x10xf32>
    %cst_65 = arith.constant dense<0.000000e+00> : vector<10xf32>
    %132 = vector.multi_reduction <add>, %131, %cst_65 [1] : vector<10x10xf32> to vector<10xf32>
    %133 = vector.shape_cast %132 : vector<10xf32> to vector<10x1xf32>
    %134 = tpu.reciprocal %133 {approx = true} : vector<10x1xf32> -> vector<10x1xf32>
    %135 = vector.broadcast %134 : vector<10x1xf32> to vector<10x10xf32>
    %136 = arith.mulf %131, %135 : vector<10x10xf32>
    %cst_66 = arith.constant dense<0.000000e+00> : vector<10x16xf32>
    %137 = tpu.matmul %136, %123, %cst_66 {dimension_numbers = #tpu.dot_dimension_numbers<[1], [0], [0], [1], [0, 0, 1, 1], [], []>} : vector<10x10xf32>, vector<10x16xf32>, vector<10x16xf32> -> vector<10x16xf32>
    %138 = arith.truncf %137 : vector<10x16xf32> to vector<10x16xbf16>
    %c0_67 = arith.constant 0 : index
    %c5 = arith.constant 5 : index
    %c0_68 = arith.constant 0 : index
    %c0_69 = arith.constant 0 : index
    %139 = vector.load %arg5[%c0_67, %c5, %c0_68, %c0_69] : memref<3x8x16x128xbf16, #tpu.memory_space<vmem>>, vector<1x1x16x128xbf16>
    %140 = vector.shape_cast %139 : vector<1x1x16x128xbf16> to vector<16x128xbf16>
    %cst_70 = arith.constant dense<0.000000e+00> : vector<10x128xf32>
    %141 = tpu.matmul %138, %140, %cst_70 {dimension_numbers = #tpu.dot_dimension_numbers<[1], [0], [0], [1], [0, 0, 1, 1], [], []>} : vector<10x16xbf16>, vector<16x128xbf16>, vector<10x128xf32> -> vector<10x128xf32>
    %142 = arith.addf %120, %141 : vector<10x128xf32>
    %143 = vector.extract_strided_slice %10 {offsets = [0, 96], sizes = [10, 16], strides = [1, 1]} : vector<10x384xf32> to vector<10x16xf32>
    %144 = vector.extract_strided_slice %10 {offsets = [0, 224], sizes = [10, 16], strides = [1, 1]} : vector<10x384xf32> to vector<10x16xf32>
    %145 = vector.extract_strided_slice %10 {offsets = [0, 352], sizes = [10, 16], strides = [1, 1]} : vector<10x384xf32> to vector<10x16xf32>
    "tpu.trace_start"() <{level = 10 : i32, message = "ik,jk->ij"}> : () -> ()
    %cst_71 = arith.constant dense<0.000000e+00> : vector<10x10xf32>
    %146 = tpu.matmul %143, %144, %cst_71 {dimension_numbers = #tpu.dot_dimension_numbers<[1], [1], [0], [0], [0, 0, 1, 0], [], []>} : vector<10x16xf32>, vector<10x16xf32>, vector<10x10xf32> -> vector<10x10xf32>
    "tpu.trace_stop"() : () -> ()
    %c0_72 = arith.constant 0 : index
    %c0_73 = arith.constant 0 : index
    %147 = vector.load %arg10[%c0_72, %c0_73] : memref<10x10xf32, #tpu.memory_space<vmem>>, vector<10x10xf32>
    %148 = arith.addf %146, %147 : vector<10x10xf32>
    %cst_74 = arith.constant dense<0xFF800000> : vector<10xf32>
    %149 = vector.multi_reduction <maximumf>, %148, %cst_74 [1] : vector<10x10xf32> to vector<10xf32>
    %150 = vector.shape_cast %149 : vector<10xf32> to vector<10x1xf32>
    %151 = vector.broadcast %150 : vector<10x1xf32> to vector<10x10xf32>
    %152 = arith.subf %148, %151 : vector<10x10xf32>
    %153 = math.exp %152 : vector<10x10xf32>
    %cst_75 = arith.constant dense<0.000000e+00> : vector<10xf32>
    %154 = vector.multi_reduction <add>, %153, %cst_75 [1] : vector<10x10xf32> to vector<10xf32>
    %155 = vector.shape_cast %154 : vector<10xf32> to vector<10x1xf32>
    %156 = tpu.reciprocal %155 {approx = true} : vector<10x1xf32> -> vector<10x1xf32>
    %157 = vector.broadcast %156 : vector<10x1xf32> to vector<10x10xf32>
    %158 = arith.mulf %153, %157 : vector<10x10xf32>
    %cst_76 = arith.constant dense<0.000000e+00> : vector<10x16xf32>
    %159 = tpu.matmul %158, %145, %cst_76 {dimension_numbers = #tpu.dot_dimension_numbers<[1], [0], [0], [1], [0, 0, 1, 1], [], []>} : vector<10x10xf32>, vector<10x16xf32>, vector<10x16xf32> -> vector<10x16xf32>
    %160 = arith.truncf %159 : vector<10x16xf32> to vector<10x16xbf16>
    %c0_77 = arith.constant 0 : index
    %c6 = arith.constant 6 : index
    %c0_78 = arith.constant 0 : index
    %c0_79 = arith.constant 0 : index
    %161 = vector.load %arg5[%c0_77, %c6, %c0_78, %c0_79] : memref<3x8x16x128xbf16, #tpu.memory_space<vmem>>, vector<1x1x16x128xbf16>
    %162 = vector.shape_cast %161 : vector<1x1x16x128xbf16> to vector<16x128xbf16>
    %cst_80 = arith.constant dense<0.000000e+00> : vector<10x128xf32>
    %163 = tpu.matmul %160, %162, %cst_80 {dimension_numbers = #tpu.dot_dimension_numbers<[1], [0], [0], [1], [0, 0, 1, 1], [], []>} : vector<10x16xbf16>, vector<16x128xbf16>, vector<10x128xf32> -> vector<10x128xf32>
    %164 = arith.addf %142, %163 : vector<10x128xf32>
    %165 = vector.extract_strided_slice %10 {offsets = [0, 112], sizes = [10, 16], strides = [1, 1]} : vector<10x384xf32> to vector<10x16xf32>
    %166 = vector.extract_strided_slice %10 {offsets = [0, 240], sizes = [10, 16], strides = [1, 1]} : vector<10x384xf32> to vector<10x16xf32>
    %167 = vector.extract_strided_slice %10 {offsets = [0, 368], sizes = [10, 16], strides = [1, 1]} : vector<10x384xf32> to vector<10x16xf32>
    "tpu.trace_start"() <{level = 10 : i32, message = "ik,jk->ij"}> : () -> ()
    %cst_81 = arith.constant dense<0.000000e+00> : vector<10x10xf32>
    %168 = tpu.matmul %165, %166, %cst_81 {dimension_numbers = #tpu.dot_dimension_numbers<[1], [1], [0], [0], [0, 0, 1, 0], [], []>} : vector<10x16xf32>, vector<10x16xf32>, vector<10x10xf32> -> vector<10x10xf32>
    "tpu.trace_stop"() : () -> ()
    %c0_82 = arith.constant 0 : index
    %c0_83 = arith.constant 0 : index
    %169 = vector.load %arg10[%c0_82, %c0_83] : memref<10x10xf32, #tpu.memory_space<vmem>>, vector<10x10xf32>
    %170 = arith.addf %168, %169 : vector<10x10xf32>
    %cst_84 = arith.constant dense<0xFF800000> : vector<10xf32>
    %171 = vector.multi_reduction <maximumf>, %170, %cst_84 [1] : vector<10x10xf32> to vector<10xf32>
    %172 = vector.shape_cast %171 : vector<10xf32> to vector<10x1xf32>
    %173 = vector.broadcast %172 : vector<10x1xf32> to vector<10x10xf32>
    %174 = arith.subf %170, %173 : vector<10x10xf32>
    %175 = math.exp %174 : vector<10x10xf32>
    %cst_85 = arith.constant dense<0.000000e+00> : vector<10xf32>
    %176 = vector.multi_reduction <add>, %175, %cst_85 [1] : vector<10x10xf32> to vector<10xf32>
    %177 = vector.shape_cast %176 : vector<10xf32> to vector<10x1xf32>
    %178 = tpu.reciprocal %177 {approx = true} : vector<10x1xf32> -> vector<10x1xf32>
    %179 = vector.broadcast %178 : vector<10x1xf32> to vector<10x10xf32>
    %180 = arith.mulf %175, %179 : vector<10x10xf32>
    %cst_86 = arith.constant dense<0.000000e+00> : vector<10x16xf32>
    %181 = tpu.matmul %180, %167, %cst_86 {dimension_numbers = #tpu.dot_dimension_numbers<[1], [0], [0], [1], [0, 0, 1, 1], [], []>} : vector<10x10xf32>, vector<10x16xf32>, vector<10x16xf32> -> vector<10x16xf32>
    %182 = arith.truncf %181 : vector<10x16xf32> to vector<10x16xbf16>
    %c0_87 = arith.constant 0 : index
    %c7 = arith.constant 7 : index
    %c0_88 = arith.constant 0 : index
    %c0_89 = arith.constant 0 : index
    %183 = vector.load %arg5[%c0_87, %c7, %c0_88, %c0_89] : memref<3x8x16x128xbf16, #tpu.memory_space<vmem>>, vector<1x1x16x128xbf16>
    %184 = vector.shape_cast %183 : vector<1x1x16x128xbf16> to vector<16x128xbf16>
    %cst_90 = arith.constant dense<0.000000e+00> : vector<10x128xf32>
    %185 = tpu.matmul %182, %184, %cst_90 {dimension_numbers = #tpu.dot_dimension_numbers<[1], [0], [0], [1], [0, 0, 1, 1], [], []>} : vector<10x16xbf16>, vector<16x128xbf16>, vector<10x128xf32> -> vector<10x128xf32>
    %186 = arith.addf %164, %185 : vector<10x128xf32>
    %187 = arith.truncf %186 : vector<10x128xf32> to vector<10x128xbf16>
    %c0_91 = arith.constant 0 : index
    %c0_92 = arith.constant 0 : index
    %c0_93 = arith.constant 0 : index
    %188 = vector.load %arg6[%c0_91, %c0_92, %c0_93] : memref<3x128x512xbf16, #tpu.memory_space<vmem>>, vector<1x128x512xbf16>
    %189 = vector.shape_cast %188 : vector<1x128x512xbf16> to vector<128x512xbf16>
    %cst_94 = arith.constant dense<0.000000e+00> : vector<10x512xf32>
    %190 = tpu.matmul %187, %189, %cst_94 {dimension_numbers = #tpu.dot_dimension_numbers<[1], [0], [0], [1], [0, 0, 1, 1], [], []>} : vector<10x128xbf16>, vector<128x512xbf16>, vector<10x512xf32> -> vector<10x512xf32>
    %c0_95 = arith.constant 0 : index
    %c0_96 = arith.constant 0 : index
    %c0_97 = arith.constant 0 : index
    %191 = vector.load %arg7[%c0_95, %c0_96, %c0_97] : memref<3x1x512xf32, #tpu.memory_space<vmem>>, vector<1x1x512xf32>
    %192 = vector.shape_cast %191 : vector<1x1x512xf32> to vector<1x512xf32>
    %193 = vector.broadcast %192 : vector<1x512xf32> to vector<10x512xf32>
    %194 = arith.addf %190, %193 : vector<10x512xf32>
    %cst_98 = arith.constant 0.000000e+00 : f32
    %195 = vector.broadcast %cst_98 : f32 to vector<10x512xf32>
    %196 = arith.maximumf %194, %195 : vector<10x512xf32>
    %197 = arith.truncf %196 : vector<10x512xf32> to vector<10x512xbf16>
    %c0_99 = arith.constant 0 : index
    %c0_100 = arith.constant 0 : index
    %c0_101 = arith.constant 0 : index
    %198 = vector.load %arg8[%c0_99, %c0_100, %c0_101] : memref<3x512x128xbf16, #tpu.memory_space<vmem>>, vector<1x512x128xbf16>
    %199 = vector.shape_cast %198 : vector<1x512x128xbf16> to vector<512x128xbf16>
    %cst_102 = arith.constant dense<0.000000e+00> : vector<10x128xf32>
    %200 = tpu.matmul %197, %199, %cst_102 {dimension_numbers = #tpu.dot_dimension_numbers<[1], [0], [0], [1], [0, 0, 1, 1], [], []>} : vector<10x512xbf16>, vector<512x128xbf16>, vector<10x128xf32> -> vector<10x128xf32>
    %201 = arith.addf %186, %200 : vector<10x128xf32>
    %c0_103 = arith.constant 0 : index
    %c0_104 = arith.constant 0 : index
    %c0_105 = arith.constant 0 : index
    %202 = vector.load %arg9[%c0_103, %c0_104, %c0_105] : memref<3x1x128xf32, #tpu.memory_space<vmem>>, vector<1x1x128xf32>
    %203 = vector.shape_cast %202 : vector<1x1x128xf32> to vector<1x128xf32>
    %204 = vector.broadcast %203 : vector<1x128xf32> to vector<10x128xf32>
    %205 = arith.addf %201, %204 : vector<10x128xf32>
    %206 = arith.truncf %205 : vector<10x128xf32> to vector<10x128xbf16>
    %c1_106 = arith.constant 1 : index
    %c0_107 = arith.constant 0 : index
    %c0_108 = arith.constant 0 : index
    %207 = vector.load %arg4[%c1_106, %c0_107, %c0_108] : memref<3x128x384xbf16, #tpu.memory_space<vmem>>, vector<1x128x384xbf16>
    %208 = vector.shape_cast %207 : vector<1x128x384xbf16> to vector<128x384xbf16>
    %cst_109 = arith.constant dense<0.000000e+00> : vector<10x384xf32>
    %209 = tpu.matmul %206, %208, %cst_109 {dimension_numbers = #tpu.dot_dimension_numbers<[1], [0], [0], [1], [0, 0, 1, 1], [], []>} : vector<10x128xbf16>, vector<128x384xbf16>, vector<10x384xf32> -> vector<10x384xf32>
    %210 = vector.extract_strided_slice %209 {offsets = [0, 0], sizes = [10, 16], strides = [1, 1]} : vector<10x384xf32> to vector<10x16xf32>
    %211 = vector.extract_strided_slice %209 {offsets = [0, 128], sizes = [10, 16], strides = [1, 1]} : vector<10x384xf32> to vector<10x16xf32>
    %212 = vector.extract_strided_slice %209 {offsets = [0, 256], sizes = [10, 16], strides = [1, 1]} : vector<10x384xf32> to vector<10x16xf32>
    "tpu.trace_start"() <{level = 10 : i32, message = "ik,jk->ij"}> : () -> ()
    %cst_110 = arith.constant dense<0.000000e+00> : vector<10x10xf32>
    %213 = tpu.matmul %210, %211, %cst_110 {dimension_numbers = #tpu.dot_dimension_numbers<[1], [1], [0], [0], [0, 0, 1, 0], [], []>} : vector<10x16xf32>, vector<10x16xf32>, vector<10x10xf32> -> vector<10x10xf32>
    "tpu.trace_stop"() : () -> ()
    %c0_111 = arith.constant 0 : index
    %c0_112 = arith.constant 0 : index
    %214 = vector.load %arg10[%c0_111, %c0_112] : memref<10x10xf32, #tpu.memory_space<vmem>>, vector<10x10xf32>
    %215 = arith.addf %213, %214 : vector<10x10xf32>
    %cst_113 = arith.constant dense<0xFF800000> : vector<10xf32>
    %216 = vector.multi_reduction <maximumf>, %215, %cst_113 [1] : vector<10x10xf32> to vector<10xf32>
    %217 = vector.shape_cast %216 : vector<10xf32> to vector<10x1xf32>
    %218 = vector.broadcast %217 : vector<10x1xf32> to vector<10x10xf32>
    %219 = arith.subf %215, %218 : vector<10x10xf32>
    %220 = math.exp %219 : vector<10x10xf32>
    %cst_114 = arith.constant dense<0.000000e+00> : vector<10xf32>
    %221 = vector.multi_reduction <add>, %220, %cst_114 [1] : vector<10x10xf32> to vector<10xf32>
    %222 = vector.shape_cast %221 : vector<10xf32> to vector<10x1xf32>
    %223 = tpu.reciprocal %222 {approx = true} : vector<10x1xf32> -> vector<10x1xf32>
    %224 = vector.broadcast %223 : vector<10x1xf32> to vector<10x10xf32>
    %225 = arith.mulf %220, %224 : vector<10x10xf32>
    %cst_115 = arith.constant dense<0.000000e+00> : vector<10x16xf32>
    %226 = tpu.matmul %225, %212, %cst_115 {dimension_numbers = #tpu.dot_dimension_numbers<[1], [0], [0], [1], [0, 0, 1, 1], [], []>} : vector<10x10xf32>, vector<10x16xf32>, vector<10x16xf32> -> vector<10x16xf32>
    %227 = arith.truncf %226 : vector<10x16xf32> to vector<10x16xbf16>
    %c1_116 = arith.constant 1 : index
    %c0_117 = arith.constant 0 : index
    %c0_118 = arith.constant 0 : index
    %c0_119 = arith.constant 0 : index
    %228 = vector.load %arg5[%c1_116, %c0_117, %c0_118, %c0_119] : memref<3x8x16x128xbf16, #tpu.memory_space<vmem>>, vector<1x1x16x128xbf16>
    %229 = vector.shape_cast %228 : vector<1x1x16x128xbf16> to vector<16x128xbf16>
    %cst_120 = arith.constant dense<0.000000e+00> : vector<10x128xf32>
    %230 = tpu.matmul %227, %229, %cst_120 {dimension_numbers = #tpu.dot_dimension_numbers<[1], [0], [0], [1], [0, 0, 1, 1], [], []>} : vector<10x16xbf16>, vector<16x128xbf16>, vector<10x128xf32> -> vector<10x128xf32>
    %231 = arith.addf %205, %230 : vector<10x128xf32>
    %232 = vector.extract_strided_slice %209 {offsets = [0, 16], sizes = [10, 16], strides = [1, 1]} : vector<10x384xf32> to vector<10x16xf32>
    %233 = vector.extract_strided_slice %209 {offsets = [0, 144], sizes = [10, 16], strides = [1, 1]} : vector<10x384xf32> to vector<10x16xf32>
    %234 = vector.extract_strided_slice %209 {offsets = [0, 272], sizes = [10, 16], strides = [1, 1]} : vector<10x384xf32> to vector<10x16xf32>
    "tpu.trace_start"() <{level = 10 : i32, message = "ik,jk->ij"}> : () -> ()
    %cst_121 = arith.constant dense<0.000000e+00> : vector<10x10xf32>
    %235 = tpu.matmul %232, %233, %cst_121 {dimension_numbers = #tpu.dot_dimension_numbers<[1], [1], [0], [0], [0, 0, 1, 0], [], []>} : vector<10x16xf32>, vector<10x16xf32>, vector<10x10xf32> -> vector<10x10xf32>
    "tpu.trace_stop"() : () -> ()
    %c0_122 = arith.constant 0 : index
    %c0_123 = arith.constant 0 : index
    %236 = vector.load %arg10[%c0_122, %c0_123] : memref<10x10xf32, #tpu.memory_space<vmem>>, vector<10x10xf32>
    %237 = arith.addf %235, %236 : vector<10x10xf32>
    %cst_124 = arith.constant dense<0xFF800000> : vector<10xf32>
    %238 = vector.multi_reduction <maximumf>, %237, %cst_124 [1] : vector<10x10xf32> to vector<10xf32>
    %239 = vector.shape_cast %238 : vector<10xf32> to vector<10x1xf32>
    %240 = vector.broadcast %239 : vector<10x1xf32> to vector<10x10xf32>
    %241 = arith.subf %237, %240 : vector<10x10xf32>
    %242 = math.exp %241 : vector<10x10xf32>
    %cst_125 = arith.constant dense<0.000000e+00> : vector<10xf32>
    %243 = vector.multi_reduction <add>, %242, %cst_125 [1] : vector<10x10xf32> to vector<10xf32>
    %244 = vector.shape_cast %243 : vector<10xf32> to vector<10x1xf32>
    %245 = tpu.reciprocal %244 {approx = true} : vector<10x1xf32> -> vector<10x1xf32>
    %246 = vector.broadcast %245 : vector<10x1xf32> to vector<10x10xf32>
    %247 = arith.mulf %242, %246 : vector<10x10xf32>
    %cst_126 = arith.constant dense<0.000000e+00> : vector<10x16xf32>
    %248 = tpu.matmul %247, %234, %cst_126 {dimension_numbers = #tpu.dot_dimension_numbers<[1], [0], [0], [1], [0, 0, 1, 1], [], []>} : vector<10x10xf32>, vector<10x16xf32>, vector<10x16xf32> -> vector<10x16xf32>
    %249 = arith.truncf %248 : vector<10x16xf32> to vector<10x16xbf16>
    %c1_127 = arith.constant 1 : index
    %c1_128 = arith.constant 1 : index
    %c0_129 = arith.constant 0 : index
    %c0_130 = arith.constant 0 : index
    %250 = vector.load %arg5[%c1_127, %c1_128, %c0_129, %c0_130] : memref<3x8x16x128xbf16, #tpu.memory_space<vmem>>, vector<1x1x16x128xbf16>
    %251 = vector.shape_cast %250 : vector<1x1x16x128xbf16> to vector<16x128xbf16>
    %cst_131 = arith.constant dense<0.000000e+00> : vector<10x128xf32>
    %252 = tpu.matmul %249, %251, %cst_131 {dimension_numbers = #tpu.dot_dimension_numbers<[1], [0], [0], [1], [0, 0, 1, 1], [], []>} : vector<10x16xbf16>, vector<16x128xbf16>, vector<10x128xf32> -> vector<10x128xf32>
    %253 = arith.addf %231, %252 : vector<10x128xf32>
    %254 = vector.extract_strided_slice %209 {offsets = [0, 32], sizes = [10, 16], strides = [1, 1]} : vector<10x384xf32> to vector<10x16xf32>
    %255 = vector.extract_strided_slice %209 {offsets = [0, 160], sizes = [10, 16], strides = [1, 1]} : vector<10x384xf32> to vector<10x16xf32>
    %256 = vector.extract_strided_slice %209 {offsets = [0, 288], sizes = [10, 16], strides = [1, 1]} : vector<10x384xf32> to vector<10x16xf32>
    "tpu.trace_start"() <{level = 10 : i32, message = "ik,jk->ij"}> : () -> ()
    %cst_132 = arith.constant dense<0.000000e+00> : vector<10x10xf32>
    %257 = tpu.matmul %254, %255, %cst_132 {dimension_numbers = #tpu.dot_dimension_numbers<[1], [1], [0], [0], [0, 0, 1, 0], [], []>} : vector<10x16xf32>, vector<10x16xf32>, vector<10x10xf32> -> vector<10x10xf32>
    "tpu.trace_stop"() : () -> ()
    %c0_133 = arith.constant 0 : index
    %c0_134 = arith.constant 0 : index
    %258 = vector.load %arg10[%c0_133, %c0_134] : memref<10x10xf32, #tpu.memory_space<vmem>>, vector<10x10xf32>
    %259 = arith.addf %257, %258 : vector<10x10xf32>
    %cst_135 = arith.constant dense<0xFF800000> : vector<10xf32>
    %260 = vector.multi_reduction <maximumf>, %259, %cst_135 [1] : vector<10x10xf32> to vector<10xf32>
    %261 = vector.shape_cast %260 : vector<10xf32> to vector<10x1xf32>
    %262 = vector.broadcast %261 : vector<10x1xf32> to vector<10x10xf32>
    %263 = arith.subf %259, %262 : vector<10x10xf32>
    %264 = math.exp %263 : vector<10x10xf32>
    %cst_136 = arith.constant dense<0.000000e+00> : vector<10xf32>
    %265 = vector.multi_reduction <add>, %264, %cst_136 [1] : vector<10x10xf32> to vector<10xf32>
    %266 = vector.shape_cast %265 : vector<10xf32> to vector<10x1xf32>
    %267 = tpu.reciprocal %266 {approx = true} : vector<10x1xf32> -> vector<10x1xf32>
    %268 = vector.broadcast %267 : vector<10x1xf32> to vector<10x10xf32>
    %269 = arith.mulf %264, %268 : vector<10x10xf32>
    %cst_137 = arith.constant dense<0.000000e+00> : vector<10x16xf32>
    %270 = tpu.matmul %269, %256, %cst_137 {dimension_numbers = #tpu.dot_dimension_numbers<[1], [0], [0], [1], [0, 0, 1, 1], [], []>} : vector<10x10xf32>, vector<10x16xf32>, vector<10x16xf32> -> vector<10x16xf32>
    %271 = arith.truncf %270 : vector<10x16xf32> to vector<10x16xbf16>
    %c1_138 = arith.constant 1 : index
    %c2_139 = arith.constant 2 : index
    %c0_140 = arith.constant 0 : index
    %c0_141 = arith.constant 0 : index
    %272 = vector.load %arg5[%c1_138, %c2_139, %c0_140, %c0_141] : memref<3x8x16x128xbf16, #tpu.memory_space<vmem>>, vector<1x1x16x128xbf16>
    %273 = vector.shape_cast %272 : vector<1x1x16x128xbf16> to vector<16x128xbf16>
    %cst_142 = arith.constant dense<0.000000e+00> : vector<10x128xf32>
    %274 = tpu.matmul %271, %273, %cst_142 {dimension_numbers = #tpu.dot_dimension_numbers<[1], [0], [0], [1], [0, 0, 1, 1], [], []>} : vector<10x16xbf16>, vector<16x128xbf16>, vector<10x128xf32> -> vector<10x128xf32>
    %275 = arith.addf %253, %274 : vector<10x128xf32>
    %276 = vector.extract_strided_slice %209 {offsets = [0, 48], sizes = [10, 16], strides = [1, 1]} : vector<10x384xf32> to vector<10x16xf32>
    %277 = vector.extract_strided_slice %209 {offsets = [0, 176], sizes = [10, 16], strides = [1, 1]} : vector<10x384xf32> to vector<10x16xf32>
    %278 = vector.extract_strided_slice %209 {offsets = [0, 304], sizes = [10, 16], strides = [1, 1]} : vector<10x384xf32> to vector<10x16xf32>
    "tpu.trace_start"() <{level = 10 : i32, message = "ik,jk->ij"}> : () -> ()
    %cst_143 = arith.constant dense<0.000000e+00> : vector<10x10xf32>
    %279 = tpu.matmul %276, %277, %cst_143 {dimension_numbers = #tpu.dot_dimension_numbers<[1], [1], [0], [0], [0, 0, 1, 0], [], []>} : vector<10x16xf32>, vector<10x16xf32>, vector<10x10xf32> -> vector<10x10xf32>
    "tpu.trace_stop"() : () -> ()
    %c0_144 = arith.constant 0 : index
    %c0_145 = arith.constant 0 : index
    %280 = vector.load %arg10[%c0_144, %c0_145] : memref<10x10xf32, #tpu.memory_space<vmem>>, vector<10x10xf32>
    %281 = arith.addf %279, %280 : vector<10x10xf32>
    %cst_146 = arith.constant dense<0xFF800000> : vector<10xf32>
    %282 = vector.multi_reduction <maximumf>, %281, %cst_146 [1] : vector<10x10xf32> to vector<10xf32>
    %283 = vector.shape_cast %282 : vector<10xf32> to vector<10x1xf32>
    %284 = vector.broadcast %283 : vector<10x1xf32> to vector<10x10xf32>
    %285 = arith.subf %281, %284 : vector<10x10xf32>
    %286 = math.exp %285 : vector<10x10xf32>
    %cst_147 = arith.constant dense<0.000000e+00> : vector<10xf32>
    %287 = vector.multi_reduction <add>, %286, %cst_147 [1] : vector<10x10xf32> to vector<10xf32>
    %288 = vector.shape_cast %287 : vector<10xf32> to vector<10x1xf32>
    %289 = tpu.reciprocal %288 {approx = true} : vector<10x1xf32> -> vector<10x1xf32>
    %290 = vector.broadcast %289 : vector<10x1xf32> to vector<10x10xf32>
    %291 = arith.mulf %286, %290 : vector<10x10xf32>
    %cst_148 = arith.constant dense<0.000000e+00> : vector<10x16xf32>
    %292 = tpu.matmul %291, %278, %cst_148 {dimension_numbers = #tpu.dot_dimension_numbers<[1], [0], [0], [1], [0, 0, 1, 1], [], []>} : vector<10x10xf32>, vector<10x16xf32>, vector<10x16xf32> -> vector<10x16xf32>
    %293 = arith.truncf %292 : vector<10x16xf32> to vector<10x16xbf16>
    %c1_149 = arith.constant 1 : index
    %c3_150 = arith.constant 3 : index
    %c0_151 = arith.constant 0 : index
    %c0_152 = arith.constant 0 : index
    %294 = vector.load %arg5[%c1_149, %c3_150, %c0_151, %c0_152] : memref<3x8x16x128xbf16, #tpu.memory_space<vmem>>, vector<1x1x16x128xbf16>
    %295 = vector.shape_cast %294 : vector<1x1x16x128xbf16> to vector<16x128xbf16>
    %cst_153 = arith.constant dense<0.000000e+00> : vector<10x128xf32>
    %296 = tpu.matmul %293, %295, %cst_153 {dimension_numbers = #tpu.dot_dimension_numbers<[1], [0], [0], [1], [0, 0, 1, 1], [], []>} : vector<10x16xbf16>, vector<16x128xbf16>, vector<10x128xf32> -> vector<10x128xf32>
    %297 = arith.addf %275, %296 : vector<10x128xf32>
    %298 = vector.extract_strided_slice %209 {offsets = [0, 64], sizes = [10, 16], strides = [1, 1]} : vector<10x384xf32> to vector<10x16xf32>
    %299 = vector.extract_strided_slice %209 {offsets = [0, 192], sizes = [10, 16], strides = [1, 1]} : vector<10x384xf32> to vector<10x16xf32>
    %300 = vector.extract_strided_slice %209 {offsets = [0, 320], sizes = [10, 16], strides = [1, 1]} : vector<10x384xf32> to vector<10x16xf32>
    "tpu.trace_start"() <{level = 10 : i32, message = "ik,jk->ij"}> : () -> ()
    %cst_154 = arith.constant dense<0.000000e+00> : vector<10x10xf32>
    %301 = tpu.matmul %298, %299, %cst_154 {dimension_numbers = #tpu.dot_dimension_numbers<[1], [1], [0], [0], [0, 0, 1, 0], [], []>} : vector<10x16xf32>, vector<10x16xf32>, vector<10x10xf32> -> vector<10x10xf32>
    "tpu.trace_stop"() : () -> ()
    %c0_155 = arith.constant 0 : index
    %c0_156 = arith.constant 0 : index
    %302 = vector.load %arg10[%c0_155, %c0_156] : memref<10x10xf32, #tpu.memory_space<vmem>>, vector<10x10xf32>
    %303 = arith.addf %301, %302 : vector<10x10xf32>
    %cst_157 = arith.constant dense<0xFF800000> : vector<10xf32>
    %304 = vector.multi_reduction <maximumf>, %303, %cst_157 [1] : vector<10x10xf32> to vector<10xf32>
    %305 = vector.shape_cast %304 : vector<10xf32> to vector<10x1xf32>
    %306 = vector.broadcast %305 : vector<10x1xf32> to vector<10x10xf32>
    %307 = arith.subf %303, %306 : vector<10x10xf32>
    %308 = math.exp %307 : vector<10x10xf32>
    %cst_158 = arith.constant dense<0.000000e+00> : vector<10xf32>
    %309 = vector.multi_reduction <add>, %308, %cst_158 [1] : vector<10x10xf32> to vector<10xf32>
    %310 = vector.shape_cast %309 : vector<10xf32> to vector<10x1xf32>
    %311 = tpu.reciprocal %310 {approx = true} : vector<10x1xf32> -> vector<10x1xf32>
    %312 = vector.broadcast %311 : vector<10x1xf32> to vector<10x10xf32>
    %313 = arith.mulf %308, %312 : vector<10x10xf32>
    %cst_159 = arith.constant dense<0.000000e+00> : vector<10x16xf32>
    %314 = tpu.matmul %313, %300, %cst_159 {dimension_numbers = #tpu.dot_dimension_numbers<[1], [0], [0], [1], [0, 0, 1, 1], [], []>} : vector<10x10xf32>, vector<10x16xf32>, vector<10x16xf32> -> vector<10x16xf32>
    %315 = arith.truncf %314 : vector<10x16xf32> to vector<10x16xbf16>
    %c1_160 = arith.constant 1 : index
    %c4_161 = arith.constant 4 : index
    %c0_162 = arith.constant 0 : index
    %c0_163 = arith.constant 0 : index
    %316 = vector.load %arg5[%c1_160, %c4_161, %c0_162, %c0_163] : memref<3x8x16x128xbf16, #tpu.memory_space<vmem>>, vector<1x1x16x128xbf16>
    %317 = vector.shape_cast %316 : vector<1x1x16x128xbf16> to vector<16x128xbf16>
    %cst_164 = arith.constant dense<0.000000e+00> : vector<10x128xf32>
    %318 = tpu.matmul %315, %317, %cst_164 {dimension_numbers = #tpu.dot_dimension_numbers<[1], [0], [0], [1], [0, 0, 1, 1], [], []>} : vector<10x16xbf16>, vector<16x128xbf16>, vector<10x128xf32> -> vector<10x128xf32>
    %319 = arith.addf %297, %318 : vector<10x128xf32>
    %320 = vector.extract_strided_slice %209 {offsets = [0, 80], sizes = [10, 16], strides = [1, 1]} : vector<10x384xf32> to vector<10x16xf32>
    %321 = vector.extract_strided_slice %209 {offsets = [0, 208], sizes = [10, 16], strides = [1, 1]} : vector<10x384xf32> to vector<10x16xf32>
    %322 = vector.extract_strided_slice %209 {offsets = [0, 336], sizes = [10, 16], strides = [1, 1]} : vector<10x384xf32> to vector<10x16xf32>
    "tpu.trace_start"() <{level = 10 : i32, message = "ik,jk->ij"}> : () -> ()
    %cst_165 = arith.constant dense<0.000000e+00> : vector<10x10xf32>
    %323 = tpu.matmul %320, %321, %cst_165 {dimension_numbers = #tpu.dot_dimension_numbers<[1], [1], [0], [0], [0, 0, 1, 0], [], []>} : vector<10x16xf32>, vector<10x16xf32>, vector<10x10xf32> -> vector<10x10xf32>
    "tpu.trace_stop"() : () -> ()
    %c0_166 = arith.constant 0 : index
    %c0_167 = arith.constant 0 : index
    %324 = vector.load %arg10[%c0_166, %c0_167] : memref<10x10xf32, #tpu.memory_space<vmem>>, vector<10x10xf32>
    %325 = arith.addf %323, %324 : vector<10x10xf32>
    %cst_168 = arith.constant dense<0xFF800000> : vector<10xf32>
    %326 = vector.multi_reduction <maximumf>, %325, %cst_168 [1] : vector<10x10xf32> to vector<10xf32>
    %327 = vector.shape_cast %326 : vector<10xf32> to vector<10x1xf32>
    %328 = vector.broadcast %327 : vector<10x1xf32> to vector<10x10xf32>
    %329 = arith.subf %325, %328 : vector<10x10xf32>
    %330 = math.exp %329 : vector<10x10xf32>
    %cst_169 = arith.constant dense<0.000000e+00> : vector<10xf32>
    %331 = vector.multi_reduction <add>, %330, %cst_169 [1] : vector<10x10xf32> to vector<10xf32>
    %332 = vector.shape_cast %331 : vector<10xf32> to vector<10x1xf32>
    %333 = tpu.reciprocal %332 {approx = true} : vector<10x1xf32> -> vector<10x1xf32>
    %334 = vector.broadcast %333 : vector<10x1xf32> to vector<10x10xf32>
    %335 = arith.mulf %330, %334 : vector<10x10xf32>
    %cst_170 = arith.constant dense<0.000000e+00> : vector<10x16xf32>
    %336 = tpu.matmul %335, %322, %cst_170 {dimension_numbers = #tpu.dot_dimension_numbers<[1], [0], [0], [1], [0, 0, 1, 1], [], []>} : vector<10x10xf32>, vector<10x16xf32>, vector<10x16xf32> -> vector<10x16xf32>
    %337 = arith.truncf %336 : vector<10x16xf32> to vector<10x16xbf16>
    %c1_171 = arith.constant 1 : index
    %c5_172 = arith.constant 5 : index
    %c0_173 = arith.constant 0 : index
    %c0_174 = arith.constant 0 : index
    %338 = vector.load %arg5[%c1_171, %c5_172, %c0_173, %c0_174] : memref<3x8x16x128xbf16, #tpu.memory_space<vmem>>, vector<1x1x16x128xbf16>
    %339 = vector.shape_cast %338 : vector<1x1x16x128xbf16> to vector<16x128xbf16>
    %cst_175 = arith.constant dense<0.000000e+00> : vector<10x128xf32>
    %340 = tpu.matmul %337, %339, %cst_175 {dimension_numbers = #tpu.dot_dimension_numbers<[1], [0], [0], [1], [0, 0, 1, 1], [], []>} : vector<10x16xbf16>, vector<16x128xbf16>, vector<10x128xf32> -> vector<10x128xf32>
    %341 = arith.addf %319, %340 : vector<10x128xf32>
    %342 = vector.extract_strided_slice %209 {offsets = [0, 96], sizes = [10, 16], strides = [1, 1]} : vector<10x384xf32> to vector<10x16xf32>
    %343 = vector.extract_strided_slice %209 {offsets = [0, 224], sizes = [10, 16], strides = [1, 1]} : vector<10x384xf32> to vector<10x16xf32>
    %344 = vector.extract_strided_slice %209 {offsets = [0, 352], sizes = [10, 16], strides = [1, 1]} : vector<10x384xf32> to vector<10x16xf32>
    "tpu.trace_start"() <{level = 10 : i32, message = "ik,jk->ij"}> : () -> ()
    %cst_176 = arith.constant dense<0.000000e+00> : vector<10x10xf32>
    %345 = tpu.matmul %342, %343, %cst_176 {dimension_numbers = #tpu.dot_dimension_numbers<[1], [1], [0], [0], [0, 0, 1, 0], [], []>} : vector<10x16xf32>, vector<10x16xf32>, vector<10x10xf32> -> vector<10x10xf32>
    "tpu.trace_stop"() : () -> ()
    %c0_177 = arith.constant 0 : index
    %c0_178 = arith.constant 0 : index
    %346 = vector.load %arg10[%c0_177, %c0_178] : memref<10x10xf32, #tpu.memory_space<vmem>>, vector<10x10xf32>
    %347 = arith.addf %345, %346 : vector<10x10xf32>
    %cst_179 = arith.constant dense<0xFF800000> : vector<10xf32>
    %348 = vector.multi_reduction <maximumf>, %347, %cst_179 [1] : vector<10x10xf32> to vector<10xf32>
    %349 = vector.shape_cast %348 : vector<10xf32> to vector<10x1xf32>
    %350 = vector.broadcast %349 : vector<10x1xf32> to vector<10x10xf32>
    %351 = arith.subf %347, %350 : vector<10x10xf32>
    %352 = math.exp %351 : vector<10x10xf32>
    %cst_180 = arith.constant dense<0.000000e+00> : vector<10xf32>
    %353 = vector.multi_reduction <add>, %352, %cst_180 [1] : vector<10x10xf32> to vector<10xf32>
    %354 = vector.shape_cast %353 : vector<10xf32> to vector<10x1xf32>
    %355 = tpu.reciprocal %354 {approx = true} : vector<10x1xf32> -> vector<10x1xf32>
    %356 = vector.broadcast %355 : vector<10x1xf32> to vector<10x10xf32>
    %357 = arith.mulf %352, %356 : vector<10x10xf32>
    %cst_181 = arith.constant dense<0.000000e+00> : vector<10x16xf32>
    %358 = tpu.matmul %357, %344, %cst_181 {dimension_numbers = #tpu.dot_dimension_numbers<[1], [0], [0], [1], [0, 0, 1, 1], [], []>} : vector<10x10xf32>, vector<10x16xf32>, vector<10x16xf32> -> vector<10x16xf32>
    %359 = arith.truncf %358 : vector<10x16xf32> to vector<10x16xbf16>
    %c1_182 = arith.constant 1 : index
    %c6_183 = arith.constant 6 : index
    %c0_184 = arith.constant 0 : index
    %c0_185 = arith.constant 0 : index
    %360 = vector.load %arg5[%c1_182, %c6_183, %c0_184, %c0_185] : memref<3x8x16x128xbf16, #tpu.memory_space<vmem>>, vector<1x1x16x128xbf16>
    %361 = vector.shape_cast %360 : vector<1x1x16x128xbf16> to vector<16x128xbf16>
    %cst_186 = arith.constant dense<0.000000e+00> : vector<10x128xf32>
    %362 = tpu.matmul %359, %361, %cst_186 {dimension_numbers = #tpu.dot_dimension_numbers<[1], [0], [0], [1], [0, 0, 1, 1], [], []>} : vector<10x16xbf16>, vector<16x128xbf16>, vector<10x128xf32> -> vector<10x128xf32>
    %363 = arith.addf %341, %362 : vector<10x128xf32>
    %364 = vector.extract_strided_slice %209 {offsets = [0, 112], sizes = [10, 16], strides = [1, 1]} : vector<10x384xf32> to vector<10x16xf32>
    %365 = vector.extract_strided_slice %209 {offsets = [0, 240], sizes = [10, 16], strides = [1, 1]} : vector<10x384xf32> to vector<10x16xf32>
    %366 = vector.extract_strided_slice %209 {offsets = [0, 368], sizes = [10, 16], strides = [1, 1]} : vector<10x384xf32> to vector<10x16xf32>
    "tpu.trace_start"() <{level = 10 : i32, message = "ik,jk->ij"}> : () -> ()
    %cst_187 = arith.constant dense<0.000000e+00> : vector<10x10xf32>
    %367 = tpu.matmul %364, %365, %cst_187 {dimension_numbers = #tpu.dot_dimension_numbers<[1], [1], [0], [0], [0, 0, 1, 0], [], []>} : vector<10x16xf32>, vector<10x16xf32>, vector<10x10xf32> -> vector<10x10xf32>
    "tpu.trace_stop"() : () -> ()
    %c0_188 = arith.constant 0 : index
    %c0_189 = arith.constant 0 : index
    %368 = vector.load %arg10[%c0_188, %c0_189] : memref<10x10xf32, #tpu.memory_space<vmem>>, vector<10x10xf32>
    %369 = arith.addf %367, %368 : vector<10x10xf32>
    %cst_190 = arith.constant dense<0xFF800000> : vector<10xf32>
    %370 = vector.multi_reduction <maximumf>, %369, %cst_190 [1] : vector<10x10xf32> to vector<10xf32>
    %371 = vector.shape_cast %370 : vector<10xf32> to vector<10x1xf32>
    %372 = vector.broadcast %371 : vector<10x1xf32> to vector<10x10xf32>
    %373 = arith.subf %369, %372 : vector<10x10xf32>
    %374 = math.exp %373 : vector<10x10xf32>
    %cst_191 = arith.constant dense<0.000000e+00> : vector<10xf32>
    %375 = vector.multi_reduction <add>, %374, %cst_191 [1] : vector<10x10xf32> to vector<10xf32>
    %376 = vector.shape_cast %375 : vector<10xf32> to vector<10x1xf32>
    %377 = tpu.reciprocal %376 {approx = true} : vector<10x1xf32> -> vector<10x1xf32>
    %378 = vector.broadcast %377 : vector<10x1xf32> to vector<10x10xf32>
    %379 = arith.mulf %374, %378 : vector<10x10xf32>
    %cst_192 = arith.constant dense<0.000000e+00> : vector<10x16xf32>
    %380 = tpu.matmul %379, %366, %cst_192 {dimension_numbers = #tpu.dot_dimension_numbers<[1], [0], [0], [1], [0, 0, 1, 1], [], []>} : vector<10x10xf32>, vector<10x16xf32>, vector<10x16xf32> -> vector<10x16xf32>
    %381 = arith.truncf %380 : vector<10x16xf32> to vector<10x16xbf16>
    %c1_193 = arith.constant 1 : index
    %c7_194 = arith.constant 7 : index
    %c0_195 = arith.constant 0 : index
    %c0_196 = arith.constant 0 : index
    %382 = vector.load %arg5[%c1_193, %c7_194, %c0_195, %c0_196] : memref<3x8x16x128xbf16, #tpu.memory_space<vmem>>, vector<1x1x16x128xbf16>
    %383 = vector.shape_cast %382 : vector<1x1x16x128xbf16> to vector<16x128xbf16>
    %cst_197 = arith.constant dense<0.000000e+00> : vector<10x128xf32>
    %384 = tpu.matmul %381, %383, %cst_197 {dimension_numbers = #tpu.dot_dimension_numbers<[1], [0], [0], [1], [0, 0, 1, 1], [], []>} : vector<10x16xbf16>, vector<16x128xbf16>, vector<10x128xf32> -> vector<10x128xf32>
    %385 = arith.addf %363, %384 : vector<10x128xf32>
    %386 = arith.truncf %385 : vector<10x128xf32> to vector<10x128xbf16>
    %c1_198 = arith.constant 1 : index
    %c0_199 = arith.constant 0 : index
    %c0_200 = arith.constant 0 : index
    %387 = vector.load %arg6[%c1_198, %c0_199, %c0_200] : memref<3x128x512xbf16, #tpu.memory_space<vmem>>, vector<1x128x512xbf16>
    %388 = vector.shape_cast %387 : vector<1x128x512xbf16> to vector<128x512xbf16>
    %cst_201 = arith.constant dense<0.000000e+00> : vector<10x512xf32>
    %389 = tpu.matmul %386, %388, %cst_201 {dimension_numbers = #tpu.dot_dimension_numbers<[1], [0], [0], [1], [0, 0, 1, 1], [], []>} : vector<10x128xbf16>, vector<128x512xbf16>, vector<10x512xf32> -> vector<10x512xf32>
    %c1_202 = arith.constant 1 : index
    %c0_203 = arith.constant 0 : index
    %c0_204 = arith.constant 0 : index
    %390 = vector.load %arg7[%c1_202, %c0_203, %c0_204] : memref<3x1x512xf32, #tpu.memory_space<vmem>>, vector<1x1x512xf32>
    %391 = vector.shape_cast %390 : vector<1x1x512xf32> to vector<1x512xf32>
    %392 = vector.broadcast %391 : vector<1x512xf32> to vector<10x512xf32>
    %393 = arith.addf %389, %392 : vector<10x512xf32>
    %cst_205 = arith.constant 0.000000e+00 : f32
    %394 = vector.broadcast %cst_205 : f32 to vector<10x512xf32>
    %395 = arith.maximumf %393, %394 : vector<10x512xf32>
    %396 = arith.truncf %395 : vector<10x512xf32> to vector<10x512xbf16>
    %c1_206 = arith.constant 1 : index
    %c0_207 = arith.constant 0 : index
    %c0_208 = arith.constant 0 : index
    %397 = vector.load %arg8[%c1_206, %c0_207, %c0_208] : memref<3x512x128xbf16, #tpu.memory_space<vmem>>, vector<1x512x128xbf16>
    %398 = vector.shape_cast %397 : vector<1x512x128xbf16> to vector<512x128xbf16>
    %cst_209 = arith.constant dense<0.000000e+00> : vector<10x128xf32>
    %399 = tpu.matmul %396, %398, %cst_209 {dimension_numbers = #tpu.dot_dimension_numbers<[1], [0], [0], [1], [0, 0, 1, 1], [], []>} : vector<10x512xbf16>, vector<512x128xbf16>, vector<10x128xf32> -> vector<10x128xf32>
    %400 = arith.addf %385, %399 : vector<10x128xf32>
    %c1_210 = arith.constant 1 : index
    %c0_211 = arith.constant 0 : index
    %c0_212 = arith.constant 0 : index
    %401 = vector.load %arg9[%c1_210, %c0_211, %c0_212] : memref<3x1x128xf32, #tpu.memory_space<vmem>>, vector<1x1x128xf32>
    %402 = vector.shape_cast %401 : vector<1x1x128xf32> to vector<1x128xf32>
    %403 = vector.broadcast %402 : vector<1x128xf32> to vector<10x128xf32>
    %404 = arith.addf %400, %403 : vector<10x128xf32>
    %405 = arith.truncf %404 : vector<10x128xf32> to vector<10x128xbf16>
    %c2_213 = arith.constant 2 : index
    %c0_214 = arith.constant 0 : index
    %c0_215 = arith.constant 0 : index
    %406 = vector.load %arg4[%c2_213, %c0_214, %c0_215] : memref<3x128x384xbf16, #tpu.memory_space<vmem>>, vector<1x128x384xbf16>
    %407 = vector.shape_cast %406 : vector<1x128x384xbf16> to vector<128x384xbf16>
    %cst_216 = arith.constant dense<0.000000e+00> : vector<10x384xf32>
    %408 = tpu.matmul %405, %407, %cst_216 {dimension_numbers = #tpu.dot_dimension_numbers<[1], [0], [0], [1], [0, 0, 1, 1], [], []>} : vector<10x128xbf16>, vector<128x384xbf16>, vector<10x384xf32> -> vector<10x384xf32>
    %409 = vector.extract_strided_slice %408 {offsets = [0, 0], sizes = [10, 16], strides = [1, 1]} : vector<10x384xf32> to vector<10x16xf32>
    %410 = vector.extract_strided_slice %408 {offsets = [0, 128], sizes = [10, 16], strides = [1, 1]} : vector<10x384xf32> to vector<10x16xf32>
    %411 = vector.extract_strided_slice %408 {offsets = [0, 256], sizes = [10, 16], strides = [1, 1]} : vector<10x384xf32> to vector<10x16xf32>
    "tpu.trace_start"() <{level = 10 : i32, message = "ik,jk->ij"}> : () -> ()
    %cst_217 = arith.constant dense<0.000000e+00> : vector<10x10xf32>
    %412 = tpu.matmul %409, %410, %cst_217 {dimension_numbers = #tpu.dot_dimension_numbers<[1], [1], [0], [0], [0, 0, 1, 0], [], []>} : vector<10x16xf32>, vector<10x16xf32>, vector<10x10xf32> -> vector<10x10xf32>
    "tpu.trace_stop"() : () -> ()
    %c0_218 = arith.constant 0 : index
    %c0_219 = arith.constant 0 : index
    %413 = vector.load %arg10[%c0_218, %c0_219] : memref<10x10xf32, #tpu.memory_space<vmem>>, vector<10x10xf32>
    %414 = arith.addf %412, %413 : vector<10x10xf32>
    %cst_220 = arith.constant dense<0xFF800000> : vector<10xf32>
    %415 = vector.multi_reduction <maximumf>, %414, %cst_220 [1] : vector<10x10xf32> to vector<10xf32>
    %416 = vector.shape_cast %415 : vector<10xf32> to vector<10x1xf32>
    %417 = vector.broadcast %416 : vector<10x1xf32> to vector<10x10xf32>
    %418 = arith.subf %414, %417 : vector<10x10xf32>
    %419 = math.exp %418 : vector<10x10xf32>
    %cst_221 = arith.constant dense<0.000000e+00> : vector<10xf32>
    %420 = vector.multi_reduction <add>, %419, %cst_221 [1] : vector<10x10xf32> to vector<10xf32>
    %421 = vector.shape_cast %420 : vector<10xf32> to vector<10x1xf32>
    %422 = tpu.reciprocal %421 {approx = true} : vector<10x1xf32> -> vector<10x1xf32>
    %423 = vector.broadcast %422 : vector<10x1xf32> to vector<10x10xf32>
    %424 = arith.mulf %419, %423 : vector<10x10xf32>
    %cst_222 = arith.constant dense<0.000000e+00> : vector<10x16xf32>
    %425 = tpu.matmul %424, %411, %cst_222 {dimension_numbers = #tpu.dot_dimension_numbers<[1], [0], [0], [1], [0, 0, 1, 1], [], []>} : vector<10x10xf32>, vector<10x16xf32>, vector<10x16xf32> -> vector<10x16xf32>
    %426 = arith.truncf %425 : vector<10x16xf32> to vector<10x16xbf16>
    %c2_223 = arith.constant 2 : index
    %c0_224 = arith.constant 0 : index
    %c0_225 = arith.constant 0 : index
    %c0_226 = arith.constant 0 : index
    %427 = vector.load %arg5[%c2_223, %c0_224, %c0_225, %c0_226] : memref<3x8x16x128xbf16, #tpu.memory_space<vmem>>, vector<1x1x16x128xbf16>
    %428 = vector.shape_cast %427 : vector<1x1x16x128xbf16> to vector<16x128xbf16>
    %cst_227 = arith.constant dense<0.000000e+00> : vector<10x128xf32>
    %429 = tpu.matmul %426, %428, %cst_227 {dimension_numbers = #tpu.dot_dimension_numbers<[1], [0], [0], [1], [0, 0, 1, 1], [], []>} : vector<10x16xbf16>, vector<16x128xbf16>, vector<10x128xf32> -> vector<10x128xf32>
    %430 = arith.addf %404, %429 : vector<10x128xf32>
    %431 = vector.extract_strided_slice %408 {offsets = [0, 16], sizes = [10, 16], strides = [1, 1]} : vector<10x384xf32> to vector<10x16xf32>
    %432 = vector.extract_strided_slice %408 {offsets = [0, 144], sizes = [10, 16], strides = [1, 1]} : vector<10x384xf32> to vector<10x16xf32>
    %433 = vector.extract_strided_slice %408 {offsets = [0, 272], sizes = [10, 16], strides = [1, 1]} : vector<10x384xf32> to vector<10x16xf32>
    "tpu.trace_start"() <{level = 10 : i32, message = "ik,jk->ij"}> : () -> ()
    %cst_228 = arith.constant dense<0.000000e+00> : vector<10x10xf32>
    %434 = tpu.matmul %431, %432, %cst_228 {dimension_numbers = #tpu.dot_dimension_numbers<[1], [1], [0], [0], [0, 0, 1, 0], [], []>} : vector<10x16xf32>, vector<10x16xf32>, vector<10x10xf32> -> vector<10x10xf32>
    "tpu.trace_stop"() : () -> ()
    %c0_229 = arith.constant 0 : index
    %c0_230 = arith.constant 0 : index
    %435 = vector.load %arg10[%c0_229, %c0_230] : memref<10x10xf32, #tpu.memory_space<vmem>>, vector<10x10xf32>
    %436 = arith.addf %434, %435 : vector<10x10xf32>
    %cst_231 = arith.constant dense<0xFF800000> : vector<10xf32>
    %437 = vector.multi_reduction <maximumf>, %436, %cst_231 [1] : vector<10x10xf32> to vector<10xf32>
    %438 = vector.shape_cast %437 : vector<10xf32> to vector<10x1xf32>
    %439 = vector.broadcast %438 : vector<10x1xf32> to vector<10x10xf32>
    %440 = arith.subf %436, %439 : vector<10x10xf32>
    %441 = math.exp %440 : vector<10x10xf32>
    %cst_232 = arith.constant dense<0.000000e+00> : vector<10xf32>
    %442 = vector.multi_reduction <add>, %441, %cst_232 [1] : vector<10x10xf32> to vector<10xf32>
    %443 = vector.shape_cast %442 : vector<10xf32> to vector<10x1xf32>
    %444 = tpu.reciprocal %443 {approx = true} : vector<10x1xf32> -> vector<10x1xf32>
    %445 = vector.broadcast %444 : vector<10x1xf32> to vector<10x10xf32>
    %446 = arith.mulf %441, %445 : vector<10x10xf32>
    %cst_233 = arith.constant dense<0.000000e+00> : vector<10x16xf32>
    %447 = tpu.matmul %446, %433, %cst_233 {dimension_numbers = #tpu.dot_dimension_numbers<[1], [0], [0], [1], [0, 0, 1, 1], [], []>} : vector<10x10xf32>, vector<10x16xf32>, vector<10x16xf32> -> vector<10x16xf32>
    %448 = arith.truncf %447 : vector<10x16xf32> to vector<10x16xbf16>
    %c2_234 = arith.constant 2 : index
    %c1_235 = arith.constant 1 : index
    %c0_236 = arith.constant 0 : index
    %c0_237 = arith.constant 0 : index
    %449 = vector.load %arg5[%c2_234, %c1_235, %c0_236, %c0_237] : memref<3x8x16x128xbf16, #tpu.memory_space<vmem>>, vector<1x1x16x128xbf16>
    %450 = vector.shape_cast %449 : vector<1x1x16x128xbf16> to vector<16x128xbf16>
    %cst_238 = arith.constant dense<0.000000e+00> : vector<10x128xf32>
    %451 = tpu.matmul %448, %450, %cst_238 {dimension_numbers = #tpu.dot_dimension_numbers<[1], [0], [0], [1], [0, 0, 1, 1], [], []>} : vector<10x16xbf16>, vector<16x128xbf16>, vector<10x128xf32> -> vector<10x128xf32>
    %452 = arith.addf %430, %451 : vector<10x128xf32>
    %453 = vector.extract_strided_slice %408 {offsets = [0, 32], sizes = [10, 16], strides = [1, 1]} : vector<10x384xf32> to vector<10x16xf32>
    %454 = vector.extract_strided_slice %408 {offsets = [0, 160], sizes = [10, 16], strides = [1, 1]} : vector<10x384xf32> to vector<10x16xf32>
    %455 = vector.extract_strided_slice %408 {offsets = [0, 288], sizes = [10, 16], strides = [1, 1]} : vector<10x384xf32> to vector<10x16xf32>
    "tpu.trace_start"() <{level = 10 : i32, message = "ik,jk->ij"}> : () -> ()
    %cst_239 = arith.constant dense<0.000000e+00> : vector<10x10xf32>
    %456 = tpu.matmul %453, %454, %cst_239 {dimension_numbers = #tpu.dot_dimension_numbers<[1], [1], [0], [0], [0, 0, 1, 0], [], []>} : vector<10x16xf32>, vector<10x16xf32>, vector<10x10xf32> -> vector<10x10xf32>
    "tpu.trace_stop"() : () -> ()
    %c0_240 = arith.constant 0 : index
    %c0_241 = arith.constant 0 : index
    %457 = vector.load %arg10[%c0_240, %c0_241] : memref<10x10xf32, #tpu.memory_space<vmem>>, vector<10x10xf32>
    %458 = arith.addf %456, %457 : vector<10x10xf32>
    %cst_242 = arith.constant dense<0xFF800000> : vector<10xf32>
    %459 = vector.multi_reduction <maximumf>, %458, %cst_242 [1] : vector<10x10xf32> to vector<10xf32>
    %460 = vector.shape_cast %459 : vector<10xf32> to vector<10x1xf32>
    %461 = vector.broadcast %460 : vector<10x1xf32> to vector<10x10xf32>
    %462 = arith.subf %458, %461 : vector<10x10xf32>
    %463 = math.exp %462 : vector<10x10xf32>
    %cst_243 = arith.constant dense<0.000000e+00> : vector<10xf32>
    %464 = vector.multi_reduction <add>, %463, %cst_243 [1] : vector<10x10xf32> to vector<10xf32>
    %465 = vector.shape_cast %464 : vector<10xf32> to vector<10x1xf32>
    %466 = tpu.reciprocal %465 {approx = true} : vector<10x1xf32> -> vector<10x1xf32>
    %467 = vector.broadcast %466 : vector<10x1xf32> to vector<10x10xf32>
    %468 = arith.mulf %463, %467 : vector<10x10xf32>
    %cst_244 = arith.constant dense<0.000000e+00> : vector<10x16xf32>
    %469 = tpu.matmul %468, %455, %cst_244 {dimension_numbers = #tpu.dot_dimension_numbers<[1], [0], [0], [1], [0, 0, 1, 1], [], []>} : vector<10x10xf32>, vector<10x16xf32>, vector<10x16xf32> -> vector<10x16xf32>
    %470 = arith.truncf %469 : vector<10x16xf32> to vector<10x16xbf16>
    %c2_245 = arith.constant 2 : index
    %c2_246 = arith.constant 2 : index
    %c0_247 = arith.constant 0 : index
    %c0_248 = arith.constant 0 : index
    %471 = vector.load %arg5[%c2_245, %c2_246, %c0_247, %c0_248] : memref<3x8x16x128xbf16, #tpu.memory_space<vmem>>, vector<1x1x16x128xbf16>
    %472 = vector.shape_cast %471 : vector<1x1x16x128xbf16> to vector<16x128xbf16>
    %cst_249 = arith.constant dense<0.000000e+00> : vector<10x128xf32>
    %473 = tpu.matmul %470, %472, %cst_249 {dimension_numbers = #tpu.dot_dimension_numbers<[1], [0], [0], [1], [0, 0, 1, 1], [], []>} : vector<10x16xbf16>, vector<16x128xbf16>, vector<10x128xf32> -> vector<10x128xf32>
    %474 = arith.addf %452, %473 : vector<10x128xf32>
    %475 = vector.extract_strided_slice %408 {offsets = [0, 48], sizes = [10, 16], strides = [1, 1]} : vector<10x384xf32> to vector<10x16xf32>
    %476 = vector.extract_strided_slice %408 {offsets = [0, 176], sizes = [10, 16], strides = [1, 1]} : vector<10x384xf32> to vector<10x16xf32>
    %477 = vector.extract_strided_slice %408 {offsets = [0, 304], sizes = [10, 16], strides = [1, 1]} : vector<10x384xf32> to vector<10x16xf32>
    "tpu.trace_start"() <{level = 10 : i32, message = "ik,jk->ij"}> : () -> ()
    %cst_250 = arith.constant dense<0.000000e+00> : vector<10x10xf32>
    %478 = tpu.matmul %475, %476, %cst_250 {dimension_numbers = #tpu.dot_dimension_numbers<[1], [1], [0], [0], [0, 0, 1, 0], [], []>} : vector<10x16xf32>, vector<10x16xf32>, vector<10x10xf32> -> vector<10x10xf32>
    "tpu.trace_stop"() : () -> ()
    %c0_251 = arith.constant 0 : index
    %c0_252 = arith.constant 0 : index
    %479 = vector.load %arg10[%c0_251, %c0_252] : memref<10x10xf32, #tpu.memory_space<vmem>>, vector<10x10xf32>
    %480 = arith.addf %478, %479 : vector<10x10xf32>
    %cst_253 = arith.constant dense<0xFF800000> : vector<10xf32>
    %481 = vector.multi_reduction <maximumf>, %480, %cst_253 [1] : vector<10x10xf32> to vector<10xf32>
    %482 = vector.shape_cast %481 : vector<10xf32> to vector<10x1xf32>
    %483 = vector.broadcast %482 : vector<10x1xf32> to vector<10x10xf32>
    %484 = arith.subf %480, %483 : vector<10x10xf32>
    %485 = math.exp %484 : vector<10x10xf32>
    %cst_254 = arith.constant dense<0.000000e+00> : vector<10xf32>
    %486 = vector.multi_reduction <add>, %485, %cst_254 [1] : vector<10x10xf32> to vector<10xf32>
    %487 = vector.shape_cast %486 : vector<10xf32> to vector<10x1xf32>
    %488 = tpu.reciprocal %487 {approx = true} : vector<10x1xf32> -> vector<10x1xf32>
    %489 = vector.broadcast %488 : vector<10x1xf32> to vector<10x10xf32>
    %490 = arith.mulf %485, %489 : vector<10x10xf32>
    %cst_255 = arith.constant dense<0.000000e+00> : vector<10x16xf32>
    %491 = tpu.matmul %490, %477, %cst_255 {dimension_numbers = #tpu.dot_dimension_numbers<[1], [0], [0], [1], [0, 0, 1, 1], [], []>} : vector<10x10xf32>, vector<10x16xf32>, vector<10x16xf32> -> vector<10x16xf32>
    %492 = arith.truncf %491 : vector<10x16xf32> to vector<10x16xbf16>
    %c2_256 = arith.constant 2 : index
    %c3_257 = arith.constant 3 : index
    %c0_258 = arith.constant 0 : index
    %c0_259 = arith.constant 0 : index
    %493 = vector.load %arg5[%c2_256, %c3_257, %c0_258, %c0_259] : memref<3x8x16x128xbf16, #tpu.memory_space<vmem>>, vector<1x1x16x128xbf16>
    %494 = vector.shape_cast %493 : vector<1x1x16x128xbf16> to vector<16x128xbf16>
    %cst_260 = arith.constant dense<0.000000e+00> : vector<10x128xf32>
    %495 = tpu.matmul %492, %494, %cst_260 {dimension_numbers = #tpu.dot_dimension_numbers<[1], [0], [0], [1], [0, 0, 1, 1], [], []>} : vector<10x16xbf16>, vector<16x128xbf16>, vector<10x128xf32> -> vector<10x128xf32>
    %496 = arith.addf %474, %495 : vector<10x128xf32>
    %497 = vector.extract_strided_slice %408 {offsets = [0, 64], sizes = [10, 16], strides = [1, 1]} : vector<10x384xf32> to vector<10x16xf32>
    %498 = vector.extract_strided_slice %408 {offsets = [0, 192], sizes = [10, 16], strides = [1, 1]} : vector<10x384xf32> to vector<10x16xf32>
    %499 = vector.extract_strided_slice %408 {offsets = [0, 320], sizes = [10, 16], strides = [1, 1]} : vector<10x384xf32> to vector<10x16xf32>
    "tpu.trace_start"() <{level = 10 : i32, message = "ik,jk->ij"}> : () -> ()
    %cst_261 = arith.constant dense<0.000000e+00> : vector<10x10xf32>
    %500 = tpu.matmul %497, %498, %cst_261 {dimension_numbers = #tpu.dot_dimension_numbers<[1], [1], [0], [0], [0, 0, 1, 0], [], []>} : vector<10x16xf32>, vector<10x16xf32>, vector<10x10xf32> -> vector<10x10xf32>
    "tpu.trace_stop"() : () -> ()
    %c0_262 = arith.constant 0 : index
    %c0_263 = arith.constant 0 : index
    %501 = vector.load %arg10[%c0_262, %c0_263] : memref<10x10xf32, #tpu.memory_space<vmem>>, vector<10x10xf32>
    %502 = arith.addf %500, %501 : vector<10x10xf32>
    %cst_264 = arith.constant dense<0xFF800000> : vector<10xf32>
    %503 = vector.multi_reduction <maximumf>, %502, %cst_264 [1] : vector<10x10xf32> to vector<10xf32>
    %504 = vector.shape_cast %503 : vector<10xf32> to vector<10x1xf32>
    %505 = vector.broadcast %504 : vector<10x1xf32> to vector<10x10xf32>
    %506 = arith.subf %502, %505 : vector<10x10xf32>
    %507 = math.exp %506 : vector<10x10xf32>
    %cst_265 = arith.constant dense<0.000000e+00> : vector<10xf32>
    %508 = vector.multi_reduction <add>, %507, %cst_265 [1] : vector<10x10xf32> to vector<10xf32>
    %509 = vector.shape_cast %508 : vector<10xf32> to vector<10x1xf32>
    %510 = tpu.reciprocal %509 {approx = true} : vector<10x1xf32> -> vector<10x1xf32>
    %511 = vector.broadcast %510 : vector<10x1xf32> to vector<10x10xf32>
    %512 = arith.mulf %507, %511 : vector<10x10xf32>
    %cst_266 = arith.constant dense<0.000000e+00> : vector<10x16xf32>
    %513 = tpu.matmul %512, %499, %cst_266 {dimension_numbers = #tpu.dot_dimension_numbers<[1], [0], [0], [1], [0, 0, 1, 1], [], []>} : vector<10x10xf32>, vector<10x16xf32>, vector<10x16xf32> -> vector<10x16xf32>
    %514 = arith.truncf %513 : vector<10x16xf32> to vector<10x16xbf16>
    %c2_267 = arith.constant 2 : index
    %c4_268 = arith.constant 4 : index
    %c0_269 = arith.constant 0 : index
    %c0_270 = arith.constant 0 : index
    %515 = vector.load %arg5[%c2_267, %c4_268, %c0_269, %c0_270] : memref<3x8x16x128xbf16, #tpu.memory_space<vmem>>, vector<1x1x16x128xbf16>
    %516 = vector.shape_cast %515 : vector<1x1x16x128xbf16> to vector<16x128xbf16>
    %cst_271 = arith.constant dense<0.000000e+00> : vector<10x128xf32>
    %517 = tpu.matmul %514, %516, %cst_271 {dimension_numbers = #tpu.dot_dimension_numbers<[1], [0], [0], [1], [0, 0, 1, 1], [], []>} : vector<10x16xbf16>, vector<16x128xbf16>, vector<10x128xf32> -> vector<10x128xf32>
    %518 = arith.addf %496, %517 : vector<10x128xf32>
    %519 = vector.extract_strided_slice %408 {offsets = [0, 80], sizes = [10, 16], strides = [1, 1]} : vector<10x384xf32> to vector<10x16xf32>
    %520 = vector.extract_strided_slice %408 {offsets = [0, 208], sizes = [10, 16], strides = [1, 1]} : vector<10x384xf32> to vector<10x16xf32>
    %521 = vector.extract_strided_slice %408 {offsets = [0, 336], sizes = [10, 16], strides = [1, 1]} : vector<10x384xf32> to vector<10x16xf32>
    "tpu.trace_start"() <{level = 10 : i32, message = "ik,jk->ij"}> : () -> ()
    %cst_272 = arith.constant dense<0.000000e+00> : vector<10x10xf32>
    %522 = tpu.matmul %519, %520, %cst_272 {dimension_numbers = #tpu.dot_dimension_numbers<[1], [1], [0], [0], [0, 0, 1, 0], [], []>} : vector<10x16xf32>, vector<10x16xf32>, vector<10x10xf32> -> vector<10x10xf32>
    "tpu.trace_stop"() : () -> ()
    %c0_273 = arith.constant 0 : index
    %c0_274 = arith.constant 0 : index
    %523 = vector.load %arg10[%c0_273, %c0_274] : memref<10x10xf32, #tpu.memory_space<vmem>>, vector<10x10xf32>
    %524 = arith.addf %522, %523 : vector<10x10xf32>
    %cst_275 = arith.constant dense<0xFF800000> : vector<10xf32>
    %525 = vector.multi_reduction <maximumf>, %524, %cst_275 [1] : vector<10x10xf32> to vector<10xf32>
    %526 = vector.shape_cast %525 : vector<10xf32> to vector<10x1xf32>
    %527 = vector.broadcast %526 : vector<10x1xf32> to vector<10x10xf32>
    %528 = arith.subf %524, %527 : vector<10x10xf32>
    %529 = math.exp %528 : vector<10x10xf32>
    %cst_276 = arith.constant dense<0.000000e+00> : vector<10xf32>
    %530 = vector.multi_reduction <add>, %529, %cst_276 [1] : vector<10x10xf32> to vector<10xf32>
    %531 = vector.shape_cast %530 : vector<10xf32> to vector<10x1xf32>
    %532 = tpu.reciprocal %531 {approx = true} : vector<10x1xf32> -> vector<10x1xf32>
    %533 = vector.broadcast %532 : vector<10x1xf32> to vector<10x10xf32>
    %534 = arith.mulf %529, %533 : vector<10x10xf32>
    %cst_277 = arith.constant dense<0.000000e+00> : vector<10x16xf32>
    %535 = tpu.matmul %534, %521, %cst_277 {dimension_numbers = #tpu.dot_dimension_numbers<[1], [0], [0], [1], [0, 0, 1, 1], [], []>} : vector<10x10xf32>, vector<10x16xf32>, vector<10x16xf32> -> vector<10x16xf32>
    %536 = arith.truncf %535 : vector<10x16xf32> to vector<10x16xbf16>
    %c2_278 = arith.constant 2 : index
    %c5_279 = arith.constant 5 : index
    %c0_280 = arith.constant 0 : index
    %c0_281 = arith.constant 0 : index
    %537 = vector.load %arg5[%c2_278, %c5_279, %c0_280, %c0_281] : memref<3x8x16x128xbf16, #tpu.memory_space<vmem>>, vector<1x1x16x128xbf16>
    %538 = vector.shape_cast %537 : vector<1x1x16x128xbf16> to vector<16x128xbf16>
    %cst_282 = arith.constant dense<0.000000e+00> : vector<10x128xf32>
    %539 = tpu.matmul %536, %538, %cst_282 {dimension_numbers = #tpu.dot_dimension_numbers<[1], [0], [0], [1], [0, 0, 1, 1], [], []>} : vector<10x16xbf16>, vector<16x128xbf16>, vector<10x128xf32> -> vector<10x128xf32>
    %540 = arith.addf %518, %539 : vector<10x128xf32>
    %541 = vector.extract_strided_slice %408 {offsets = [0, 96], sizes = [10, 16], strides = [1, 1]} : vector<10x384xf32> to vector<10x16xf32>
    %542 = vector.extract_strided_slice %408 {offsets = [0, 224], sizes = [10, 16], strides = [1, 1]} : vector<10x384xf32> to vector<10x16xf32>
    %543 = vector.extract_strided_slice %408 {offsets = [0, 352], sizes = [10, 16], strides = [1, 1]} : vector<10x384xf32> to vector<10x16xf32>
    "tpu.trace_start"() <{level = 10 : i32, message = "ik,jk->ij"}> : () -> ()
    %cst_283 = arith.constant dense<0.000000e+00> : vector<10x10xf32>
    %544 = tpu.matmul %541, %542, %cst_283 {dimension_numbers = #tpu.dot_dimension_numbers<[1], [1], [0], [0], [0, 0, 1, 0], [], []>} : vector<10x16xf32>, vector<10x16xf32>, vector<10x10xf32> -> vector<10x10xf32>
    "tpu.trace_stop"() : () -> ()
    %c0_284 = arith.constant 0 : index
    %c0_285 = arith.constant 0 : index
    %545 = vector.load %arg10[%c0_284, %c0_285] : memref<10x10xf32, #tpu.memory_space<vmem>>, vector<10x10xf32>
    %546 = arith.addf %544, %545 : vector<10x10xf32>
    %cst_286 = arith.constant dense<0xFF800000> : vector<10xf32>
    %547 = vector.multi_reduction <maximumf>, %546, %cst_286 [1] : vector<10x10xf32> to vector<10xf32>
    %548 = vector.shape_cast %547 : vector<10xf32> to vector<10x1xf32>
    %549 = vector.broadcast %548 : vector<10x1xf32> to vector<10x10xf32>
    %550 = arith.subf %546, %549 : vector<10x10xf32>
    %551 = math.exp %550 : vector<10x10xf32>
    %cst_287 = arith.constant dense<0.000000e+00> : vector<10xf32>
    %552 = vector.multi_reduction <add>, %551, %cst_287 [1] : vector<10x10xf32> to vector<10xf32>
    %553 = vector.shape_cast %552 : vector<10xf32> to vector<10x1xf32>
    %554 = tpu.reciprocal %553 {approx = true} : vector<10x1xf32> -> vector<10x1xf32>
    %555 = vector.broadcast %554 : vector<10x1xf32> to vector<10x10xf32>
    %556 = arith.mulf %551, %555 : vector<10x10xf32>
    %cst_288 = arith.constant dense<0.000000e+00> : vector<10x16xf32>
    %557 = tpu.matmul %556, %543, %cst_288 {dimension_numbers = #tpu.dot_dimension_numbers<[1], [0], [0], [1], [0, 0, 1, 1], [], []>} : vector<10x10xf32>, vector<10x16xf32>, vector<10x16xf32> -> vector<10x16xf32>
    %558 = arith.truncf %557 : vector<10x16xf32> to vector<10x16xbf16>
    %c2_289 = arith.constant 2 : index
    %c6_290 = arith.constant 6 : index
    %c0_291 = arith.constant 0 : index
    %c0_292 = arith.constant 0 : index
    %559 = vector.load %arg5[%c2_289, %c6_290, %c0_291, %c0_292] : memref<3x8x16x128xbf16, #tpu.memory_space<vmem>>, vector<1x1x16x128xbf16>
    %560 = vector.shape_cast %559 : vector<1x1x16x128xbf16> to vector<16x128xbf16>
    %cst_293 = arith.constant dense<0.000000e+00> : vector<10x128xf32>
    %561 = tpu.matmul %558, %560, %cst_293 {dimension_numbers = #tpu.dot_dimension_numbers<[1], [0], [0], [1], [0, 0, 1, 1], [], []>} : vector<10x16xbf16>, vector<16x128xbf16>, vector<10x128xf32> -> vector<10x128xf32>
    %562 = arith.addf %540, %561 : vector<10x128xf32>
    %563 = vector.extract_strided_slice %408 {offsets = [0, 112], sizes = [10, 16], strides = [1, 1]} : vector<10x384xf32> to vector<10x16xf32>
    %564 = vector.extract_strided_slice %408 {offsets = [0, 240], sizes = [10, 16], strides = [1, 1]} : vector<10x384xf32> to vector<10x16xf32>
    %565 = vector.extract_strided_slice %408 {offsets = [0, 368], sizes = [10, 16], strides = [1, 1]} : vector<10x384xf32> to vector<10x16xf32>
    "tpu.trace_start"() <{level = 10 : i32, message = "ik,jk->ij"}> : () -> ()
    %cst_294 = arith.constant dense<0.000000e+00> : vector<10x10xf32>
    %566 = tpu.matmul %563, %564, %cst_294 {dimension_numbers = #tpu.dot_dimension_numbers<[1], [1], [0], [0], [0, 0, 1, 0], [], []>} : vector<10x16xf32>, vector<10x16xf32>, vector<10x10xf32> -> vector<10x10xf32>
    "tpu.trace_stop"() : () -> ()
    %c0_295 = arith.constant 0 : index
    %c0_296 = arith.constant 0 : index
    %567 = vector.load %arg10[%c0_295, %c0_296] : memref<10x10xf32, #tpu.memory_space<vmem>>, vector<10x10xf32>
    %568 = arith.addf %566, %567 : vector<10x10xf32>
    %cst_297 = arith.constant dense<0xFF800000> : vector<10xf32>
    %569 = vector.multi_reduction <maximumf>, %568, %cst_297 [1] : vector<10x10xf32> to vector<10xf32>
    %570 = vector.shape_cast %569 : vector<10xf32> to vector<10x1xf32>
    %571 = vector.broadcast %570 : vector<10x1xf32> to vector<10x10xf32>
    %572 = arith.subf %568, %571 : vector<10x10xf32>
    %573 = math.exp %572 : vector<10x10xf32>
    %cst_298 = arith.constant dense<0.000000e+00> : vector<10xf32>
    %574 = vector.multi_reduction <add>, %573, %cst_298 [1] : vector<10x10xf32> to vector<10xf32>
    %575 = vector.shape_cast %574 : vector<10xf32> to vector<10x1xf32>
    %576 = tpu.reciprocal %575 {approx = true} : vector<10x1xf32> -> vector<10x1xf32>
    %577 = vector.broadcast %576 : vector<10x1xf32> to vector<10x10xf32>
    %578 = arith.mulf %573, %577 : vector<10x10xf32>
    %cst_299 = arith.constant dense<0.000000e+00> : vector<10x16xf32>
    %579 = tpu.matmul %578, %565, %cst_299 {dimension_numbers = #tpu.dot_dimension_numbers<[1], [0], [0], [1], [0, 0, 1, 1], [], []>} : vector<10x10xf32>, vector<10x16xf32>, vector<10x16xf32> -> vector<10x16xf32>
    %580 = arith.truncf %579 : vector<10x16xf32> to vector<10x16xbf16>
    %c2_300 = arith.constant 2 : index
    %c7_301 = arith.constant 7 : index
    %c0_302 = arith.constant 0 : index
    %c0_303 = arith.constant 0 : index
    %581 = vector.load %arg5[%c2_300, %c7_301, %c0_302, %c0_303] : memref<3x8x16x128xbf16, #tpu.memory_space<vmem>>, vector<1x1x16x128xbf16>
    %582 = vector.shape_cast %581 : vector<1x1x16x128xbf16> to vector<16x128xbf16>
    %cst_304 = arith.constant dense<0.000000e+00> : vector<10x128xf32>
    %583 = tpu.matmul %580, %582, %cst_304 {dimension_numbers = #tpu.dot_dimension_numbers<[1], [0], [0], [1], [0, 0, 1, 1], [], []>} : vector<10x16xbf16>, vector<16x128xbf16>, vector<10x128xf32> -> vector<10x128xf32>
    %584 = arith.addf %562, %583 : vector<10x128xf32>
    %585 = arith.truncf %584 : vector<10x128xf32> to vector<10x128xbf16>
    %c2_305 = arith.constant 2 : index
    %c0_306 = arith.constant 0 : index
    %c0_307 = arith.constant 0 : index
    %586 = vector.load %arg6[%c2_305, %c0_306, %c0_307] : memref<3x128x512xbf16, #tpu.memory_space<vmem>>, vector<1x128x512xbf16>
    %587 = vector.shape_cast %586 : vector<1x128x512xbf16> to vector<128x512xbf16>
    %cst_308 = arith.constant dense<0.000000e+00> : vector<10x512xf32>
    %588 = tpu.matmul %585, %587, %cst_308 {dimension_numbers = #tpu.dot_dimension_numbers<[1], [0], [0], [1], [0, 0, 1, 1], [], []>} : vector<10x128xbf16>, vector<128x512xbf16>, vector<10x512xf32> -> vector<10x512xf32>
    %c2_309 = arith.constant 2 : index
    %c0_310 = arith.constant 0 : index
    %c0_311 = arith.constant 0 : index
    %589 = vector.load %arg7[%c2_309, %c0_310, %c0_311] : memref<3x1x512xf32, #tpu.memory_space<vmem>>, vector<1x1x512xf32>
    %590 = vector.shape_cast %589 : vector<1x1x512xf32> to vector<1x512xf32>
    %591 = vector.broadcast %590 : vector<1x512xf32> to vector<10x512xf32>
    %592 = arith.addf %588, %591 : vector<10x512xf32>
    %cst_312 = arith.constant 0.000000e+00 : f32
    %593 = vector.broadcast %cst_312 : f32 to vector<10x512xf32>
    %594 = arith.maximumf %592, %593 : vector<10x512xf32>
    %595 = arith.truncf %594 : vector<10x512xf32> to vector<10x512xbf16>
    %c2_313 = arith.constant 2 : index
    %c0_314 = arith.constant 0 : index
    %c0_315 = arith.constant 0 : index
    %596 = vector.load %arg8[%c2_313, %c0_314, %c0_315] : memref<3x512x128xbf16, #tpu.memory_space<vmem>>, vector<1x512x128xbf16>
    %597 = vector.shape_cast %596 : vector<1x512x128xbf16> to vector<512x128xbf16>
    %cst_316 = arith.constant dense<0.000000e+00> : vector<10x128xf32>
    %598 = tpu.matmul %595, %597, %cst_316 {dimension_numbers = #tpu.dot_dimension_numbers<[1], [0], [0], [1], [0, 0, 1, 1], [], []>} : vector<10x512xbf16>, vector<512x128xbf16>, vector<10x128xf32> -> vector<10x128xf32>
    %599 = arith.addf %584, %598 : vector<10x128xf32>
    %c2_317 = arith.constant 2 : index
    %c0_318 = arith.constant 0 : index
    %c0_319 = arith.constant 0 : index
    %600 = vector.load %arg9[%c2_317, %c0_318, %c0_319] : memref<3x1x128xf32, #tpu.memory_space<vmem>>, vector<1x1x128xf32>
    %601 = vector.shape_cast %600 : vector<1x1x128xf32> to vector<1x128xf32>
    %602 = vector.broadcast %601 : vector<1x128xf32> to vector<10x128xf32>
    %603 = arith.addf %599, %602 : vector<10x128xf32>
    %c0_320 = arith.constant 0 : index
    %c0_321 = arith.constant 0 : index
    %604 = vector.load %arg12[%c0_320, %c0_321] : memref<1x2xf32, #tpu.memory_space<vmem>>, vector<1x2xf32>
    %c0_322 = arith.constant 0 : index
    %c0_323 = arith.constant 0 : index
    %c0_324 = arith.constant 0 : index
    %605 = vector.load %arg11[%c0_322, %c0_323, %c0_324] : memref<2x10x128xf32, #tpu.memory_space<vmem>>, vector<1x10x128xf32>
    %606 = vector.shape_cast %605 : vector<1x10x128xf32> to vector<10x128xf32>
    %607 = arith.mulf %603, %606 : vector<10x128xf32>
    %cst_325 = arith.constant dense<0.000000e+00> : vector<10xf32>
    %608 = vector.multi_reduction <add>, %607, %cst_325 [1] : vector<10x128xf32> to vector<10xf32>
    %609 = vector.shape_cast %608 : vector<10xf32> to vector<10x1xf32>
    %cst_326 = arith.constant dense<0.000000e+00> : vector<1xf32>
    %610 = vector.multi_reduction <add>, %609, %cst_326 [0] : vector<10x1xf32> to vector<1xf32>
    %611 = vector.shape_cast %610 : vector<1xf32> to vector<1x1xf32>
    %c1_327 = arith.constant 1 : index
    %c0_328 = arith.constant 0 : index
    %c0_329 = arith.constant 0 : index
    %612 = vector.load %arg11[%c1_327, %c0_328, %c0_329] : memref<2x10x128xf32, #tpu.memory_space<vmem>>, vector<1x10x128xf32>
    %613 = vector.shape_cast %612 : vector<1x10x128xf32> to vector<10x128xf32>
    %614 = arith.mulf %603, %613 : vector<10x128xf32>
    %cst_330 = arith.constant dense<0.000000e+00> : vector<10xf32>
    %615 = vector.multi_reduction <add>, %614, %cst_330 [1] : vector<10x128xf32> to vector<10xf32>
    %616 = vector.shape_cast %615 : vector<10xf32> to vector<10x1xf32>
    %cst_331 = arith.constant dense<0.000000e+00> : vector<1xf32>
    %617 = vector.multi_reduction <add>, %616, %cst_331 [0] : vector<10x1xf32> to vector<1xf32>
    %618 = vector.shape_cast %617 : vector<1xf32> to vector<1x1xf32>
    %619 = tpu.concatenate %611, %618 in 1 : vector<1x1xf32>, vector<1x1xf32> -> vector<1x2xf32>
    %620 = arith.addf %619, %604 : vector<1x2xf32>
    %621 = vector.shape_cast %620 : vector<1x2xf32> to vector<1x1x2xf32>
    %c0_332 = arith.constant 0 : index
    %c0_333 = arith.constant 0 : index
    %c0_334 = arith.constant 0 : index
    %622 = vector.load %arg13[%c0_332, %c0_333, %c0_334] : memref<1x1x2xf32, #tpu.memory_space<vmem>>, vector<1x1x2xf32>
    tpu.vector_store %arg13[%c0_332, %c0_333, %c0_334], %621 {strides = array<i32>} : memref<1x1x2xf32, #tpu.memory_space<vmem>>, vector<1x1x2xf32>,
    return
  }
  func.func @transform_0(%arg0: i32) -> (i32, i32, i32) {
    %c0_i32 = arith.constant 0 : i32
    %c0_i32_0 = arith.constant 0 : i32
    %c0_i32_1 = arith.constant 0 : i32
    return %arg0, %c0_i32, %c0_i32_0 : i32, i32, i32
  }
  func.func @transform_1(%arg0: i32) -> (i32, i32) {
    %c0_i32 = arith.constant 0 : i32
    %c0_i32_0 = arith.constant 0 : i32
    %c0_i32_1 = arith.constant 0 : i32
    return %c0_i32, %c0_i32_0 : i32, i32
  }
  func.func @transform_2(%arg0: i32) -> (i32, i32) {
    %c0_i32 = arith.constant 0 : i32
    %c0_i32_0 = arith.constant 0 : i32
    %c0_i32_1 = arith.constant 0 : i32
    return %c0_i32, %c0_i32_0 : i32, i32
  }
  func.func @transform_3(%arg0: i32) -> (i32, i32, i32) {
    %c0_i32 = arith.constant 0 : i32
    %c0_i32_0 = arith.constant 0 : i32
    %c0_i32_1 = arith.constant 0 : i32
    %c0_i32_2 = arith.constant 0 : i32
    return %c0_i32, %c0_i32_0, %c0_i32_1 : i32, i32, i32
  }
  func.func @transform_4(%arg0: i32) -> (i32, i32, i32, i32) {
    %c0_i32 = arith.constant 0 : i32
    %c0_i32_0 = arith.constant 0 : i32
    %c0_i32_1 = arith.constant 0 : i32
    %c0_i32_2 = arith.constant 0 : i32
    %c0_i32_3 = arith.constant 0 : i32
    return %c0_i32, %c0_i32_0, %c0_i32_1, %c0_i32_2 : i32, i32, i32, i32
  }
  func.func @transform_5(%arg0: i32) -> (i32, i32, i32) {
    %c0_i32 = arith.constant 0 : i32
    %c0_i32_0 = arith.constant 0 : i32
    %c0_i32_1 = arith.constant 0 : i32
    %c0_i32_2 = arith.constant 0 : i32
    return %c0_i32, %c0_i32_0, %c0_i32_1 : i32, i32, i32
  }
  func.func @transform_6(%arg0: i32) -> (i32, i32, i32) {
    %c0_i32 = arith.constant 0 : i32
    %c0_i32_0 = arith.constant 0 : i32
    %c0_i32_1 = arith.constant 0 : i32
    %c0_i32_2 = arith.constant 0 : i32
    return %c0_i32, %c0_i32_0, %c0_i32_1 : i32, i32, i32
  }
  func.func @transform_7(%arg0: i32) -> (i32, i32, i32) {
    %c0_i32 = arith.constant 0 : i32
    %c0_i32_0 = arith.constant 0 : i32
    %c0_i32_1 = arith.constant 0 : i32
    %c0_i32_2 = arith.constant 0 : i32
    return %c0_i32, %c0_i32_0, %c0_i32_1 : i32, i32, i32
  }
  func.func @transform_8(%arg0: i32) -> (i32, i32, i32) {
    %c0_i32 = arith.constant 0 : i32
    %c0_i32_0 = arith.constant 0 : i32
    %c0_i32_1 = arith.constant 0 : i32
    %c0_i32_2 = arith.constant 0 : i32
    return %c0_i32, %c0_i32_0, %c0_i32_1 : i32, i32, i32
  }
  func.func @transform_9(%arg0: i32) -> (i32, i32) {
    %c0_i32 = arith.constant 0 : i32
    %c0_i32_0 = arith.constant 0 : i32
    %c0_i32_1 = arith.constant 0 : i32
    return %c0_i32, %c0_i32_0 : i32, i32
  }
  func.func @transform_10(%arg0: i32) -> (i32, i32, i32) {
    %c0_i32 = arith.constant 0 : i32
    %c0_i32_0 = arith.constant 0 : i32
    %c0_i32_1 = arith.constant 0 : i32
    %c0_i32_2 = arith.constant 0 : i32
    return %c0_i32, %c0_i32_0, %c0_i32_1 : i32, i32, i32
  }
  func.func @transform_11(%arg0: i32) -> (i32, i32) {
    %c0_i32 = arith.constant 0 : i32
    %c0_i32_0 = arith.constant 0 : i32
    %c0_i32_1 = arith.constant 0 : i32
    return %c0_i32, %c0_i32_0 : i32, i32
  }
  func.func @transform_12(%arg0: i32) -> (i32, i32, i32) {
    %c0_i32 = arith.constant 0 : i32
    %c0_i32_0 = arith.constant 0 : i32
    %c0_i32_1 = arith.constant 0 : i32
    return %arg0, %c0_i32, %c0_i32_0 : i32, i32, i32
  }
}

</mosaic_0001>

<bundles_post_ra>
// kernel: transmodel_forward.1
= control target key start
LH: loop header
LB: loop body
LE: loop exit
PB: predicated region body
PF: predicated region fallthrough
CT: control target
= control target key end

     0   :  { %17 = vsyncpa [#allocation3], 0  ;;  %s13296_s0 = inlined_call_operand.vmem [shape: f32[2,10,40], index: 0, kind: input, shape index: {}]   ;;  %s13297_s1 = inlined_call_operand.vmem [shape: bf16[40,128], index: 1, kind: input, shape index: {}]   ;;  %s13298_s2 = inlined_call_operand.vmem [shape: f32[10,128], index: 2, kind: input, shape index: {}]   ;;  %s13299_s3 = inlined_call_operand.hbm [shape: bf16[3,128,384], index: 3, kind: input, shape index: {}]   ;;  %s13300_s4 = inlined_call_operand.hbm [shape: bf16[3,8,16,128], index: 4, kind: input, shape index: {}]   ;;  %s13301_s5 = inlined_call_operand.hbm [shape: bf16[3,128,512], index: 5, kind: input, shape index: {}]   ;;  %s13302_s6 = inlined_call_operand.vmem [shape: f32[3,1,512], index: 6, kind: input, shape index: {}]   ;;  %s13303_s7 = inlined_call_operand.hbm [shape: bf16[3,512,128], index: 7, kind: input, shape index: {}]   ;;  %s13304_s8 = inlined_call_operand.vmem [shape: f32[3,1,128], index: 8, kind: input, shape index: {}]   ;;  %s13305_s9 = inlined_call_operand.vmem [shape: f32[10,10], index: 9, kind: input, shape index: {}]   ;;  %s13306_s10 = inlined_call_operand.vmem [shape: f32[2,10,128], index: 10, kind: input, shape index: {}]   ;;  %s13307_s11 = inlined_call_operand.vmem [shape: f32[1,2], index: 11, kind: input, shape index: {}]   ;;  %s13308_s12 = inlined_call_operand.hbm [shape: f32[2,1,2], index: 12, kind: output, shape index: {}]  }
   0x1   :  { %18 = vsyncpa [#allocation6], 0 }
   0x2   :  { %19 = vsyncpa [#allocation9], 0 }
   0x3   :  { %20 = vsyncpa [#allocation4], 0 }
   0x4   :  { %22 = vsyncpa [#allocation4 + $0x1], 0  ;;  %s12003_s21 = smov 0   ;;  %s12005_s22 = smov 0  }
   0x5   :  { %s12007_s23 = smov 0   ;;  %s12009_s24 = smov 0  }
   0x6 LB: > { %13314 = sst [smem:[#allocation15_spill]] %s11911_s23  ;;  %s12024_s25 = sadd.s32 4294967295, %s11915_s24   ;;  %s11915_s24 = sphi %s12009_s24, %s13324_s24   ;;  %s11911_s23 = sphi %s12007_s23, %s13326_s23   ;;  %s11907_s22 = sphi %s12005_s22, %s13328_s22   ;;  %s11903_s21 = sphi %s12003_s21, %s13327_s21  }
   0x7   : > { %s9624_s26 = sadd.s32 4294967294, %s11915_s24   ;;  %s12028_s27 = sadd.s32 1, %s11915_s24  }
   0x8   : > { %13315 = sst [smem:[#allocation16_spill]] %s12028_s27  ;;  %s292_s28 = sadd.s32 1, %s11911_s23 }
   0x9   : > { %s289_s29 = ssub.s32 %s11915_s24, %s12028_s27  ;;  %p302_p0 = scmp.ne.s32.totalorder %s11911_s23, %s11907_s22 }
   0xa   : > { %p290_p1 = scmp.eq.s32.totalorder %s289_s29, 0  ;;  %p303_p2 = scmp.eq.s32.totalorder %s12024_s25, 1 }
   0xb   : > { %p308_p3 = scmp.ne.s32.totalorder %s11907_s22, %s11903_s21  ;;  %p309_p4 = scmp.eq.s32.totalorder %s9624_s26, 1 }
   0xc   : > { %s12039_s30 = scalar_select %p290_p1, %s11911_s23, %s292_s28  }
   0xd   : > { %p12041_p5 = por %p303_p2, %p302_p0  ;;  %p12045_p6 = por %p309_p4, %p308_p3 }
   0xe   : > { %13316 = sst [smem:[#allocation17_spill]] %s12039_s30  ;;  %p9625_p7 = scmp.ge.s32.totalorder %s11915_s24, 1 }
   0xf   : > { %s13318_s14 = scalar_select %p12045_p6, 1, 0 }
  0x10   : > { %p316_p8 = scmp.lt.s32.totalorder %s11915_s24, 3  ;;  %p11123_p9 = scmp.eq.s32.totalorder %s12024_s25, 0 }
  0x11   : > { %13319 = sst [smem:[#allocation18_spill]] %s13318_s14  ;;  %s11917_s16 = smov [#allocation5]  }
  0x12   : > { %p12052_p10 = pnand %p9625_p7, %p316_p8  ;;  %s347_s17 = sshll.u32 %s11917_s16, 4  ;;  %s348_s17 = int_to_ptr.vmem [resolvable:$true] %s347_s17 }
  0x13   : > { %s11918_s19 = smov [#allocation2]   ;;  %s11750_s26 = scalar_lea.vmem %s348_s17, 3072 }
  0x14   : > { %p11106_p11 = pneg %p12052_p10  ;;  %s334_s20 = sshll.u32 %s11918_s19, 4  ;;  %s335_s20 = int_to_ptr.vmem [resolvable:$true] %s334_s20 }
  0x15   : > { %p11751_p0 = scmp.ne.s32.totalorder %s348_s17, %s11750_s26  ;;  %p11758_p3 = scmp.lt.s32.totalorder %s348_s17, %s348_s17 }
  0x16   : > { %p12060_p12 = pnand %p11123_p9, %p11106_p11  ;;  %p11759_p4 = scmp.lt.s32.totalorder %s11750_s26, %s11750_s26 }
  0x18   : > { %p11741_p13 = pneg %p12060_p12  ;;  %p11760_p7 = por %p11759_p4, %p11758_p3 }
  0x1a   : > { %p11753_p1 = pnand %p11751_p0, %p11741_p13 }
  0x1c   : > { %p11754_p2 = pneg %p11753_p1 }
  0x1e   : > { %p11761_p8 = pnand %p11760_p7, %p11754_p2 }
  0x20   : > { %11764 = shalt.err (!%p11761_p8)
}
  0x21   : > { %s13313_s28 = smov 64   ;;  %s11920_s29 = smov 4  }
  0x22   : > { %11112 = dma.hbm_to_vmem [thread:$0]  (!%p12060_p12), %s13300_s4, 3072, %s348_s17, [#allocation6], %s13313_s28, %s13313_s28, %s11920_s29  }
  0x23   : > { %s11776_s30 = scalar_lea.vmem %s335_s20, 9216  ;;  %p11784_p2 = scmp.lt.s32.totalorder %s335_s20, %s335_s20 }
  0x24   : > { %p11777_p11 = scmp.ne.s32.totalorder %s335_s20, %s11776_s30  ;;  %p11785_p3 = scmp.lt.s32.totalorder %s11776_s30, %s11776_s30 }
  0x26   : > { %p11779_p0 = pnand %p11777_p11, %p11741_p13  ;;  %p11786_p4 = por %p11785_p3, %p11784_p2 }
  0x28   : > { %p11780_p1 = pneg %p11779_p0 }
  0x2a   : > { %p11787_p7 = pnand %p11786_p4, %p11780_p1 }
  0x2c   : > { %11790 = shalt.err (!%p11787_p7)
}
  0x2d   : > { %s11921_s26 = smov 192   ;;  %s11922_s23 = smov 12  }
  0x2e   : > { %11109 = dma.hbm_to_vmem [thread:$0]  (!%p12060_p12), %s13299_s3, 9216, %s335_s20, [#allocation3], %s11921_s26, %s11921_s26, %s11922_s23  }
  0x2f   : > { %s11923_s17 = smov [#allocation7]  }
  0x30   : > { %s360_s16 = sshll.u32 %s11923_s17, 4  ;;  %s361_s16 = int_to_ptr.vmem [resolvable:$true] %s360_s16 }
  0x31   : > { %s11802_s19 = scalar_lea.vmem %s361_s16, 12288  ;;  %p11810_p1 = scmp.lt.s32.totalorder %s361_s16, %s361_s16 }
  0x32   : > { %p11803_p8 = scmp.ne.s32.totalorder %s361_s16, %s11802_s19  ;;  %p11811_p2 = scmp.lt.s32.totalorder %s11802_s19, %s11802_s19 }
  0x34   : > { %p11805_p11 = pnand %p11803_p8, %p11741_p13  ;;  %p11812_p3 = por %p11811_p2, %p11810_p1 }
  0x36   : > { %p11806_p0 = pneg %p11805_p11 }
  0x38   : > { %p11813_p4 = pnand %p11812_p3, %p11806_p0 }
  0x3a   : > { %11816 = shalt.err (!%p11813_p4)
}
  0x3b   : > { %s11924_s30 = smov 256   ;;  %s11925_s28 = smov 16  }
  0x3c   : > { %11115 = dma.hbm_to_vmem [thread:$0]  (!%p12060_p12), %s13301_s5, 12288, %s361_s16, [#allocation6], %s11924_s30, %s11924_s30, %s11925_s28  }
  0x3d   : > { %s11926_s14 = smov [#allocation8]  }
  0x3e   : > { %s376_s20 = sshll.u32 %s11926_s14, 4  ;;  %s377_s20 = int_to_ptr.vmem [resolvable:$true] %s376_s20 }
  0x3f   : > { %s11828_s26 = scalar_lea.vmem %s377_s20, 12288  ;;  %p11836_p0 = scmp.lt.s32.totalorder %s377_s20, %s377_s20 }
  0x40   : > { %p11829_p7 = scmp.ne.s32.totalorder %s377_s20, %s11828_s26  ;;  %p11837_p1 = scmp.lt.s32.totalorder %s11828_s26, %s11828_s26 }
  0x42   : > { %p11831_p8 = pnand %p11829_p7, %p11741_p13  ;;  %p11838_p2 = por %p11837_p1, %p11836_p0 }
  0x44   : > { %p11832_p11 = pneg %p11831_p8 }
  0x46   : > { %p11839_p3 = pnand %p11838_p2, %p11832_p11 }
  0x48   : > { %11842 = shalt.err (!%p11839_p3)
}
  0x49   : > { %s13322_s17 = smov 64   ;;  %412 = sbr.rel (%p12052_p10) target bundleno = 15576 (0x3cd8), region = 68 }
  0x4a   : > { %11118 = dma.hbm_to_vmem [thread:$0]  (!%p12060_p12), %s13303_s7, 12288, %s377_s20, [#allocation9], %s13322_s17, %s13322_s17, %s11920_s29  }
  0x4e   : > { %11886 = dma.done.wait (%p11123_p9), [#allocation3], 9216  }
  0x4f   : > { %11888 = vsyncadd (%p11123_p9), [#allocation3], 4294958080 }
  0x50   : > { %11890 = dma.done.wait (%p11123_p9), [#allocation6], 15360  }
  0x51   : > { %11892 = vsyncadd (%p11123_p9), [#allocation6], 4294951936 }
  0x52   : > { %11894 = dma.done.wait (%p11123_p9), [#allocation9], 12288  }
  0x53   : > { %11896 = vsyncadd (%p11123_p9), [#allocation9], 4294955008  ;;  %p465_p10 = scmp.lt.s32.totalorder %s12024_s25, 1  ;;  %v11927_v0 = vmov 0.0   ;;  %vm11928_vm0 = vmmov 0   ;;  %vm500_vm1 = vcmask 1043456  }
  0x54   : > { %10538 = vmatprep.subr.bf16.mxu0 %v11927_v0  ;;  %10544 = vmatprep.mubr.msk.bf16.mxu0 %vm11928_vm0, %v11927_v0  ;;  %v11184_v1 = vld [vmem:[%s13297_s1 + $0x10] ss:$0 sps:$4 sm:$0xff]   ;;  %v11185_v3 = vld [vmem:[%s13297_s1 + $0x8] sm:$0xff]   ;;  %v11186_v6 = vld [vmem:[%s13297_s1] sm:$0xff]   ;;  %vm496_vm2 = vcmask 326656   ;;  %v11929_v32 = vmov 0  }
  0x55   : > { %s466_s15 = scalar_select %p465_p10, %s12024_s25, 1  ;;  %v502_v2 = vsel %vm500_vm1, %v11184_v1, 0  ;;  %v11187_v4 = vld [vmem:[#allocation2 + $0xac] ss:$12 sps:$4 sm:$0xff]   ;;  %v11189_v5 = vld [vmem:[#allocation2 + $0xa8] ss:$12 sps:$4 sm:$0xff]   ;;  %738 = vmatprep.mubr.bf16.mxu1 %v11929_v32 }
  0x56   : > { %10539 = vmatpush3.bf16.msra.mxu0 %v502_v2  ;;  %706 = vmatprep.subr.bf16.mxu1 %v11187_v4  ;;  %v11191_v9 = vld [vmem:[#allocation2 + $0x94] ss:$12 sps:$4 sm:$0xff]   ;;  %v11193_v10 = vld [vmem:[#allocation2 + $0x90] ss:$12 sps:$4 sm:$0xff]   ;;  %v11197_v14 = vld [vmem:[#allocation2 + $0x78] ss:$12 sps:$4 sm:$0xff]  }
  0x57   : > { %s10134_s18 = sshll.u32 %s466_s15, 4  ;;  %10540 = vmatprep.subr.bf16.mxu0 %v11927_v0  ;;  %707 = vmatpush1.bf16.msra.mxu1 %v11189_v5  ;;  %v11195_v11 = vld [vmem:[#allocation2 + $0x7c] ss:$12 sps:$4 sm:$0xff]   ;;  %v11199_v15 = vld [vmem:[#allocation2 + $0x64] ss:$12 sps:$4 sm:$0xff]   ;;  %vm792_vm3 = vcmask 130048  }
  0x58   : > { %s469_s27 = scalar_lea.vmem %s13296_s0, %s10134_s18  ;;  %708 = vmatprep.subr.bf16.mxu1 %v11191_v9  ;;  %v11190_v13 = vld [vmem:[#allocation2 + $0xb0] ss:$12 sps:$4 sm:$0xff]   ;;  %v11194_v16 = vld [vmem:[#allocation2 + $0x98] ss:$12 sps:$4 sm:$0xff]   ;;  %v11201_v17 = vld [vmem:[#allocation2 + $0x60] ss:$12 sps:$4 sm:$0xff]  }
  0x59   : > { %v471_v7 = vld [vmem:[%s469_s27] sm:$0xff]  ;;  %v472_v8 = vld [vmem:[%s469_s27 + $0x8] sm:$0x3]  ;;  %v11203_v18 = vld [vmem:[#allocation2 + $0x4c] ss:$12 sps:$4 sm:$0xff]   ;;  %s11930_s29 = smov 112  }
  0x5a   : > { %10541 = vmatpush3.bf16.msra.mxu0 %v11185_v3  ;;  %v473_v12 = vpack.c.bf16 %v472_v8, %v471_v7  ;;  %v11198_v19 = vld [vmem:[#allocation2 + $0x80] ss:$12 sps:$4 sm:$0xff]   ;;  %v11205_v20 = vld [vmem:[#allocation2 + $0x48] ss:$12 sps:$4 sm:$0xff]   ;;  %v11209_v23 = vld [vmem:[#allocation2 + $0x30] ss:$12 sps:$4 sm:$0xff]  }
  0x5b   : > { %10542 = vmatprep.subr.bf16.mxu0 %v11927_v0  ;;  %709 = vmatpush1.bf16.msra.mxu1 %v11193_v10  ;;  %v11207_v21 = vld [vmem:[#allocation2 + $0x34] ss:$12 sps:$4 sm:$0xff]   ;;  %v11206_v24 = vld [vmem:[#allocation2 + $0x50] ss:$12 sps:$4 sm:$0xff]   ;;  %v11210_v25 = vld [vmem:[#allocation2 + $0x38] ss:$12 sps:$4 sm:$0xff]  }
  0x5c   : > { %710 = vmatprep.subr.bf16.mxu1 %v11195_v11  ;;  %v11202_v22 = vld [vmem:[#allocation2 + $0x68] ss:$12 sps:$4 sm:$0xff]   ;;  %v11213_v27 = vld [vmem:[#allocation2 + $0x18] ss:$12 sps:$4 sm:$0xff]   ;;  %v11214_v28 = vld [vmem:[#allocation2 + $0x20] ss:$12 sps:$4 sm:$0xff]  }
  0x5d   : > { %v11211_v26 = vld [vmem:[#allocation2 + $0x1c] ss:$12 sps:$4 sm:$0xff]   ;;  %v11215_v29 = vld [vmem:[#allocation2 + $0x4] ss:$12 sps:$4 sm:$0xff]   ;;  %v11217_v30 = vld [vmem:[#allocation2] ss:$12 sps:$4 sm:$0xff]  }
  0x5e   : > { %10543 = vmatpush3.bf16.msra.mxu0 %v11186_v6  ;;  %v11218_v31 = vld [vmem:[#allocation2 + $0x8] ss:$12 sps:$4 sm:$0xff]   ;;  %v479_v34 = vld [vmem:[%s13298_s2] sm:$0xff]  ;;  %vm910_vm4 = vcmask 1041408   ;;  %vm884_vm5 = vcmask 74752   ;;  %vm880_vm6 = vcmask 80896  }
  0x5f   : > { %10548 = vmatprep.subr.bf16.mxu0 %v11927_v0  ;;  %711 = vmatpush1.bf16.msra.mxu1 %v11197_v14  ;;  %v480_v36 = vld [vmem:[%s13298_s2 + $0x8] sm:$0x3]  ;;  %v12211_v57 = vld [vmem:[%s13305_s9] sm:$0xff]  ;;  %s11931_s14 = smov 96   ;;  %s11932_s16 = smov 80   ;;  %vm9510_vm7 = vcmask 7168  }
  0x60   : > { %712 = vmatprep.subr.bf16.mxu1 %v11199_v15  ;;  %v1045_v54 = vld [vmem:[%s13305_s9 + $0x8] sm:$0x3]  ;;  %s11933_s19 = smov 64   ;;  %s11934_s27 = smov 48   ;;  %vm9513_vm8 = vcmask 8192  }
  0x61   : > { %10545 = vmatmul.mubr.msk.bf16.vlgmr.msra.gmra.mxu0 %vm496_vm2, %v473_v12  ;;  %v791_v62 = vld [vmem:[%s13305_s9 + $0x8] sm:$0x3]  ;;  %s11935_s17 = smov 32   ;;  %s11936_s18 = smov 16  }
  0x62   : > { %10549 = vmatpush3.bf16.msra.mxu0 %v11190_v13  ;;  %10564 = vmatprep.mubr.msk.bf16.mxu0 %vm11928_vm0, %v11927_v0  ;;  %s463_s26 = sand.u32 1, %s11907_s22   ;;  %s10131_s28 = sshll.u32 %s12024_s25, 4 }
  0x63   : > { %10550 = vmatprep.subr.bf16.mxu0 %v11927_v0  ;;  %713 = vmatpush1.bf16.msra.mxu1 %v11201_v17  ;;  %s9516_s23 = scalar_lea.sflag [#allocation4], %s463_s26  ;;  %s11937_s20 = smov [#allocation10]  }
  0x64   : > { %714 = vmatprep.subr.bf16.mxu1 %v11203_v18 }
  0x66   : > { %10551 = vmatpush3.bf16.msra.mxu0 %v11194_v16 }
  0x67   : > { %10552 = vmatprep.subr.bf16.mxu0 %v11927_v0  ;;  %715 = vmatpush1.bf16.msra.mxu1 %v11205_v20 }
  0x68   : > { %716 = vmatprep.subr.bf16.mxu1 %v11207_v21 }
  0x6a   : > { %10553 = vmatpush3.bf16.msra.mxu0 %v11198_v19 }
  0x6b   : > { %10554 = vmatprep.subr.bf16.mxu0 %v11927_v0  ;;  %717 = vmatpush1.bf16.msra.mxu1 %v11209_v23 }
  0x6c   : > { %718 = vmatprep.subr.bf16.mxu1 %v11211_v26 }
  0x6e   : > { %10555 = vmatpush3.bf16.msra.mxu0 %v11202_v22 }
  0x6f   : > { %10556 = vmatprep.subr.bf16.mxu0 %v11927_v0  ;;  %719 = vmatpush1.bf16.msra.mxu1 %v11213_v27 }
  0x70   : > { %720 = vmatprep.subr.bf16.mxu1 %v11215_v29 }
  0x72   : > { %10557 = vmatpush3.bf16.msra.mxu0 %v11206_v24 }
  0x73   : > { %10558 = vmatprep.subr.bf16.mxu0 %v11927_v0  ;;  %721 = vmatpush1.bf16.msra.mxu1 %v11217_v30 }
  0x76   : > { %10559 = vmatpush3.bf16.msra.mxu0 %v11210_v25 }
  0x77   : > { %10560 = vmatprep.subr.bf16.mxu0 %v11927_v0 }
  0x7a   : > { %10561 = vmatpush3.bf16.msra.mxu0 %v11214_v28 }
  0x7b   : > { %10562 = vmatprep.subr.bf16.mxu0 %v11927_v0 }
  0x7e   : > { %10563 = vmatpush3.bf16.msra.mxu0 %v11218_v31 }
 0x121   : > { %v538_v33 = vpop.f32.mrf.mxu0 }
 0x122   : > { %v12154_v38 = vadd.f32 %v538_v33, %v479_v34 }
 0x123   : > { %v10546_v35 = vpop.f32.mrf.mxu0 }
 0x125   : > { %v541_v37 = vpop.f32.mrf.mxu0 }
 0x126   : > { %v12156_v39 = vadd.f32 %v541_v37, %v480_v36 }
 0x127   : > { %v10547_v40 = vpop.f32.mrf.mxu0 }
 0x128   : > { %v545_v41 = vpack.c.bf16 %v12156_v39, %v12154_v38 }
 0x12a   : > { %739 = vmatmul.mubr.bf16.vlgmr.msra.gmra.mxu1 %v545_v41  ;;  %10565 = vmatmul.mubr.bf16.vlgmr.msra.gmra.mxu0 %v545_v41 }
 0x1ea   : > { %v12160_v42 = vpop.f32.mrf.mxu1  ;;  %v12162_v43 = vpop.f32.mrf.mxu0 }
 0x1eb   : > { %1046 = vrot.lane.b32.xlu1 %v12160_v42, %s11930_s29  ;;  %10572 = vmatprep.mubr.msk.f32.mxu1 %vm792_vm3, %v12160_v42 }
 0x1ec   : > { %v12168_v44 = vpop.f32.mrf.mxu1  ;;  %v10566_v45 = vpop.f32.mrf.mxu0 }
 0x1ee   : > { %v12170_v46 = vpop.f32.mrf.mxu1  ;;  %v12172_v47 = vpop.f32.mrf.mxu0 }
 0x1ef   : > { %1048 = vrot.lane.b32.xlu1 %v12170_v46, %s11930_s29 }
 0x1f0   : > { %v12176_v48 = vpop.f32.mrf.mxu1  ;;  %v10567_v49 = vpop.f32.mrf.mxu0 }
 0x1f1   : > { %1052 = vrot.lane.b32.xlu0 %v12176_v48, %s11930_s29  ;;  %10568 = vmatprep.subr.msk.mxu1 %vm792_vm3, %v12176_v48 }
 0x1f2   : > { %10569 = vmatpush3.xpose.msk.msra.mxu1 %vm792_vm3, %v12176_v48 }
 0x1f3   : > { %10570 = vmatprep.subr.msk.mxu1 %vm792_vm3, %v12168_v44 }
 0x1f5   : > { %1050 = vrot.lane.b32.xlu0 %v12168_v44, %s11930_s29 }
 0x1f6   : > { %10571 = vmatpush3.xpose.msk.msra.mxu1 %vm792_vm3, %v12168_v44 }
 0x1f7   : > { %10575 = vmatprep.subr.msk.mxu1 %vm910_vm4, %v12172_v47 }
 0x1f9   : > { %10573 = vmatmul.mubr.msk.f32.vlgmr.msra.gmra.mxu1 %vm792_vm3, %v12170_v46 }
 0x1fa   : > { %10576 = vmatpush3.msk.msra.mxu1 %vm910_vm4, %v12172_v47 }
 0x1fb   : > { %10577 = vmatprep.subr.mxu1 %v12162_v43 }
 0x1fc   : > { %10578 = vmatpush3.msra.mxu1 %v12162_v43 }
 0x1fd   : > { %10582 = vmatprep.subr.bf16.mxu1 %v11927_v0 }
 0x25d   : > { %v1047_v50 = vpop.permute.xlu1 %1046 }
 0x25e   : > { %10592 = vmatprep.mubr.msk.f32.mxu0 %vm792_vm3, %v1047_v50  ;;  %v1305_v50 = vld [vmem:[%s13305_s9 + $0x8] sm:$0x3] }
 0x261   : > { %v1049_v53 = vpop.permute.xlu1 %1048 }
 0x263   : > { %v1053_v51 = vpop.permute.xlu0 %1052 }
 0x264   : > { %10588 = vmatprep.subr.msk.mxu0 %vm792_vm3, %v1053_v51 }
 0x265   : > { %10589 = vmatpush3.xpose.msk.msra.mxu0 %vm792_vm3, %v1053_v51 }
 0x267   : > { %v1051_v52 = vpop.permute.xlu0 %1050 }
 0x268   : > { %10590 = vmatprep.subr.msk.mxu0 %vm792_vm3, %v1051_v52 }
 0x269   : > { %10591 = vmatpush3.xpose.msk.msra.mxu0 %vm792_vm3, %v1051_v52 }
 0x26c   : > { %10593 = vmatmul.mubr.msk.f32.vlgmr.msra.gmra.mxu0 %vm792_vm3, %v1049_v53 }
 0x2b9   : > { %v10574_v63 = vpop.f32.mrf.mxu1 }
 0x2ba   : > { %v877_v1 = vadd.f32 %v10574_v63, %v791_v62  ;;  %v11219_v63 = vld [vmem:[#allocation5] sm:$0xff]  }
 0x2bb   : > { %v871_v14 = vpop.f32.mrf.mxu1 }
 0x2bc   : > { %v885_v2 = vsel %vm884_vm5, %v877_v1, -inf  ;;  %v872_v15 = vadd.f32 %v871_v14, %v12211_v57 }
 0x2be   : > { %v881_v16 = vsel %vm880_vm6, %v872_v15, -inf }
 0x32c   : > { %v10594_v55 = vpop.f32.mrf.mxu0 }
 0x32d   : > { %v1134_v56 = vadd.f32 %v10594_v55, %v1045_v54 }
 0x32e   : > { %v1128_v58 = vpop.f32.mrf.mxu0 }
 0x32f   : > { %v1129_v59 = vadd.f32 %v1128_v58, %v12211_v57  ;;  %v1140_v60 = vsel %vm884_vm5, %v1134_v56, -inf }
 0x330   : > { %1141 = vmax.xlane.f32.xlu1 %v1140_v60 }
 0x331   : > { %v1137_v61 = vsel %vm880_vm6, %v1129_v59, -inf }
 0x332   : > { %1138 = vmax.xlane.f32.xlu0 %v1137_v61 }
 0x341   : > { %1162 = vrot.lane.b32.xlu1 %v12172_v47, %s11930_s29 }
 0x345   : > { %1312 = vrot.lane.b32.xlu1 %v12176_v48, %s11931_s14 }
 0x349   : > { %1310 = vrot.lane.b32.xlu1 %v12168_v44, %s11931_s14 }
 0x34d   : > { %1308 = vrot.lane.b32.xlu1 %v12170_v46, %s11931_s14 }
 0x371   : > { %886 = vmax.xlane.f32.xlu1 %v885_v2 }
 0x3b9   : > { %v1142_v3 = vpop.xlane.xlu1 %1141 }
 0x3ba   : > { %v1144_v4 = vsub.f32 %v1134_v56, %v1142_v3 }
 0x3bb   : > { %v1139_v5 = vpop.xlane.xlu0 %1138 }
 0x3bc   : > { %v1147_v6 = vmul.f32 1.442695, %v1144_v4  ;;  %v1143_v7 = vsub.f32 %v1129_v59, %v1139_v5 }
 0x3bd   : > { %v1163_v8 = vpop.permute.xlu1 %1162 }
 0x3be   : > { %11547 = vpow2.f32 %v1147_v6  ;;  %v1145_v9 = vmul.f32 1.442695, %v1143_v7  ;;  %10595 = vmatprep.subr.msk.mxu0 %vm910_vm4, %v1163_v8 }
 0x3bf   : > { %10596 = vmatpush3.msk.msra.mxu0 %vm910_vm4, %v1163_v8 }
 0x3c0   : > { %11549 = vpow2.f32 %v1145_v9 }
 0x3c1   : > { %v1313_v20 = vpop.permute.xlu1 %1312 }
 0x3c5   : > { %v1311_v26 = vpop.permute.xlu1 %1310 }
 0x3c9   : > { %v1309_v27 = vpop.permute.xlu1 %1308 }
 0x3cb   : > { %v11548_v10 = vpop.eup %11547 }
 0x3cc   : > { %v1152_v11 = vsel %vm884_vm5, %v11548_v10, 0.0 }
 0x3cd   : > { %v11550_v12 = vpop.eup %11549  ;;  %1153 = vadd.xlane.f32.xlu0 %v1152_v11 }
 0x3ce   : > { %v1149_v13 = vsel %vm880_vm6, %v11550_v12, 0.0 }
 0x3d1   : > { %1150 = vadd.xlane.f32.xlu0 %v1149_v13  ;;  %v11220_v13 = vld [vmem:[#allocation5 + $0x8] sm:$0xff]  }
 0x3e7   : > { %1160 = vrot.lane.b32.xlu0 %v12162_v43, %s11930_s29 }
 0x3eb   : > { %1306 = vrot.lane.b32.xlu0 %v12160_v42, %s11931_s14 }
 0x3fa   : > { %v887_v28 = vpop.xlane.xlu1 %886 }
 0x3fb   : > { %v889_v29 = vsub.f32 %v877_v1, %v887_v28  ;;  %v11221_v28 = vld [vmem:[#allocation5 + $0x10] sm:$0xff]  }
 0x3fd   : > { %v892_v33 = vmul.f32 1.442695, %v889_v29 }
 0x40a   : > { %882 = vmax.xlane.f32.xlu0 %v881_v16 }
 0x456   : > { %v1154_v17 = vpop.xlane.xlu0 %1153 }
 0x457   : > { %11551 = vrcp.f32 %v1154_v17 }
 0x45a   : > { %v1151_v18 = vpop.xlane.xlu0 %1150 }
 0x45b   : > { %11553 = vrcp.f32 %v1151_v18 }
 0x45e   : > { %v1161_v19 = vpop.permute.xlu0 %1160 }
 0x45f   : > { %10597 = vmatprep.subr.mxu0 %v1161_v19 }
 0x460   : > { %10598 = vmatpush3.msra.mxu0 %v1161_v19 }
 0x461   : > { %10608 = vmatprep.subr.msk.mxu0 %vm792_vm3, %v1313_v20 }
 0x462   : > { %v1307_v25 = vpop.permute.xlu0 %1306 }
 0x464   : > { %v11552_v21 = vpop.eup %11551 }
 0x465   : > { %v1158_v24 = vmul.f32 %v11552_v21, %v11548_v10 }
 0x468   : > { %v11554_v22 = vpop.eup %11553 }
 0x469   : > { %v1157_v23 = vmul.f32 %v11554_v22, %v11550_v12 }
 0x46b   : > { %10599 = vmatprep.mubr.msk.f32.mxu0 %vm880_vm6, %v1157_v23 }
 0x46c   : > { %10600 = vmatmul.mubr.msk.f32.vlgmr.msra.gmra.mxu0 %vm880_vm6, %v1158_v24 }
 0x46d   : > { %10609 = vmatpush3.xpose.msk.msra.mxu0 %vm792_vm3, %v1313_v20  ;;  %10612 = vmatprep.mubr.msk.f32.mxu0 %vm792_vm3, %v1307_v25 }
 0x46e   : > { %10610 = vmatprep.subr.msk.mxu0 %vm792_vm3, %v1311_v26 }
 0x471   : > { %10611 = vmatpush3.xpose.msk.msra.mxu0 %vm792_vm3, %v1311_v26 }
 0x472   : > { %10622 = vmatprep.subr.bf16.mxu0 %v11927_v0 }
 0x474   : > { %10613 = vmatmul.mubr.msk.f32.vlgmr.msra.gmra.mxu0 %vm792_vm3, %v1309_v27 }
 0x475   : > { %10624 = vmatprep.mubr.msk.bf16.mxu0 %vm11928_vm0, %v11927_v0  ;;  %10623 = vmatpush3.bf16.msra.mxu0 %v11221_v28  ;;  %v1823_v28 = vld [vmem:[%s13305_s9 + $0x8] sm:$0x3] }
 0x493   : > { %v883_v30 = vpop.xlane.xlu0 %882 }
 0x494   : > { %v888_v31 = vsub.f32 %v872_v15, %v883_v30 }
 0x496   : > { %v890_v34 = vmul.f32 1.442695, %v888_v31 }
 0x498   : > { %11555 = vpow2.f32 %v890_v34 }
 0x499   : > { %11557 = vpow2.f32 %v892_v33 }
 0x4a5   : > { %v11556_v35 = vpop.eup %11555 }
 0x4a6   : > { %v894_v36 = vsel %vm880_vm6, %v11556_v35, 0.0  ;;  %v11558_v37 = vpop.eup %11557 }
 0x4a7   : > { %895 = vadd.xlane.f32.xlu0 %v894_v36  ;;  %v897_v40 = vsel %vm884_vm5, %v11558_v37, 0.0 }
 0x4ab   : > { %898 = vadd.xlane.f32.xlu0 %v897_v40 }
 0x52c   : > { %v10601_v41 = vpop.f32.mrf.mxu0 }
 0x52e   : > { %v1239_v49 = vpop.f32.mrf.mxu0 }
 0x52f   : > { %v1248_v16 = vpack.c.bf16 %v10601_v41, %v1239_v49 }
 0x530   : > { %v896_v45 = vpop.xlane.xlu0 %895 }
 0x531   : > { %11559 = vrcp.f32 %v896_v45 }
 0x534   : > { %v10614_v51 = vpop.f32.mrf.mxu0  ;;  %v899_v52 = vpop.xlane.xlu0 %898 }
 0x535   : > { %v1394_v53 = vadd.f32 %v10614_v51, %v1305_v50  ;;  %11561 = vrcp.f32 %v899_v52 }
 0x536   : > { %v1388_v54 = vpop.f32.mrf.mxu0 }
 0x537   : > { %v1389_v55 = vadd.f32 %v1388_v54, %v12211_v57  ;;  %v1400_v56 = vsel %vm884_vm5, %v1394_v53, -inf }
 0x538   : > { %1401 = vmax.xlane.f32.xlu0 %v1400_v56 }
 0x539   : > { %v1397_v58 = vsel %vm880_vm6, %v1389_v55, -inf }
 0x53a   : > { %1398 = vmax.xlane.f32.xlu1 %v1397_v58 }
 0x53e   : > { %v11560_v59 = vpop.eup %11559 }
 0x53f   : > { %v902_v60 = vmul.f32 %v11560_v59, %v11556_v35 }
 0x541   : > { %10579 = vmatprep.mubr.msk.f32.mxu1 %vm880_vm6, %v902_v60 }
 0x542   : > { %v11562_v61 = vpop.eup %11561 }
 0x543   : > { %v903_v62 = vmul.f32 %v11562_v61, %v11558_v37 }
 0x545   : > { %10580 = vmatmul.mubr.msk.f32.vlgmr.msra.gmra.mxu1 %vm880_vm6, %v903_v62 }
 0x546   : > { %10584 = vmatprep.mubr.msk.bf16.mxu1 %vm11928_vm0, %v11927_v0  ;;  %10583 = vmatpush3.bf16.msra.mxu1 %v11219_v63 }
 0x547   : > { %10602 = vmatprep.subr.bf16.mxu1 %v11927_v0 }
 0x54b   : > { %1421 = vrot.lane.b32.xlu1 %v12172_v47, %s11931_s14 }
 0x54f   : > { %1571 = vrot.lane.b32.xlu1 %v12176_v48, %s11932_s16 }
 0x553   : > { %1569 = vrot.lane.b32.xlu1 %v12168_v44, %s11932_s16 }
 0x5c1   : > { %v1402_v1 = vpop.xlane.xlu0 %1401 }
 0x5c2   : > { %v1404_v2 = vsub.f32 %v1394_v53, %v1402_v1  ;;  %v1564_v53 = vld [vmem:[%s13305_s9 + $0x8] sm:$0x3] }
 0x5c3   : > { %v1399_v3 = vpop.xlane.xlu1 %1398 }
 0x5c4   : > { %v1407_v4 = vmul.f32 1.442695, %v1404_v2  ;;  %v1403_v5 = vsub.f32 %v1389_v55, %v1399_v3 }
 0x5c6   : > { %11563 = vpow2.f32 %v1407_v4  ;;  %v1405_v6 = vmul.f32 1.442695, %v1403_v5 }
 0x5c7   : > { %v1422_v15 = vpop.permute.xlu1 %1421 }
 0x5c8   : > { %11565 = vpow2.f32 %v1405_v6 }
 0x5cb   : > { %v1572_v17 = vpop.permute.xlu1 %1571 }
 0x5cf   : > { %v1570_v18 = vpop.permute.xlu1 %1569 }
 0x5d3   : > { %v11564_v7 = vpop.eup %11563 }
 0x5d4   : > { %v1412_v8 = vsel %vm884_vm5, %v11564_v7, 0.0 }
 0x5d5   : > { %v11566_v9 = vpop.eup %11565  ;;  %1413 = vadd.xlane.f32.xlu0 %v1412_v8 }
 0x5d6   : > { %v1409_v10 = vsel %vm880_vm6, %v11566_v9, 0.0 }
 0x5d7   : > { %1410 = vadd.xlane.f32.xlu1 %v1409_v10 }
 0x5e8   : > { %1567 = vrot.lane.b32.xlu1 %v12170_v46, %s11932_s16 }
 0x5eb   : > { %1419 = vrot.lane.b32.xlu0 %v12162_v43, %s11931_s14 }
 0x5ef   : > { %1565 = vrot.lane.b32.xlu0 %v12160_v42, %s11932_s16 }
 0x605   : > { %v10581_v11 = vpop.f32.mrf.mxu1 }
 0x607   : > { %v980_v12 = vpop.f32.mrf.mxu1 }
 0x608   : > { %v989_v14 = vpack.c.bf16 %v10581_v11, %v980_v12 }
 0x60a   : > { %10585 = vmatmul.mubr.msk.bf16.vlgmr.msra.gmra.mxu1 %vm792_vm3, %v989_v14 }
 0x60b   : > { %10603 = vmatpush3.bf16.msra.mxu1 %v11220_v13  ;;  %10604 = vmatprep.mubr.msk.bf16.mxu1 %vm11928_vm0, %v11927_v0 }
 0x60c   : > { %10615 = vmatprep.subr.msk.mxu1 %vm910_vm4, %v1422_v15 }
 0x612   : > { %10605 = vmatmul.mubr.msk.bf16.vlgmr.msra.gmra.mxu1 %vm792_vm3, %v1248_v16 }
 0x613   : > { %10616 = vmatpush3.msk.msra.mxu1 %vm910_vm4, %v1422_v15 }
 0x65e   : > { %v1414_v19 = vpop.xlane.xlu0 %1413 }
 0x65f   : > { %11567 = vrcp.f32 %v1414_v19 }
 0x660   : > { %v1411_v20 = vpop.xlane.xlu1 %1410 }
 0x661   : > { %11569 = vrcp.f32 %v1411_v20 }
 0x662   : > { %v1420_v21 = vpop.permute.xlu0 %1419 }
 0x663   : > { %10617 = vmatprep.subr.mxu1 %v1420_v21 }
 0x664   : > { %10618 = vmatpush3.msra.mxu1 %v1420_v21  ;;  %v1568_v27 = vpop.permute.xlu1 %1567 }
 0x665   : > { %10628 = vmatprep.subr.msk.mxu1 %vm792_vm3, %v1572_v17 }
 0x666   : > { %v1566_v26 = vpop.permute.xlu0 %1565 }
 0x66c   : > { %v11568_v22 = vpop.eup %11567 }
 0x66d   : > { %v1418_v25 = vmul.f32 %v11568_v22, %v11564_v7 }
 0x66e   : > { %v11570_v23 = vpop.eup %11569 }
 0x66f   : > { %v1417_v24 = vmul.f32 %v11570_v23, %v11566_v9 }
 0x671   : > { %10619 = vmatprep.mubr.msk.f32.mxu1 %vm880_vm6, %v1417_v24  ;;  %v11222_v24 = vld [vmem:[#allocation5 + $0x18] sm:$0xff]  }
 0x672   : > { %10620 = vmatmul.mubr.msk.f32.vlgmr.msra.gmra.mxu1 %vm880_vm6, %v1418_v25 }
 0x673   : > { %10629 = vmatpush3.xpose.msk.msra.mxu1 %vm792_vm3, %v1572_v17  ;;  %10632 = vmatprep.mubr.msk.f32.mxu1 %vm792_vm3, %v1566_v26 }
 0x674   : > { %10630 = vmatprep.subr.msk.mxu1 %vm792_vm3, %v1570_v18 }
 0x677   : > { %10631 = vmatpush3.xpose.msk.msra.mxu1 %vm792_vm3, %v1570_v18 }
 0x678   : > { %10642 = vmatprep.subr.bf16.mxu1 %v11927_v0 }
 0x67a   : > { %10633 = vmatmul.mubr.msk.f32.vlgmr.msra.gmra.mxu1 %vm792_vm3, %v1568_v27 }
 0x67b   : > { %10644 = vmatprep.mubr.msk.bf16.mxu1 %vm11928_vm0, %v11927_v0  ;;  %10643 = vmatpush3.bf16.msra.mxu1 %v11222_v24 }
 0x6ca   : > { %v1035_v29 = vpop.f32.mrf.mxu1 }
 0x6cb   : > { %v1042_v34 = vadd.f32 %v1035_v29, %v12154_v38 }
 0x6cc   : > { %v10586_v30 = vpop.f32.mrf.mxu1 }
 0x6ce   : > { %v1038_v31 = vpop.f32.mrf.mxu1 }
 0x6cf   : > { %v1043_v40 = vadd.f32 %v1038_v31, %v12156_v39 }
 0x6d0   : > { %v10587_v33 = vpop.f32.mrf.mxu1 }
 0x6d2   : > { %v1295_v35 = vpop.f32.mrf.mxu1 }
 0x6d3   : > { %v1302_v36 = vadd.f32 %v1295_v35, %v1042_v34 }
 0x6d4   : > { %v10606_v37 = vpop.f32.mrf.mxu1 }
 0x6d6   : > { %v1298_v41 = vpop.f32.mrf.mxu1 }
 0x6d7   : > { %v1303_v45 = vadd.f32 %v1298_v41, %v1043_v40 }
 0x6d8   : > { %v10607_v49 = vpop.f32.mrf.mxu1 }
 0x732   : > { %v10621_v50 = vpop.f32.mrf.mxu1 }
 0x734   : > { %v1498_v51 = vpop.f32.mrf.mxu1 }
 0x735   : > { %v1507_v52 = vpack.c.bf16 %v10621_v50, %v1498_v51 }
 0x737   : > { %10625 = vmatmul.mubr.msk.bf16.vlgmr.msra.gmra.mxu0 %vm792_vm3, %v1507_v52 }
 0x73a   : > { %v10634_v54 = vpop.f32.mrf.mxu1 }
 0x73b   : > { %v1653_v55 = vadd.f32 %v10634_v54, %v1564_v53 }
 0x73c   : > { %v1647_v38 = vpop.f32.mrf.mxu1 }
 0x73d   : > { %v1648_v56 = vadd.f32 %v1647_v38, %v12211_v57  ;;  %v1659_v58 = vsel %vm884_vm5, %v1653_v55, -inf }
 0x73e   : > { %1660 = vmax.xlane.f32.xlu1 %v1659_v58 }
 0x73f   : > { %v1656_v39 = vsel %vm880_vm6, %v1648_v56, -inf }
 0x740   : > { %1657 = vmax.xlane.f32.xlu0 %v1656_v39 }
 0x74f   : > { %1680 = vrot.lane.b32.xlu1 %v12172_v47, %s11932_s16 }
 0x753   : > { %1830 = vrot.lane.b32.xlu1 %v12176_v48, %s11933_s19 }
 0x757   : > { %1828 = vrot.lane.b32.xlu1 %v12168_v44, %s11933_s19 }
 0x75b   : > { %1826 = vrot.lane.b32.xlu1 %v12170_v46, %s11933_s19 }
 0x7c7   : > { %v1661_v59 = vpop.xlane.xlu1 %1660 }
 0x7c8   : > { %v1663_v60 = vsub.f32 %v1653_v55, %v1661_v59 }
 0x7c9   : > { %v1658_v61 = vpop.xlane.xlu0 %1657 }
 0x7ca   : > { %v1666_v62 = vmul.f32 1.442695, %v1663_v60  ;;  %v1662_v63 = vsub.f32 %v1648_v56, %v1658_v61 }
 0x7cb   : > { %v1681_v1 = vpop.permute.xlu1 %1680 }
 0x7cc   : > { %11571 = vpow2.f32 %v1666_v62  ;;  %v1664_v2 = vmul.f32 1.442695, %v1662_v63  ;;  %10635 = vmatprep.subr.msk.mxu0 %vm910_vm4, %v1681_v1 }
 0x7cd   : > { %10636 = vmatpush3.msk.msra.mxu0 %vm910_vm4, %v1681_v1 }
 0x7ce   : > { %11573 = vpow2.f32 %v1664_v2 }
 0x7cf   : > { %v1831_v16 = vpop.permute.xlu1 %1830 }
 0x7d3   : > { %v1829_v22 = vpop.permute.xlu1 %1828 }
 0x7d7   : > { %v1827_v23 = vpop.permute.xlu1 %1826 }
 0x7d9   : > { %v11572_v3 = vpop.eup %11571 }
 0x7da   : > { %v1671_v4 = vsel %vm884_vm5, %v11572_v3, 0.0 }
 0x7db   : > { %v11574_v5 = vpop.eup %11573  ;;  %1672 = vadd.xlane.f32.xlu0 %v1671_v4 }
 0x7dc   : > { %v1668_v6 = vsel %vm880_vm6, %v11574_v5, 0.0 }
 0x7df   : > { %1669 = vadd.xlane.f32.xlu0 %v1668_v6 }
 0x7f5   : > { %1678 = vrot.lane.b32.xlu0 %v12162_v43, %s11932_s16 }
 0x7f7   : > { %v1554_v7 = vpop.f32.mrf.mxu0 }
 0x7f8   : > { %v12316_v8 = vadd.f32 %v1554_v7, %v1302_v36 }
 0x7f9   : > { %1824 = vrot.lane.b32.xlu0 %v12160_v42, %s11933_s19  ;;  %v10626_v9 = vpop.f32.mrf.mxu0 }
 0x7fb   : > { %v1557_v10 = vpop.f32.mrf.mxu0 }
 0x7fc   : > { %v12320_v11 = vadd.f32 %v1557_v10, %v1303_v45 }
 0x7fd   : > { %v10627_v12 = vpop.f32.mrf.mxu0 }
 0x7fe   : > { %v2082_v12 = vld [vmem:[%s13305_s9 + $0x8] sm:$0x3] }
 0x864   : > { %v1673_v13 = vpop.xlane.xlu0 %1672 }
 0x865   : > { %11575 = vrcp.f32 %v1673_v13 }
 0x868   : > { %v1670_v14 = vpop.xlane.xlu0 %1669 }
 0x869   : > { %11577 = vrcp.f32 %v1670_v14 }
 0x86c   : > { %v1679_v15 = vpop.permute.xlu0 %1678 }
 0x86d   : > { %10637 = vmatprep.subr.mxu0 %v1679_v15 }
 0x86e   : > { %10638 = vmatpush3.msra.mxu0 %v1679_v15 }
 0x86f   : > { %10648 = vmatprep.subr.msk.mxu0 %vm792_vm3, %v1831_v16 }
 0x870   : > { %v1825_v21 = vpop.permute.xlu0 %1824 }
 0x872   : > { %v11576_v17 = vpop.eup %11575 }
 0x873   : > { %v1677_v20 = vmul.f32 %v11576_v17, %v11572_v3 }
 0x876   : > { %v11578_v18 = vpop.eup %11577 }
 0x877   : > { %v1676_v19 = vmul.f32 %v11578_v18, %v11574_v5 }
 0x879   : > { %10639 = vmatprep.mubr.msk.f32.mxu0 %vm880_vm6, %v1676_v19 }
 0x87a   : > { %10640 = vmatmul.mubr.msk.f32.vlgmr.msra.gmra.mxu0 %vm880_vm6, %v1677_v20 }
 0x87b   : > { %10649 = vmatpush3.xpose.msk.msra.mxu0 %vm792_vm3, %v1831_v16  ;;  %10652 = vmatprep.mubr.msk.f32.mxu0 %vm792_vm3, %v1825_v21 }
 0x87c   : > { %10650 = vmatprep.subr.msk.mxu0 %vm792_vm3, %v1829_v22 }
 0x87f   : > { %10651 = vmatpush3.xpose.msk.msra.mxu0 %vm792_vm3, %v1829_v22 }
 0x880   : > { %10662 = vmatprep.subr.bf16.mxu0 %v11927_v0 }
 0x882   : > { %10653 = vmatmul.mubr.msk.f32.vlgmr.msra.gmra.mxu0 %vm792_vm3, %v1827_v23 }
 0x883   : > { %10664 = vmatprep.mubr.msk.bf16.mxu0 %vm11928_vm0, %v11927_v0 }
 0x93a   : > { %v10641_v25 = vpop.f32.mrf.mxu0 }
 0x93c   : > { %v1757_v26 = vpop.f32.mrf.mxu0 }
 0x93d   : > { %v1766_v27 = vpack.c.bf16 %v10641_v25, %v1757_v26 }
 0x93f   : > { %10645 = vmatmul.mubr.msk.bf16.vlgmr.msra.gmra.mxu1 %vm792_vm3, %v1766_v27 }
 0x942   : > { %v10654_v29 = vpop.f32.mrf.mxu0 }
 0x943   : > { %v1912_v30 = vadd.f32 %v10654_v29, %v1823_v28 }
 0x944   : > { %v1906_v31 = vpop.f32.mrf.mxu0 }
 0x945   : > { %v1907_v33 = vadd.f32 %v1906_v31, %v12211_v57  ;;  %v1918_v34 = vsel %vm884_vm5, %v1912_v30, -inf }
 0x946   : > { %1919 = vmax.xlane.f32.xlu1 %v1918_v34 }
 0x947   : > { %v1915_v35 = vsel %vm880_vm6, %v1907_v33, -inf }
 0x948   : > { %1916 = vmax.xlane.f32.xlu0 %v1915_v35 }
 0x957   : > { %1939 = vrot.lane.b32.xlu1 %v12172_v47, %s11933_s19 }
 0x95b   : > { %2089 = vrot.lane.b32.xlu1 %v12176_v48, %s11934_s27 }
 0x95f   : > { %2087 = vrot.lane.b32.xlu1 %v12168_v44, %s11934_s27 }
 0x963   : > { %2085 = vrot.lane.b32.xlu1 %v12170_v46, %s11934_s27 }
 0x9cf   : > { %v1920_v36 = vpop.xlane.xlu1 %1919 }
 0x9d0   : > { %v1922_v37 = vsub.f32 %v1912_v30, %v1920_v36 }
 0x9d1   : > { %v1917_v40 = vpop.xlane.xlu0 %1916 }
 0x9d2   : > { %v1925_v41 = vmul.f32 1.442695, %v1922_v37  ;;  %v1921_v45 = vsub.f32 %v1907_v33, %v1917_v40 }
 0x9d3   : > { %v1940_v49 = vpop.permute.xlu1 %1939 }
 0x9d4   : > { %11579 = vpow2.f32 %v1925_v41  ;;  %v1923_v50 = vmul.f32 1.442695, %v1921_v45  ;;  %10655 = vmatprep.subr.msk.mxu1 %vm910_vm4, %v1940_v49 }
 0x9d5   : > { %10656 = vmatpush3.msk.msra.mxu1 %vm910_vm4, %v1940_v49 }
 0x9d6   : > { %11581 = vpow2.f32 %v1923_v50 }
 0x9d7   : > { %v2090_v63 = vpop.permute.xlu1 %2089 }
 0x9db   : > { %v2088_v6 = vpop.permute.xlu1 %2087 }
 0x9df   : > { %v2086_v7 = vpop.permute.xlu1 %2085 }
 0x9e1   : > { %v11580_v51 = vpop.eup %11579 }
 0x9e2   : > { %v1930_v52 = vsel %vm884_vm5, %v11580_v51, 0.0 }
 0x9e3   : > { %v11582_v53 = vpop.eup %11581  ;;  %1931 = vadd.xlane.f32.xlu0 %v1930_v52 }
 0x9e4   : > { %v1927_v54 = vsel %vm880_vm6, %v11582_v53, 0.0 }
 0x9e7   : > { %1928 = vadd.xlane.f32.xlu0 %v1927_v54 }
 0x9fd   : > { %1937 = vrot.lane.b32.xlu0 %v12162_v43, %s11933_s19 }
 0x9ff   : > { %v1813_v55 = vpop.f32.mrf.mxu1 }
 0xa00   : > { %v12355_v38 = vadd.f32 %v1813_v55, %v12316_v8  ;;  %v11223_v8 = vld [vmem:[#allocation5 + $0x20] sm:$0xff]  }
 0xa01   : > { %2083 = vrot.lane.b32.xlu0 %v12160_v42, %s11934_s27  ;;  %v10646_v56 = vpop.f32.mrf.mxu1  ;;  %10663 = vmatpush3.bf16.msra.mxu0 %v11223_v8 }
 0xa03   : > { %v1816_v58 = vpop.f32.mrf.mxu1 }
 0xa04   : > { %v12360_v39 = vadd.f32 %v1816_v58, %v12320_v11 }
 0xa05   : > { %v10647_v59 = vpop.f32.mrf.mxu1 }
 0xa06   : > { %v2341_v59 = vld [vmem:[%s13305_s9 + $0x8] sm:$0x3] }
 0xa6c   : > { %v1932_v60 = vpop.xlane.xlu0 %1931 }
 0xa6d   : > { %11583 = vrcp.f32 %v1932_v60 }
 0xa70   : > { %v1929_v61 = vpop.xlane.xlu0 %1928 }
 0xa71   : > { %11585 = vrcp.f32 %v1929_v61 }
 0xa74   : > { %v1938_v62 = vpop.permute.xlu0 %1937 }
 0xa75   : > { %10657 = vmatprep.subr.mxu1 %v1938_v62 }
 0xa76   : > { %10658 = vmatpush3.msra.mxu1 %v1938_v62 }
 0xa77   : > { %10668 = vmatprep.subr.msk.mxu1 %vm792_vm3, %v2090_v63 }
 0xa78   : > { %v2084_v5 = vpop.permute.xlu0 %2083 }
 0xa7a   : > { %v11584_v1 = vpop.eup %11583 }
 0xa7b   : > { %v1936_v4 = vmul.f32 %v11584_v1, %v11580_v51 }
 0xa7e   : > { %v11586_v2 = vpop.eup %11585 }
 0xa7f   : > { %v1935_v3 = vmul.f32 %v11586_v2, %v11582_v53 }
 0xa81   : > { %10659 = vmatprep.mubr.msk.f32.mxu1 %vm880_vm6, %v1935_v3 }
 0xa82   : > { %10660 = vmatmul.mubr.msk.f32.vlgmr.msra.gmra.mxu1 %vm880_vm6, %v1936_v4 }
 0xa83   : > { %10669 = vmatpush3.xpose.msk.msra.mxu1 %vm792_vm3, %v2090_v63  ;;  %10672 = vmatprep.mubr.msk.f32.mxu1 %vm792_vm3, %v2084_v5 }
 0xa84   : > { %10670 = vmatprep.subr.msk.mxu1 %vm792_vm3, %v2088_v6 }
 0xa87   : > { %10671 = vmatpush3.xpose.msk.msra.mxu1 %vm792_vm3, %v2088_v6 }
 0xa88   : > { %10682 = vmatprep.subr.bf16.mxu1 %v11927_v0 }
 0xa8a   : > { %10673 = vmatmul.mubr.msk.f32.vlgmr.msra.gmra.mxu1 %vm792_vm3, %v2086_v7 }
 0xa8b   : > { %10684 = vmatprep.mubr.msk.bf16.mxu1 %vm11928_vm0, %v11927_v0 }
 0xb42   : > { %v10661_v9 = vpop.f32.mrf.mxu1 }
 0xb44   : > { %v2016_v10 = vpop.f32.mrf.mxu1 }
 0xb45   : > { %v2025_v11 = vpack.c.bf16 %v10661_v9, %v2016_v10 }
 0xb47   : > { %10665 = vmatmul.mubr.msk.bf16.vlgmr.msra.gmra.mxu0 %vm792_vm3, %v2025_v11 }
 0xb4a   : > { %v10674_v13 = vpop.f32.mrf.mxu1 }
 0xb4b   : > { %v2171_v14 = vadd.f32 %v10674_v13, %v2082_v12 }
 0xb4c   : > { %v2165_v15 = vpop.f32.mrf.mxu1 }
 0xb4d   : > { %v2166_v16 = vadd.f32 %v2165_v15, %v12211_v57  ;;  %v2177_v17 = vsel %vm884_vm5, %v2171_v14, -inf }
 0xb4e   : > { %2178 = vmax.xlane.f32.xlu1 %v2177_v17 }
 0xb4f   : > { %v2174_v18 = vsel %vm880_vm6, %v2166_v16, -inf }
 0xb50   : > { %2175 = vmax.xlane.f32.xlu0 %v2174_v18 }
 0xb5f   : > { %2198 = vrot.lane.b32.xlu1 %v12172_v47, %s11934_s27 }
 0xb63   : > { %2348 = vrot.lane.b32.xlu1 %v12176_v48, %s11935_s17 }
 0xb67   : > { %2346 = vrot.lane.b32.xlu1 %v12168_v44, %s11935_s17 }
 0xb6b   : > { %2344 = vrot.lane.b32.xlu1 %v12170_v46, %s11935_s17 }
 0xbd7   : > { %v2179_v19 = vpop.xlane.xlu1 %2178 }
 0xbd8   : > { %v2181_v20 = vsub.f32 %v2171_v14, %v2179_v19 }
 0xbd9   : > { %v2176_v21 = vpop.xlane.xlu0 %2175 }
 0xbda   : > { %v2184_v22 = vmul.f32 1.442695, %v2181_v20  ;;  %v2180_v23 = vsub.f32 %v2166_v16, %v2176_v21 }
 0xbdb   : > { %v2199_v24 = vpop.permute.xlu1 %2198 }
 0xbdc   : > { %11587 = vpow2.f32 %v2184_v22  ;;  %v2182_v25 = vmul.f32 1.442695, %v2180_v23  ;;  %10675 = vmatprep.subr.msk.mxu0 %vm910_vm4, %v2199_v24 }
 0xbdd   : > { %10676 = vmatpush3.msk.msra.mxu0 %vm910_vm4, %v2199_v24 }
 0xbde   : > { %11589 = vpow2.f32 %v2182_v25 }
 0xbdf   : > { %v2349_v45 = vpop.permute.xlu1 %2348 }
 0xbe3   : > { %v2347_v54 = vpop.permute.xlu1 %2346 }
 0xbe7   : > { %v2345_v55 = vpop.permute.xlu1 %2344 }
 0xbe9   : > { %v11588_v26 = vpop.eup %11587 }
 0xbea   : > { %v2189_v27 = vsel %vm884_vm5, %v11588_v26, 0.0 }
 0xbeb   : > { %v11590_v28 = vpop.eup %11589  ;;  %2190 = vadd.xlane.f32.xlu0 %v2189_v27  ;;  %v11225_v27 = vld [vmem:[#allocation5 + $0x30] sm:$0xff]  }
 0xbec   : > { %v2186_v29 = vsel %vm880_vm6, %v11590_v28, 0.0 }
 0xbef   : > { %2187 = vadd.xlane.f32.xlu0 %v2186_v29 }
 0xc05   : > { %2196 = vrot.lane.b32.xlu0 %v12162_v43, %s11934_s27 }
 0xc07   : > { %v2072_v30 = vpop.f32.mrf.mxu0 }
 0xc08   : > { %v12395_v31 = vadd.f32 %v2072_v30, %v12355_v38  ;;  %v11224_v38 = vld [vmem:[#allocation5 + $0x28] sm:$0xff]  }
 0xc09   : > { %2342 = vrot.lane.b32.xlu0 %v12160_v42, %s11935_s17  ;;  %v10666_v33 = vpop.f32.mrf.mxu0  ;;  %10683 = vmatpush3.bf16.msra.mxu1 %v11224_v38 }
 0xc0b   : > { %v2075_v34 = vpop.f32.mrf.mxu0 }
 0xc0c   : > { %v12400_v35 = vadd.f32 %v2075_v34, %v12360_v39 }
 0xc0d   : > { %v10667_v36 = vpop.f32.mrf.mxu0 }
 0xc74   : > { %v2191_v37 = vpop.xlane.xlu0 %2190 }
 0xc75   : > { %11591 = vrcp.f32 %v2191_v37 }
 0xc78   : > { %v2188_v40 = vpop.xlane.xlu0 %2187 }
 0xc79   : > { %11593 = vrcp.f32 %v2188_v40 }
 0xc7c   : > { %v2197_v41 = vpop.permute.xlu0 %2196 }
 0xc7d   : > { %10677 = vmatprep.subr.mxu0 %v2197_v41 }
 0xc7e   : > { %10678 = vmatpush3.msra.mxu0 %v2197_v41 }
 0xc7f   : > { %10688 = vmatprep.subr.msk.mxu0 %vm792_vm3, %v2349_v45 }
 0xc80   : > { %v2343_v53 = vpop.permute.xlu0 %2342 }
 0xc82   : > { %v11592_v49 = vpop.eup %11591 }
 0xc83   : > { %v2195_v52 = vmul.f32 %v11592_v49, %v11588_v26 }
 0xc86   : > { %v11594_v50 = vpop.eup %11593 }
 0xc87   : > { %v2194_v51 = vmul.f32 %v11594_v50, %v11590_v28 }
 0xc89   : > { %10679 = vmatprep.mubr.msk.f32.mxu0 %vm880_vm6, %v2194_v51 }
 0xc8a   : > { %10680 = vmatmul.mubr.msk.f32.vlgmr.msra.gmra.mxu0 %vm880_vm6, %v2195_v52 }
 0xc8b   : > { %10689 = vmatpush3.xpose.msk.msra.mxu0 %vm792_vm3, %v2349_v45  ;;  %10692 = vmatprep.mubr.msk.f32.mxu0 %vm792_vm3, %v2343_v53 }
 0xc8c   : > { %10690 = vmatprep.subr.msk.mxu0 %vm792_vm3, %v2347_v54 }
 0xc8f   : > { %10691 = vmatpush3.xpose.msk.msra.mxu0 %vm792_vm3, %v2347_v54 }
 0xc90   : > { %10702 = vmatprep.subr.bf16.mxu0 %v11927_v0 }
 0xc92   : > { %10693 = vmatmul.mubr.msk.f32.vlgmr.msra.gmra.mxu0 %vm792_vm3, %v2345_v55 }
 0xc93   : > { %10704 = vmatprep.mubr.msk.bf16.mxu0 %vm11928_vm0, %v11927_v0  ;;  %10703 = vmatpush3.bf16.msra.mxu0 %v11225_v27  ;;  %v11260_v27 = vld [vmem:[#allocation7 + $0x48] ss:$16 sps:$4 sm:$0xff]  }
 0xd4a   : > { %v10681_v56 = vpop.f32.mrf.mxu0 }
 0xd4c   : > { %v2275_v58 = vpop.f32.mrf.mxu0 }
 0xd4d   : > { %v2284_v39 = vpack.c.bf16 %v10681_v56, %v2275_v58 }
 0xd4f   : > { %10685 = vmatmul.mubr.msk.bf16.vlgmr.msra.gmra.mxu1 %vm792_vm3, %v2284_v39 }
 0xd52   : > { %v10694_v60 = vpop.f32.mrf.mxu0 }
 0xd53   : > { %v2430_v61 = vadd.f32 %v10694_v60, %v2341_v59 }
 0xd54   : > { %v2424_v62 = vpop.f32.mrf.mxu0 }
 0xd55   : > { %v2425_v63 = vadd.f32 %v2424_v62, %v12211_v57  ;;  %v2436_v1 = vsel %vm884_vm5, %v2430_v61, -inf }
 0xd56   : > { %2437 = vmax.xlane.f32.xlu1 %v2436_v1 }
 0xd57   : > { %v2433_v2 = vsel %vm880_vm6, %v2425_v63, -inf }
 0xd58   : > { %2434 = vmax.xlane.f32.xlu0 %v2433_v2 }
 0xd67   : > { %2457 = vrot.lane.b32.xlu1 %v12172_v47, %s11935_s17 }
 0xd6b   : > { %2607 = vrot.lane.b32.xlu1 %v12176_v48, %s11936_s18 }
 0xd6f   : > { %2605 = vrot.lane.b32.xlu1 %v12168_v44, %s11936_s18 }
 0xd73   : > { %2603 = vrot.lane.b32.xlu1 %v12170_v46, %s11936_s18 }
 0xddf   : > { %v2438_v3 = vpop.xlane.xlu1 %2437 }
 0xde0   : > { %v2440_v4 = vsub.f32 %v2430_v61, %v2438_v3 }
 0xde1   : > { %v2435_v5 = vpop.xlane.xlu0 %2434 }
 0xde2   : > { %v2443_v6 = vmul.f32 1.442695, %v2440_v4  ;;  %v2439_v7 = vsub.f32 %v2425_v63, %v2435_v5  ;;  %v11226_v4 = vld [vmem:[#allocation5 + $0x38] sm:$0xff]   ;;  %v11227_v5 = vld [vmem:[#allocation7 + $0xe0] ss:$16 sps:$4 sm:$0xff]  }
 0xde3   : > { %v2458_v8 = vpop.permute.xlu1 %2457 }
 0xde4   : > { %11595 = vpow2.f32 %v2443_v6  ;;  %v2441_v9 = vmul.f32 1.442695, %v2439_v7  ;;  %10695 = vmatprep.subr.msk.mxu1 %vm910_vm4, %v2458_v8  ;;  %v11229_v6 = vld [vmem:[#allocation7 + $0xe4] ss:$16 sps:$4 sm:$0xff]   ;;  %v11232_v7 = vld [vmem:[#allocation7 + $0xec] ss:$16 sps:$4 sm:$0xff]  }
 0xde5   : > { %10696 = vmatpush3.msk.msra.mxu1 %vm910_vm4, %v2458_v8  ;;  %v11235_v8 = vld [vmem:[#allocation7 + $0xc4] ss:$16 sps:$4 sm:$0xff]  }
 0xde6   : > { %11597 = vpow2.f32 %v2441_v9  ;;  %v11233_v9 = vld [vmem:[#allocation7 + $0xc0] ss:$16 sps:$4 sm:$0xff]  }
 0xde7   : > { %v2608_v20 = vpop.permute.xlu1 %2607 }
 0xdeb   : > { %v2606_v25 = vpop.permute.xlu1 %2605 }
 0xdef   : > { %v2604_v26 = vpop.permute.xlu1 %2603 }
 0xdf1   : > { %v11596_v48 = vpop.eup %11595 }
 0xdf2   : > { %v2448_v10 = vsel %vm884_vm5, %v11596_v48, 0.0 }
 0xdf3   : > { %v11598_v44 = vpop.eup %11597  ;;  %2449 = vadd.xlane.f32.xlu0 %v2448_v10  ;;  %v11239_v10 = vld [vmem:[#allocation7 + $0xa0] ss:$16 sps:$4 sm:$0xff]  }
 0xdf4   : > { %v2445_v46 = vsel %vm880_vm6, %v11598_v44, 0.0 }
 0xdf7   : > { %2446 = vadd.xlane.f32.xlu0 %v2445_v46  ;;  %v11245_v46 = vld [vmem:[#allocation7 + $0x80] ss:$16 sps:$4 sm:$0xff]  }
 0xe0d   : > { %2455 = vrot.lane.b32.xlu0 %v12162_v43, %s11935_s17 }
 0xe0f   : > { %v2331_v11 = vpop.f32.mrf.mxu1 }
 0xe10   : > { %v12435_v12 = vadd.f32 %v2331_v11, %v12395_v31  ;;  %v2600_v31 = vld [vmem:[%s13305_s9 + $0x8] sm:$0x3]  ;;  %v11253_v11 = vld [vmem:[#allocation7 + $0x64] ss:$16 sps:$4 sm:$0xff]  }
 0xe11   : > { %2601 = vrot.lane.b32.xlu0 %v12160_v42, %s11936_s18  ;;  %v10686_v13 = vpop.f32.mrf.mxu1 }
 0xe12   : > { %v11259_v13 = vld [vmem:[#allocation7 + $0x44] ss:$16 sps:$4 sm:$0xff]  }
 0xe13   : > { %v2334_v14 = vpop.f32.mrf.mxu1 }
 0xe14   : > { %v12440_v15 = vadd.f32 %v2334_v14, %v12400_v35  ;;  %v11257_v14 = vld [vmem:[#allocation7 + $0x40] ss:$16 sps:$4 sm:$0xff]  }
 0xe15   : > { %v10687_v16 = vpop.f32.mrf.mxu1 }
 0xe7c   : > { %v2450_v17 = vpop.xlane.xlu0 %2449 }
 0xe7d   : > { %11599 = vrcp.f32 %v2450_v17  ;;  %v11230_v17 = vld [vmem:[#allocation7 + $0xe8] ss:$16 sps:$4 sm:$0xff]  }
 0xe80   : > { %v2447_v18 = vpop.xlane.xlu0 %2446 }
 0xe81   : > { %11601 = vrcp.f32 %v2447_v18 }
 0xe84   : > { %v2456_v19 = vpop.permute.xlu0 %2455 }
 0xe85   : > { %10697 = vmatprep.subr.mxu1 %v2456_v19 }
 0xe86   : > { %10698 = vmatpush3.msra.mxu1 %v2456_v19  ;;  %v11238_v19 = vld [vmem:[#allocation7 + $0xcc] ss:$16 sps:$4 sm:$0xff]  }
 0xe87   : > { %10708 = vmatprep.subr.msk.mxu1 %vm792_vm3, %v2608_v20 }
 0xe88   : > { %v2602_v24 = vpop.permute.xlu0 %2601 }
 0xe8a   : > { %v11600_v21 = vpop.eup %11599 }
 0xe8b   : > { %v2454_v42 = vmul.f32 %v11600_v21, %v11596_v48  ;;  %v11241_v48 = vld [vmem:[#allocation7 + $0xa4] ss:$16 sps:$4 sm:$0xff]   ;;  %v11244_v21 = vld [vmem:[#allocation7 + $0xac] ss:$16 sps:$4 sm:$0xff]  }
 0xe8e   : > { %v11602_v22 = vpop.eup %11601 }
 0xe8f   : > { %v2453_v23 = vmul.f32 %v11602_v22, %v11598_v44  ;;  %v11247_v44 = vld [vmem:[#allocation7 + $0x84] ss:$16 sps:$4 sm:$0xff]   ;;  %v11242_v22 = vld [vmem:[#allocation7 + $0xa8] ss:$16 sps:$4 sm:$0xff]  }
 0xe91   : > { %10699 = vmatprep.mubr.msk.f32.mxu1 %vm880_vm6, %v2453_v23  ;;  %v11250_v23 = vld [vmem:[#allocation7 + $0x8c] ss:$16 sps:$4 sm:$0xff]  }
 0xe92   : > { %10700 = vmatmul.mubr.msk.f32.vlgmr.msra.gmra.mxu1 %vm880_vm6, %v2454_v42  ;;  %v11248_v42 = vld [vmem:[#allocation7 + $0x88] ss:$16 sps:$4 sm:$0xff]  }
 0xe93   : > { %10709 = vmatpush3.xpose.msk.msra.mxu1 %vm792_vm3, %v2608_v20  ;;  %10712 = vmatprep.mubr.msk.f32.mxu1 %vm792_vm3, %v2602_v24  ;;  %v11236_v20 = vld [vmem:[#allocation7 + $0xc8] ss:$16 sps:$4 sm:$0xff]   ;;  %v11256_v24 = vld [vmem:[#allocation7 + $0x6c] ss:$16 sps:$4 sm:$0xff]  }
 0xe94   : > { %10710 = vmatprep.subr.msk.mxu1 %vm792_vm3, %v2606_v25 }
 0xe97   : > { %10711 = vmatpush3.xpose.msk.msra.mxu1 %vm792_vm3, %v2606_v25  ;;  %v11254_v25 = vld [vmem:[#allocation7 + $0x68] ss:$16 sps:$4 sm:$0xff]  }
 0xe98   : > { %10722 = vmatprep.subr.bf16.mxu1 %v11927_v0 }
 0xe9a   : > { %10713 = vmatmul.mubr.msk.f32.vlgmr.msra.gmra.mxu1 %vm792_vm3, %v2604_v26  ;;  %v11262_v26 = vld [vmem:[#allocation7 + $0x4c] ss:$16 sps:$4 sm:$0xff]  }
 0xe9b   : > { %10724 = vmatprep.mubr.msk.bf16.mxu1 %vm11928_vm0, %v11927_v0  ;;  %10723 = vmatpush3.bf16.msra.mxu1 %v11226_v4  ;;  %v11294_v4 = vld [vmem:[#allocation8 + $0x98] sm:$0xff]  }
 0xe9c   : > { %3116 = vmatprep.subr.bf16.mxu1 %v11232_v7  ;;  %v11297_v7 = vld [vmem:[#allocation8 + $0x10] sm:$0xff]  }
 0xf52   : > { %v10701_v28 = vpop.f32.mrf.mxu1 }
 0xf54   : > { %v2534_v29 = vpop.f32.mrf.mxu1 }
 0xf55   : > { %v2543_v30 = vpack.c.bf16 %v10701_v28, %v2534_v29  ;;  %v11265_v28 = vld [vmem:[#allocation7 + $0x24] ss:$16 sps:$4 sm:$0xff]   ;;  %v11268_v29 = vld [vmem:[#allocation7 + $0x2c] ss:$16 sps:$4 sm:$0xff]  }
 0xf57   : > { %10705 = vmatmul.mubr.msk.bf16.vlgmr.msra.gmra.mxu0 %vm792_vm3, %v2543_v30  ;;  %v11263_v30 = vld [vmem:[#allocation7 + $0x20] ss:$16 sps:$4 sm:$0xff]  }
 0xf5a   : > { %v10714_v33 = vpop.f32.mrf.mxu1 }
 0xf5b   : > { %v2689_v34 = vadd.f32 %v10714_v33, %v2600_v31  ;;  %v11266_v31 = vld [vmem:[#allocation7 + $0x28] ss:$16 sps:$4 sm:$0xff]   ;;  %v11271_v33 = vld [vmem:[#allocation7 + $0x4] ss:$16 sps:$4 sm:$0xff]  }
 0xf5c   : > { %v2683_v35 = vpop.f32.mrf.mxu1 }
 0xf5d   : > { %v2684_v36 = vadd.f32 %v2683_v35, %v12211_v57  ;;  %v2695_v37 = vsel %vm884_vm5, %v2689_v34, -inf  ;;  %v11269_v35 = vld [vmem:[#allocation7] ss:$16 sps:$4 sm:$0xff]  }
 0xf5e   : > { %2696 = vmax.xlane.f32.xlu1 %v2695_v37  ;;  %v11275_v37 = vld [vmem:[#allocation8 + $0x78] sm:$0xff]  }
 0xf5f   : > { %v2692_v40 = vsel %vm880_vm6, %v2684_v36, -inf }
 0xf60   : > { %2693 = vmax.xlane.f32.xlu0 %v2692_v40  ;;  %v11276_v40 = vld [vmem:[#allocation8 + $0xf8] sm:$0xff]  }
 0xf6f   : > { %2716 = vrot.lane.b32.xlu1 %v12172_v47, %s11936_s18 }
 0xfe7   : > { %v2697_v41 = vpop.xlane.xlu1 %2696 }
 0xfe8   : > { %v2699_v45 = vsub.f32 %v2689_v34, %v2697_v41  ;;  %v11274_v34 = vld [vmem:[#allocation7 + $0xc] ss:$16 sps:$4 sm:$0xff]  }
 0xfe9   : > { %v2694_v49 = vpop.xlane.xlu0 %2693 }
 0xfea   : > { %v2702_v50 = vmul.f32 1.442695, %v2699_v45  ;;  %v2698_v51 = vsub.f32 %v2684_v36, %v2694_v49  ;;  %v11272_v36 = vld [vmem:[#allocation7 + $0x8] ss:$16 sps:$4 sm:$0xff]  }
 0xfeb   : > { %v2717_v52 = vpop.permute.xlu1 %2716 }
 0xfec   : > { %11603 = vpow2.f32 %v2702_v50  ;;  %v2700_v53 = vmul.f32 1.442695, %v2698_v51  ;;  %10715 = vmatprep.subr.msk.mxu0 %vm910_vm4, %v2717_v52 }
 0xfed   : > { %10716 = vmatpush3.msk.msra.mxu0 %vm910_vm4, %v2717_v52 }
 0xfee   : > { %11605 = vpow2.f32 %v2700_v53  ;;  %v11277_v53 = vld [vmem:[#allocation8 + $0x38] sm:$0xff]  }
 0xff9   : > { %v11604_v57 = vpop.eup %11603 }
 0xffa   : > { %v2707_v54 = vsel %vm884_vm5, %v11604_v57, 0.0 }
 0xffb   : > { %v11606_v55 = vpop.eup %11605  ;;  %2708 = vadd.xlane.f32.xlu0 %v2707_v54 }
 0xffc   : > { %v2704_v47 = vsel %vm880_vm6, %v11606_v55, 0.0 }
 0xfff   : > { %2705 = vadd.xlane.f32.xlu0 %v2704_v47  ;;  %v11280_v47 = vld [vmem:[#allocation8 + $0xf0] sm:$0xff]  }
0x1015   : > { %2714 = vrot.lane.b32.xlu0 %v12162_v43, %s11936_s18 }
0x1017   : > { %v2590_v38 = vpop.f32.mrf.mxu0 }
0x1018   : > { %v12469_v56 = vadd.f32 %v2590_v38, %v12435_v12  ;;  %v11251_v12 = vld [vmem:[#allocation7 + $0x60] ss:$16 sps:$4 sm:$0xff]  }
0x1019   : > { %v10706_v58 = vpop.f32.mrf.mxu0  ;;  %v11281_v38 = vld [vmem:[#allocation8 + $0x30] sm:$0xff]  }
0x101a   : > { %v11282_v58 = vld [vmem:[#allocation8 + $0xb0] sm:$0xff]  }
0x101b   : > { %v2593_v39 = vpop.f32.mrf.mxu0 }
0x101c   : > { %v12472_v59 = vadd.f32 %v2593_v39, %v12440_v15  ;;  %v11284_v39 = vld [vmem:[#allocation8 + $0xe8] sm:$0xff]  }
0x101d   : > { %v10707_v60 = vpop.f32.mrf.mxu0 }
0x101e   : > { %v11286_v60 = vld [vmem:[#allocation8 + $0xa8] sm:$0xff]  }
0x1084   : > { %v2709_v61 = vpop.xlane.xlu0 %2708 }
0x1085   : > { %11607 = vrcp.f32 %v2709_v61  ;;  %v11287_v61 = vld [vmem:[#allocation8 + $0x60] sm:$0xff]  }
0x1088   : > { %v2706_v62 = vpop.xlane.xlu0 %2705 }
0x1089   : > { %11609 = vrcp.f32 %v2706_v62  ;;  %v11288_v62 = vld [vmem:[#allocation8 + $0xe0] sm:$0xff]  }
0x108c   : > { %v2715_v63 = vpop.permute.xlu0 %2714 }
0x108d   : > { %10717 = vmatprep.subr.mxu0 %v2715_v63 }
0x108e   : > { %10718 = vmatpush3.msra.mxu0 %v2715_v63  ;;  %v11289_v63 = vld [vmem:[#allocation8 + $0x20] sm:$0xff]  }
0x108f   : > { %3073 = vmatprep.subr.bf16.mxu0 %v11229_v6  ;;  %v11296_v6 = vld [vmem:[#allocation8 + $0xd0] sm:$0xff]  }
0x1092   : > { %v11608_v1 = vpop.eup %11607 }
0x1093   : > { %v2713_v3 = vmul.f32 %v11608_v1, %v11604_v57  ;;  %v11278_v57 = vld [vmem:[#allocation8 + $0xb8] sm:$0xff]   ;;  %v11290_v1 = vld [vmem:[#allocation8 + $0xa0] sm:$0xff]  }
0x1096   : > { %v11610_v2 = vpop.eup %11609 }
0x1097   : > { %v2712_v43 = vmul.f32 %v11610_v2, %v11606_v55  ;;  %v11279_v55 = vld [vmem:[#allocation8 + $0x70] sm:$0xff]   ;;  %v11291_v2 = vld [vmem:[#allocation8 + $0x58] sm:$0xff]  }
0x1099   : > { %10719 = vmatprep.mubr.msk.f32.mxu0 %vm880_vm6, %v2712_v43  ;;  %v11292_v43 = vld [vmem:[#allocation8 + $0xd8] sm:$0xff]  }
0x109a   : > { %10720 = vmatmul.mubr.msk.f32.vlgmr.msra.gmra.mxu0 %vm880_vm6, %v2713_v3  ;;  %v11293_v3 = vld [vmem:[#allocation8 + $0x18] sm:$0xff]  }
0x109b   : > { %3105 = vmatprep.mubr.bf16.mxu0 %v11929_v32  ;;  %3074 = vmatpush1.bf16.msra.mxu0 %v11227_v5  ;;  %v11295_v5 = vld [vmem:[#allocation8 + $0x50] sm:$0xff]  }
0x109c   : > { %3075 = vmatprep.subr.bf16.mxu0 %v11235_v8  ;;  %v11298_v8 = vld [vmem:[#allocation8 + $0x90] sm:$0xff]  }
0x109f   : > { %3076 = vmatpush1.bf16.msra.mxu0 %v11233_v9  ;;  %v11299_v9 = vld [vmem:[#allocation8 + $0x48] sm:$0xff]  }
0x10a0   : > { %3077 = vmatprep.subr.bf16.mxu0 %v11241_v48  ;;  %v11300_v48 = vld [vmem:[#allocation8 + $0xc8] sm:$0xff]  }
0x10a3   : > { %3078 = vmatpush1.bf16.msra.mxu0 %v11239_v10  ;;  %v11301_v10 = vld [vmem:[#allocation8 + $0x8] sm:$0xff]  }
0x10a4   : > { %3079 = vmatprep.subr.bf16.mxu0 %v11247_v44  ;;  %v11302_v44 = vld [vmem:[#allocation8 + $0x88] sm:$0xff]  }
0x10a7   : > { %3080 = vmatpush1.bf16.msra.mxu0 %v11245_v46  ;;  %v11303_v46 = vld [vmem:[#allocation8 + $0x40] sm:$0xff]  }
0x10a8   : > { %3081 = vmatprep.subr.bf16.mxu0 %v11253_v11  ;;  %v11304_v11 = vld [vmem:[#allocation8 + $0xc0] sm:$0xff]  }
0x10ab   : > { %3082 = vmatpush1.bf16.msra.mxu0 %v11251_v12  ;;  %v11305_v12 = vld [vmem:[#allocation8] sm:$0xff]  }
0x10ac   : > { %3083 = vmatprep.subr.bf16.mxu0 %v11259_v13  ;;  %v11306_v13 = vld [vmem:[#allocation8 + $0x80] sm:$0xff]  }
0x10af   : > { %3084 = vmatpush1.bf16.msra.mxu0 %v11257_v14  ;;  %v11309_v14 = vld [vmem:[#allocation2 + $0x16c] ss:$12 sps:$4 sm:$0xff]  }
0x10b0   : > { %3085 = vmatprep.subr.bf16.mxu0 %v11265_v28 }
0x10b3   : > { %3086 = vmatpush1.bf16.msra.mxu0 %v11263_v30 }
0x10b4   : > { %3087 = vmatprep.subr.bf16.mxu0 %v11271_v33 }
0x10b7   : > { %3088 = vmatpush1.bf16.msra.mxu0 %v11269_v35 }
0x10b8   : > { %10228 = vmatprep.subr.bf16.mxu0 %v11275_v37 }
0x115a   : > { %v10721_v15 = vpop.f32.mrf.mxu0 }
0x115c   : > { %v2793_v16 = vpop.f32.mrf.mxu0 }
0x115d   : > { %v2802_v18 = vpack.c.bf16 %v10721_v15, %v2793_v16  ;;  %v2893_v15 = vlaneseq }
0x115f   : > { %10725 = vmatmul.mubr.msk.bf16.vlgmr.msra.gmra.mxu1 %vm792_vm3, %v2802_v18  ;;  %v2894_v16 = vshrl.u32 %v2893_v15, 7  ;;  %v11335_v15 = vld [vmem:[#allocation2 + $0xc0] ss:$12 sps:$4 sm:$0xff]  }
0x1160   : > { %3117 = vmatpush1.bf16.msra.mxu1 %v11230_v17  ;;  %3148 = vmatprep.mubr.bf16.mxu1 %v11929_v32 }
0x1161   : > { %3118 = vmatprep.subr.bf16.mxu1 %v11238_v19  ;;  %v12488_v17 = vsub.s32 1, %v2894_v16  ;;  %v12490_v18 = vsub.s32 3, %v2894_v16  ;;  %v12492_v19 = vsub.s32 0, %v2894_v16 }
0x1164   : > { %3119 = vmatpush1.bf16.msra.mxu1 %v11236_v20  ;;  %v12494_v20 = vsub.s32 2, %v2894_v16  ;;  %v11338_v16 = vld [vmem:[#allocation2 + $0xc8] ss:$12 sps:$4 sm:$0xff]  }
0x1165   : > { %3120 = vmatprep.subr.bf16.mxu1 %v11244_v21  ;;  %v2891_v21 = vld [vmem:[%s13302_s6] sm:$0xf] }
0x1168   : > { %3121 = vmatpush1.bf16.msra.mxu1 %v11242_v22 }
0x1169   : > { %3122 = vmatprep.subr.bf16.mxu1 %v11250_v23 }
0x116c   : > { %3123 = vmatpush1.bf16.msra.mxu1 %v11248_v42  ;;  %v2900_v42 = vrot.slane %v2891_v21, %v12488_v17 }
0x116d   : > { %3124 = vmatprep.subr.bf16.mxu1 %v11256_v24  ;;  %v2908_v24 = vrot.slane %v2891_v21, %v12490_v18 }
0x1170   : > { %3125 = vmatpush1.bf16.msra.mxu1 %v11254_v25  ;;  %v2896_v25 = vrot.slane %v2891_v21, %v12492_v19 }
0x1171   : > { %3126 = vmatprep.subr.bf16.mxu1 %v11262_v26  ;;  %v2904_v26 = vrot.slane %v2891_v21, %v12494_v20 }
0x1174   : > { %3127 = vmatpush1.bf16.msra.mxu1 %v11260_v27 }
0x1175   : > { %3128 = vmatprep.subr.bf16.mxu1 %v11268_v29 }
0x1178   : > { %3129 = vmatpush1.bf16.msra.mxu1 %v11266_v31 }
0x1179   : > { %3130 = vmatprep.subr.bf16.mxu1 %v11274_v34 }
0x117c   : > { %3131 = vmatpush1.bf16.msra.mxu1 %v11272_v36 }
0x117d   : > { %10250 = vmatprep.subr.bf16.mxu1 %v11276_v40 }
0x121f   : > { %v2849_v41 = vpop.f32.mrf.mxu1 }
0x1220   : > { %v12480_v50 = vadd.f32 %v2849_v41, %v12469_v56  ;;  %v11283_v56 = vld [vmem:[#allocation8 + $0x68] sm:$0xff]  }
0x1221   : > { %v10726_v45 = vpop.f32.mrf.mxu1 }
0x1223   : > { %v2852_v49 = vpop.f32.mrf.mxu1 }
0x1224   : > { %v12483_v51 = vadd.f32 %v2852_v49, %v12472_v59  ;;  %v11285_v59 = vld [vmem:[#allocation8 + $0x28] sm:$0xff]  }
0x1225   : > { %v10727_v52 = vpop.f32.mrf.mxu1 }
0x1226   : > { %v2858_v54 = vpack.c.bf16 %v12483_v51, %v12480_v50 }
0x1228   : > { %3106 = vmatmul.mubr.bf16.vlgmr.msra.gmra.mxu0 %v2858_v54  ;;  %3149 = vmatmul.mubr.bf16.vlgmr.msra.gmra.mxu1 %v2858_v54 }
0x1229   : > { %10229 = vmatpush3.bf16.msra.mxu0 %v11277_v53  ;;  %10251 = vmatpush3.bf16.msra.mxu1 %v11278_v57 }
0x122a   : > { %10230 = vmatprep.subr.bf16.mxu0 %v11279_v55  ;;  %10252 = vmatprep.subr.bf16.mxu1 %v11280_v47 }
0x122d   : > { %10231 = vmatpush3.bf16.msra.mxu0 %v11281_v38  ;;  %10253 = vmatpush3.bf16.msra.mxu1 %v11282_v58 }
0x122e   : > { %10232 = vmatprep.subr.bf16.mxu0 %v11283_v56  ;;  %10254 = vmatprep.subr.bf16.mxu1 %v11284_v39 }
0x1231   : > { %10233 = vmatpush3.bf16.msra.mxu0 %v11285_v59  ;;  %10255 = vmatpush3.bf16.msra.mxu1 %v11286_v60  ;;  %v11307_v59 = vld [vmem:[#allocation2 + $0x168] ss:$12 sps:$4 sm:$0xff]   ;;  %v11310_v60 = vld [vmem:[#allocation2 + $0x170] ss:$12 sps:$4 sm:$0xff]  }
0x1232   : > { %10234 = vmatprep.subr.bf16.mxu0 %v11287_v61  ;;  %10256 = vmatprep.subr.bf16.mxu1 %v11288_v62 }
0x1235   : > { %10235 = vmatpush3.bf16.msra.mxu0 %v11289_v63  ;;  %10257 = vmatpush3.bf16.msra.mxu1 %v11290_v1  ;;  %v11313_v63 = vld [vmem:[#allocation2 + $0x154] ss:$12 sps:$4 sm:$0xff]   ;;  %v11311_v1 = vld [vmem:[#allocation2 + $0x150] ss:$12 sps:$4 sm:$0xff]  }
0x1236   : > { %10236 = vmatprep.subr.bf16.mxu0 %v11291_v2  ;;  %10258 = vmatprep.subr.bf16.mxu1 %v11292_v43  ;;  %v11314_v2 = vld [vmem:[#allocation2 + $0x158] ss:$12 sps:$4 sm:$0xff]   ;;  %v11317_v43 = vld [vmem:[#allocation2 + $0x13c] ss:$12 sps:$4 sm:$0xff]  }
0x1239   : > { %10237 = vmatpush3.bf16.msra.mxu0 %v11293_v3  ;;  %10259 = vmatpush3.bf16.msra.mxu1 %v11294_v4  ;;  %v11315_v3 = vld [vmem:[#allocation2 + $0x138] ss:$12 sps:$4 sm:$0xff]   ;;  %v11318_v4 = vld [vmem:[#allocation2 + $0x140] ss:$12 sps:$4 sm:$0xff]  }
0x123a   : > { %10238 = vmatprep.subr.bf16.mxu0 %v11295_v5  ;;  %10260 = vmatprep.subr.bf16.mxu1 %v11296_v6  ;;  %v11321_v5 = vld [vmem:[#allocation2 + $0x124] ss:$12 sps:$4 sm:$0xff]   ;;  %v11319_v6 = vld [vmem:[#allocation2 + $0x120] ss:$12 sps:$4 sm:$0xff]  }
0x123d   : > { %10239 = vmatpush3.bf16.msra.mxu0 %v11297_v7  ;;  %10261 = vmatpush3.bf16.msra.mxu1 %v11298_v8  ;;  %v11322_v7 = vld [vmem:[#allocation2 + $0x128] ss:$12 sps:$4 sm:$0xff]   ;;  %v11325_v8 = vld [vmem:[#allocation2 + $0x10c] ss:$12 sps:$4 sm:$0xff]  }
0x123e   : > { %10240 = vmatprep.subr.bf16.mxu0 %v11299_v9  ;;  %10262 = vmatprep.subr.bf16.mxu1 %v11300_v48  ;;  %v11323_v9 = vld [vmem:[#allocation2 + $0x108] ss:$12 sps:$4 sm:$0xff]   ;;  %v11326_v48 = vld [vmem:[#allocation2 + $0x110] ss:$12 sps:$4 sm:$0xff]  }
0x1241   : > { %10241 = vmatpush3.bf16.msra.mxu0 %v11301_v10  ;;  %10263 = vmatpush3.bf16.msra.mxu1 %v11302_v44  ;;  %v11329_v10 = vld [vmem:[#allocation2 + $0xf4] ss:$12 sps:$4 sm:$0xff]   ;;  %v11327_v44 = vld [vmem:[#allocation2 + $0xf0] ss:$12 sps:$4 sm:$0xff]  }
0x1242   : > { %10242 = vmatprep.subr.bf16.mxu0 %v11303_v46  ;;  %10264 = vmatprep.subr.bf16.mxu1 %v11304_v11  ;;  %v11330_v46 = vld [vmem:[#allocation2 + $0xf8] ss:$12 sps:$4 sm:$0xff]   ;;  %v11333_v11 = vld [vmem:[#allocation2 + $0xdc] ss:$12 sps:$4 sm:$0xff]  }
0x1245   : > { %10243 = vmatpush3.bf16.msra.mxu0 %v11305_v12  ;;  %10265 = vmatpush3.bf16.msra.mxu1 %v11306_v13  ;;  %v11331_v12 = vld [vmem:[#allocation2 + $0xd8] ss:$12 sps:$4 sm:$0xff]   ;;  %v11334_v13 = vld [vmem:[#allocation2 + $0xe0] ss:$12 sps:$4 sm:$0xff]  }
0x1246   : > { %10728 = vmatprep.subr.bf16.mxu1 %v11927_v0  ;;  %3682 = vmatprep.subr.bf16.mxu0 %v11309_v14  ;;  %v11337_v14 = vld [vmem:[#allocation2 + $0xc4] ss:$12 sps:$4 sm:$0xff]  }
0x12e8   : > { %v3107_v22 = vpop.f32.mrf.mxu0  ;;  %v3150_v23 = vpop.f32.mrf.mxu1 }
0x12e9   : > { %v3108_v36 = vadd.f32 %v3107_v22, %v2896_v25  ;;  %v3151_v37 = vadd.f32 %v3150_v23, %v2904_v26 }
0x12ea   : > { %v3109_v27 = vpop.f32.mrf.mxu0  ;;  %v3152_v28 = vpop.f32.mrf.mxu1 }
0x12eb   : > { %v3110_v31 = vadd.f32 %v3109_v27, %v2900_v42  ;;  %v3153_v33 = vadd.f32 %v3152_v28, %v2908_v24  ;;  %v3159_v38 = vmax.f32 %v3108_v36, 0.0  ;;  %v3161_v58 = vmax.f32 %v3151_v37, 0.0  ;;  %v9802_v36 = vld [vmem:[%s13304_s8] ss:$0 sm:$0xff] }
0x12ec   : > { %v3111_v29 = vpop.f32.mrf.mxu0  ;;  %v3154_v30 = vpop.f32.mrf.mxu1 }
0x12ed   : > { %v3112_v34 = vadd.f32 %v3111_v29, %v2896_v25  ;;  %v3155_v35 = vadd.f32 %v3154_v30, %v2904_v26  ;;  %v3160_v57 = vmax.f32 %v3110_v31, 0.0  ;;  %v3162_v54 = vmax.f32 %v3153_v33, 0.0 }
0x12ee   : > { %v3113_v40 = vpop.f32.mrf.mxu0  ;;  %v3156_v41 = vpop.f32.mrf.mxu1 }
0x12ef   : > { %v3114_v45 = vadd.f32 %v3113_v40, %v2900_v42  ;;  %v3157_v49 = vadd.f32 %v3156_v41, %v2908_v24  ;;  %v3163_v52 = vmax.f32 %v3112_v34, 0.0  ;;  %v3165_v53 = vmax.f32 %v3155_v35, 0.0 }
0x12f1   : > { %v3164_v55 = vmax.f32 %v3114_v45, 0.0  ;;  %v3166_v47 = vmax.f32 %v3157_v49, 0.0  ;;  %v3167_v61 = vpack.c.bf16 %v3163_v52, %v3159_v38  ;;  %v3169_v62 = vpack.c.bf16 %v3165_v53, %v3161_v58  ;;  %v12563_v58 = vld [vmem:[%s13305_s9] sm:$0xff] }
0x12f3   : > { %v3168_v56 = vpack.c.bf16 %v3164_v55, %v3160_v57  ;;  %v3170_v39 = vpack.c.bf16 %v3166_v47, %v3162_v54  ;;  %v3767_v47 = vld [vmem:[%s13305_s9 + $0x8] sm:$0x3] }
0x12f5   : > { %3459 = vmatprep.mubr.bf16.mxu0 %v3168_v56  ;;  %3500 = vmatprep.mubr.bf16.mxu1 %v3170_v39 }
0x12f6   : > { %3460 = vmatmul.mubr.bf16.vlgmr.msra.gmra.mxu0 %v3167_v61  ;;  %3501 = vmatmul.mubr.bf16.vlgmr.msra.gmra.mxu1 %v3169_v62 }
0x12f7   : > { %3683 = vmatpush1.bf16.msra.mxu0 %v11307_v59  ;;  %10729 = vmatpush3.bf16.msra.mxu1 %v11310_v60 }
0x12f8   : > { %3684 = vmatprep.subr.bf16.mxu0 %v11313_v63  ;;  %10730 = vmatprep.subr.bf16.mxu1 %v11927_v0 }
0x12f9   : > { %3714 = vmatprep.mubr.bf16.mxu0 %v11929_v32  ;;  %10744 = vmatprep.mubr.msk.bf16.mxu1 %vm11928_vm0, %v11927_v0 }
0x12fb   : > { %3685 = vmatpush1.bf16.msra.mxu0 %v11311_v1  ;;  %10731 = vmatpush3.bf16.msra.mxu1 %v11314_v2 }
0x12fc   : > { %3686 = vmatprep.subr.bf16.mxu0 %v11317_v43  ;;  %10732 = vmatprep.subr.bf16.mxu1 %v11927_v0 }
0x12ff   : > { %3687 = vmatpush1.bf16.msra.mxu0 %v11315_v3  ;;  %10733 = vmatpush3.bf16.msra.mxu1 %v11318_v4 }
0x1300   : > { %3688 = vmatprep.subr.bf16.mxu0 %v11321_v5  ;;  %10734 = vmatprep.subr.bf16.mxu1 %v11927_v0 }
0x1303   : > { %3689 = vmatpush1.bf16.msra.mxu0 %v11319_v6  ;;  %10735 = vmatpush3.bf16.msra.mxu1 %v11322_v7 }
0x1304   : > { %10736 = vmatprep.subr.bf16.mxu1 %v11927_v0  ;;  %3690 = vmatprep.subr.bf16.mxu0 %v11325_v8 }
0x1307   : > { %3691 = vmatpush1.bf16.msra.mxu0 %v11323_v9  ;;  %10737 = vmatpush3.bf16.msra.mxu1 %v11326_v48 }
0x1308   : > { %10738 = vmatprep.subr.bf16.mxu1 %v11927_v0  ;;  %3692 = vmatprep.subr.bf16.mxu0 %v11329_v10 }
0x130b   : > { %3693 = vmatpush1.bf16.msra.mxu0 %v11327_v44  ;;  %10739 = vmatpush3.bf16.msra.mxu1 %v11330_v46 }
0x130c   : > { %10740 = vmatprep.subr.bf16.mxu1 %v11927_v0  ;;  %3694 = vmatprep.subr.bf16.mxu0 %v11333_v11 }
0x130f   : > { %3695 = vmatpush1.bf16.msra.mxu0 %v11331_v12  ;;  %10741 = vmatpush3.bf16.msra.mxu1 %v11334_v13 }
0x1310   : > { %10742 = vmatprep.subr.bf16.mxu1 %v11927_v0  ;;  %3696 = vmatprep.subr.bf16.mxu0 %v11337_v14 }
0x1313   : > { %3697 = vmatpush1.bf16.msra.mxu0 %v11335_v15  ;;  %10743 = vmatpush3.bf16.msra.mxu1 %v11338_v16  ;;  %v11339_v15 = vld [vmem:[#allocation5 + $0x40] sm:$0xff]  }
0x13b6   : > { %v10244_v21 = vpop.f32.mrf.mxu0  ;;  %v10266_v22 = vpop.f32.mrf.mxu1 }
0x13b8   : > { %v10245_v23 = vpop.f32.mrf.mxu0  ;;  %v10267_v42 = vpop.f32.mrf.mxu1 }
0x13b9   : > { %v10246_v24 = vadd.f32 %v10245_v23, %v10244_v21  ;;  %v10268_v25 = vadd.f32 %v10267_v42, %v10266_v22  ;;  %v4018_v23 = vld [vmem:[%s13305_s9 + $0x8] sm:$0x3] }
0x13ba   : > { %v10247_v26 = vpop.f32.mrf.mxu0  ;;  %v10269_v27 = vpop.f32.mrf.mxu1 }
0x13bb   : > { %v3503_v28 = vadd.f32 %v10268_v25, %v10246_v24 }
0x13bc   : > { %v10248_v29 = vpop.f32.mrf.mxu0  ;;  %v10270_v30 = vpop.f32.mrf.mxu1 }
0x13bd   : > { %v10249_v31 = vadd.f32 %v10248_v29, %v10247_v26  ;;  %v10271_v33 = vadd.f32 %v10270_v30, %v10269_v27  ;;  %v3509_v34 = vadd.f32 %v3503_v28, %v12480_v50 }
0x13bf   : > { %v3506_v35 = vadd.f32 %v10271_v33, %v10249_v31  ;;  %v12518_v40 = vadd.f32 %v9802_v36, %v3509_v34 }
0x13c1   : > { %v3510_v37 = vadd.f32 %v3506_v35, %v12483_v51 }
0x13c3   : > { %v12520_v41 = vadd.f32 %v9802_v36, %v3510_v37 }
0x13c5   : > { %v3520_v45 = vpack.c.bf16 %v12520_v41, %v12518_v40 }
0x13c7   : > { %3715 = vmatmul.mubr.bf16.vlgmr.msra.gmra.mxu0 %v3520_v45  ;;  %10745 = vmatmul.mubr.bf16.vlgmr.msra.gmra.mxu1 %v3520_v45 }
0x1487   : > { %v12524_v49 = vpop.f32.mrf.mxu0  ;;  %v12526_v52 = vpop.f32.mrf.mxu1 }
0x1488   : > { %10752 = vmatprep.mubr.msk.f32.mxu0 %vm792_vm3, %v12524_v49 }
0x1489   : > { %v12530_v50 = vpop.f32.mrf.mxu0  ;;  %v10746_v53 = vpop.f32.mrf.mxu1 }
0x148b   : > { %v12532_v51 = vpop.f32.mrf.mxu0  ;;  %v12534_v57 = vpop.f32.mrf.mxu1 }
0x148c   : > { %10755 = vmatprep.subr.msk.mxu1 %vm910_vm4, %v12534_v57 }
0x148d   : > { %v12538_v54 = vpop.f32.mrf.mxu0  ;;  %v10747_v55 = vpop.f32.mrf.mxu1  ;;  %10756 = vmatpush3.msk.msra.mxu1 %vm910_vm4, %v12534_v57 }
0x148e   : > { %10748 = vmatprep.subr.msk.mxu0 %vm792_vm3, %v12538_v54  ;;  %10757 = vmatprep.subr.mxu1 %v12526_v52 }
0x148f   : > { %10749 = vmatpush3.xpose.msk.msra.mxu0 %vm792_vm3, %v12538_v54  ;;  %10758 = vmatpush3.msra.mxu1 %v12526_v52 }
0x1490   : > { %10750 = vmatprep.subr.msk.mxu0 %vm792_vm3, %v12530_v50 }
0x1493   : > { %10751 = vmatpush3.xpose.msk.msra.mxu0 %vm792_vm3, %v12530_v50 }
0x1494   : > { %10762 = vmatprep.subr.bf16.mxu0 %v11927_v0 }
0x1496   : > { %10753 = vmatmul.mubr.msk.f32.vlgmr.msra.gmra.mxu0 %vm792_vm3, %v12532_v51 }
0x1497   : > { %10764 = vmatprep.mubr.msk.bf16.mxu0 %vm11928_vm0, %v11927_v0  ;;  %10763 = vmatpush3.bf16.msra.mxu0 %v11339_v15 }
0x1556   : > { %v10754_v38 = vpop.f32.mrf.mxu0 }
0x1557   : > { %v3852_v56 = vadd.f32 %v10754_v38, %v3767_v47 }
0x1558   : > { %v3846_v39 = vpop.f32.mrf.mxu0 }
0x1559   : > { %v3847_v59 = vadd.f32 %v3846_v39, %v12563_v58  ;;  %v3858_v60 = vsel %vm884_vm5, %v3852_v56, -inf }
0x155a   : > { %3859 = vmax.xlane.f32.xlu0 %v3858_v60 }
0x155b   : > { %v3855_v61 = vsel %vm880_vm6, %v3847_v59, -inf }
0x155c   : > { %3856 = vmax.xlane.f32.xlu1 %v3855_v61 }
0x156d   : > { %4025 = vrot.lane.b32.xlu1 %v12538_v54, %s11930_s29 }
0x1571   : > { %4019 = vrot.lane.b32.xlu1 %v12524_v49, %s11930_s29 }
0x15e3   : > { %v3860_v62 = vpop.xlane.xlu0 %3859 }
0x15e4   : > { %v3862_v63 = vsub.f32 %v3852_v56, %v3860_v62 }
0x15e5   : > { %v3857_v1 = vpop.xlane.xlu1 %3856 }
0x15e6   : > { %v3865_v2 = vmul.f32 1.442695, %v3862_v63  ;;  %v3861_v43 = vsub.f32 %v3847_v59, %v3857_v1 }
0x15e8   : > { %11611 = vpow2.f32 %v3865_v2  ;;  %v3863_v3 = vmul.f32 1.442695, %v3861_v43 }
0x15e9   : > { %v4026_v4 = vpop.permute.xlu1 %4025 }
0x15ea   : > { %11613 = vpow2.f32 %v3863_v3  ;;  %10768 = vmatprep.subr.msk.mxu1 %vm792_vm3, %v4026_v4 }
0x15ed   : > { %v4020_v9 = vpop.permute.xlu1 %4019 }
0x15f5   : > { %v11612_v5 = vpop.eup %11611 }
0x15f6   : > { %v3870_v6 = vsel %vm884_vm5, %v11612_v5, 0.0 }
0x15f7   : > { %v11614_v7 = vpop.eup %11613  ;;  %3871 = vadd.xlane.f32.xlu0 %v3870_v6  ;;  %v11340_v6 = vld [vmem:[#allocation5 + $0x48] sm:$0xff]  }
0x15f8   : > { %v3867_v8 = vsel %vm880_vm6, %v11614_v7, 0.0 }
0x15f9   : > { %3868 = vadd.xlane.f32.xlu1 %v3867_v8 }
0x160a   : > { %4021 = vrot.lane.b32.xlu1 %v12532_v51, %s11930_s29 }
0x160d   : > { %4023 = vrot.lane.b32.xlu0 %v12530_v50, %s11930_s29 }
0x1680   : > { %v3872_v48 = vpop.xlane.xlu0 %3871 }
0x1681   : > { %11615 = vrcp.f32 %v3872_v48  ;;  %v4278_v48 = vld [vmem:[%s13305_s9 + $0x8] sm:$0x3] }
0x1682   : > { %v3869_v10 = vpop.xlane.xlu1 %3868 }
0x1683   : > { %11617 = vrcp.f32 %v3869_v10 }
0x1684   : > { %v4024_v13 = vpop.permute.xlu0 %4023 }
0x1686   : > { %v4022_v14 = vpop.permute.xlu1 %4021 }
0x168e   : > { %v11616_v44 = vpop.eup %11615 }
0x168f   : > { %v3876_v12 = vmul.f32 %v11616_v44, %v11612_v5 }
0x1690   : > { %v11618_v46 = vpop.eup %11617 }
0x1691   : > { %v3875_v11 = vmul.f32 %v11618_v46, %v11614_v7 }
0x1693   : > { %10759 = vmatprep.mubr.msk.f32.mxu1 %vm880_vm6, %v3875_v11 }
0x1694   : > { %10760 = vmatmul.mubr.msk.f32.vlgmr.msra.gmra.mxu1 %vm880_vm6, %v3876_v12 }
0x1695   : > { %10769 = vmatpush3.xpose.msk.msra.mxu1 %vm792_vm3, %v4026_v4  ;;  %10772 = vmatprep.mubr.msk.f32.mxu1 %vm792_vm3, %v4020_v9 }
0x1696   : > { %10770 = vmatprep.subr.msk.mxu1 %vm792_vm3, %v4024_v13 }
0x1699   : > { %10771 = vmatpush3.xpose.msk.msra.mxu1 %vm792_vm3, %v4024_v13 }
0x169a   : > { %10782 = vmatprep.subr.bf16.mxu1 %v11927_v0 }
0x169c   : > { %10773 = vmatmul.mubr.msk.f32.vlgmr.msra.gmra.mxu1 %vm792_vm3, %v4022_v14 }
0x169d   : > { %10784 = vmatprep.mubr.msk.bf16.mxu1 %vm11928_vm0, %v11927_v0  ;;  %10783 = vmatpush3.bf16.msra.mxu1 %v11340_v6 }
0x1754   : > { %v10761_v16 = vpop.f32.mrf.mxu1 }
0x1756   : > { %v3952_v21 = vpop.f32.mrf.mxu1 }
0x1757   : > { %v3961_v22 = vpack.c.bf16 %v10761_v16, %v3952_v21 }
0x1759   : > { %10765 = vmatmul.mubr.msk.bf16.vlgmr.msra.gmra.mxu0 %vm792_vm3, %v3961_v22 }
0x175c   : > { %v10774_v42 = vpop.f32.mrf.mxu1 }
0x175d   : > { %v4107_v24 = vadd.f32 %v10774_v42, %v4018_v23 }
0x175e   : > { %v4101_v25 = vpop.f32.mrf.mxu1 }
0x175f   : > { %v4102_v26 = vadd.f32 %v4101_v25, %v12563_v58  ;;  %v4113_v27 = vsel %vm884_vm5, %v4107_v24, -inf }
0x1760   : > { %4114 = vmax.xlane.f32.xlu1 %v4113_v27 }
0x1761   : > { %v4110_v28 = vsel %vm880_vm6, %v4102_v26, -inf }
0x1762   : > { %4111 = vmax.xlane.f32.xlu0 %v4110_v28 }
0x1771   : > { %4135 = vrot.lane.b32.xlu1 %v12534_v57, %s11930_s29 }
0x1775   : > { %4285 = vrot.lane.b32.xlu1 %v12538_v54, %s11931_s14 }
0x1779   : > { %4283 = vrot.lane.b32.xlu1 %v12530_v50, %s11931_s14 }
0x177d   : > { %4281 = vrot.lane.b32.xlu1 %v12532_v51, %s11931_s14 }
0x17e9   : > { %v4115_v29 = vpop.xlane.xlu1 %4114 }
0x17ea   : > { %v4117_v30 = vsub.f32 %v4107_v24, %v4115_v29 }
0x17eb   : > { %v4112_v31 = vpop.xlane.xlu0 %4111 }
0x17ec   : > { %v4120_v33 = vmul.f32 1.442695, %v4117_v30  ;;  %v4116_v34 = vsub.f32 %v4102_v26, %v4112_v31 }
0x17ed   : > { %v4136_v35 = vpop.permute.xlu1 %4135 }
0x17ee   : > { %11619 = vpow2.f32 %v4120_v33  ;;  %v4118_v36 = vmul.f32 1.442695, %v4116_v34  ;;  %10775 = vmatprep.subr.msk.mxu0 %vm910_vm4, %v4136_v35 }
0x17ef   : > { %10776 = vmatpush3.msk.msra.mxu0 %vm910_vm4, %v4136_v35 }
0x17f0   : > { %11621 = vpow2.f32 %v4118_v36 }
0x17f1   : > { %v4286_v62 = vpop.permute.xlu1 %4285 }
0x17f5   : > { %v4284_v4 = vpop.permute.xlu1 %4283 }
0x17f9   : > { %v4282_v5 = vpop.permute.xlu1 %4281 }
0x17fb   : > { %v11620_v37 = vpop.eup %11619 }
0x17fc   : > { %v4125_v45 = vsel %vm884_vm5, %v11620_v37, 0.0 }
0x17fd   : > { %v11622_v53 = vpop.eup %11621  ;;  %4126 = vadd.xlane.f32.xlu0 %v4125_v45 }
0x17fe   : > { %v4122_v55 = vsel %vm880_vm6, %v11622_v53, 0.0 }
0x1801   : > { %4123 = vadd.xlane.f32.xlu0 %v4122_v55 }
0x1817   : > { %4133 = vrot.lane.b32.xlu0 %v12526_v52, %s11930_s29 }
0x1819   : > { %v12610_v47 = vpop.f32.mrf.mxu0 }
0x181a   : > { %v4015_v28 = vadd.f32 %v12610_v47, %v12518_v40 }
0x181b   : > { %4279 = vrot.lane.b32.xlu0 %v12524_v49, %s11931_s14  ;;  %v10766_v38 = vpop.f32.mrf.mxu0 }
0x181d   : > { %v12614_v56 = vpop.f32.mrf.mxu0 }
0x181e   : > { %v4016_v33 = vadd.f32 %v12614_v56, %v12520_v41 }
0x181f   : > { %v10767_v39 = vpop.f32.mrf.mxu0 }
0x1886   : > { %v4127_v59 = vpop.xlane.xlu0 %4126 }
0x1887   : > { %11623 = vrcp.f32 %v4127_v59 }
0x188a   : > { %v4124_v60 = vpop.xlane.xlu0 %4123 }
0x188b   : > { %11625 = vrcp.f32 %v4124_v60  ;;  %v11341_v60 = vld [vmem:[#allocation5 + $0x50] sm:$0xff]  }
0x188e   : > { %v4134_v61 = vpop.permute.xlu0 %4133 }
0x188f   : > { %10777 = vmatprep.subr.mxu0 %v4134_v61 }
0x1890   : > { %10778 = vmatpush3.msra.mxu0 %v4134_v61 }
0x1891   : > { %10788 = vmatprep.subr.msk.mxu0 %vm792_vm3, %v4286_v62 }
0x1892   : > { %v4280_v3 = vpop.permute.xlu0 %4279 }
0x1894   : > { %v11624_v63 = vpop.eup %11623 }
0x1895   : > { %v4131_v43 = vmul.f32 %v11624_v63, %v11620_v37 }
0x1898   : > { %v11626_v1 = vpop.eup %11625 }
0x1899   : > { %v4130_v2 = vmul.f32 %v11626_v1, %v11622_v53  ;;  %v4537_v1 = vld [vmem:[%s13305_s9 + $0x8] sm:$0x3] }
0x189b   : > { %10779 = vmatprep.mubr.msk.f32.mxu0 %vm880_vm6, %v4130_v2 }
0x189c   : > { %10780 = vmatmul.mubr.msk.f32.vlgmr.msra.gmra.mxu0 %vm880_vm6, %v4131_v43 }
0x189d   : > { %10789 = vmatpush3.xpose.msk.msra.mxu0 %vm792_vm3, %v4286_v62  ;;  %10792 = vmatprep.mubr.msk.f32.mxu0 %vm792_vm3, %v4280_v3 }
0x189e   : > { %10790 = vmatprep.subr.msk.mxu0 %vm792_vm3, %v4284_v4 }
0x18a1   : > { %10791 = vmatpush3.xpose.msk.msra.mxu0 %vm792_vm3, %v4284_v4 }
0x18a2   : > { %10802 = vmatprep.subr.bf16.mxu0 %v11927_v0 }
0x18a4   : > { %10793 = vmatmul.mubr.msk.f32.vlgmr.msra.gmra.mxu0 %vm792_vm3, %v4282_v5 }
0x18a5   : > { %10804 = vmatprep.mubr.msk.bf16.mxu0 %vm11928_vm0, %v11927_v0  ;;  %10803 = vmatpush3.bf16.msra.mxu0 %v11341_v60 }
0x195c   : > { %v10781_v7 = vpop.f32.mrf.mxu0 }
0x195e   : > { %v4212_v8 = vpop.f32.mrf.mxu0 }
0x195f   : > { %v4221_v9 = vpack.c.bf16 %v10781_v7, %v4212_v8 }
0x1961   : > { %10785 = vmatmul.mubr.msk.bf16.vlgmr.msra.gmra.mxu1 %vm792_vm3, %v4221_v9 }
0x1964   : > { %v10794_v10 = vpop.f32.mrf.mxu0 }
0x1965   : > { %v4367_v44 = vadd.f32 %v10794_v10, %v4278_v48 }
0x1966   : > { %v4361_v46 = vpop.f32.mrf.mxu0 }
0x1967   : > { %v4362_v11 = vadd.f32 %v4361_v46, %v12563_v58  ;;  %v4373_v12 = vsel %vm884_vm5, %v4367_v44, -inf }
0x1968   : > { %4374 = vmax.xlane.f32.xlu1 %v4373_v12 }
0x1969   : > { %v4370_v13 = vsel %vm880_vm6, %v4362_v11, -inf }
0x196a   : > { %4371 = vmax.xlane.f32.xlu0 %v4370_v13 }
0x1979   : > { %4394 = vrot.lane.b32.xlu1 %v12534_v57, %s11931_s14 }
0x197d   : > { %4544 = vrot.lane.b32.xlu1 %v12538_v54, %s11932_s16 }
0x1981   : > { %4542 = vrot.lane.b32.xlu1 %v12530_v50, %s11932_s16 }
0x1985   : > { %4540 = vrot.lane.b32.xlu1 %v12532_v51, %s11932_s16 }
0x19f1   : > { %v4375_v14 = vpop.xlane.xlu1 %4374 }
0x19f2   : > { %v4377_v15 = vsub.f32 %v4367_v44, %v4375_v14 }
0x19f3   : > { %v4372_v16 = vpop.xlane.xlu0 %4371 }
0x19f4   : > { %v4380_v21 = vmul.f32 1.442695, %v4377_v15  ;;  %v4376_v22 = vsub.f32 %v4362_v11, %v4372_v16 }
0x19f5   : > { %v4395_v23 = vpop.permute.xlu1 %4394 }
0x19f6   : > { %11627 = vpow2.f32 %v4380_v21  ;;  %v4378_v42 = vmul.f32 1.442695, %v4376_v22  ;;  %10795 = vmatprep.subr.msk.mxu1 %vm910_vm4, %v4395_v23 }
0x19f7   : > { %10796 = vmatpush3.msk.msra.mxu1 %vm910_vm4, %v4395_v23 }
0x19f8   : > { %11629 = vpow2.f32 %v4378_v42 }
0x19f9   : > { %v4545_v40 = vpop.permute.xlu1 %4544 }
0x19fd   : > { %v4543_v56 = vpop.permute.xlu1 %4542 }
0x1a01   : > { %v4541_v59 = vpop.permute.xlu1 %4540 }
0x1a03   : > { %v11628_v24 = vpop.eup %11627 }
0x1a04   : > { %v4385_v25 = vsel %vm884_vm5, %v11628_v24, 0.0 }
0x1a05   : > { %v11630_v26 = vpop.eup %11629  ;;  %4386 = vadd.xlane.f32.xlu0 %v4385_v25 }
0x1a06   : > { %v4382_v27 = vsel %vm880_vm6, %v11630_v26, 0.0 }
0x1a09   : > { %4383 = vadd.xlane.f32.xlu0 %v4382_v27 }
0x1a1f   : > { %4392 = vrot.lane.b32.xlu0 %v12526_v52, %s11931_s14 }
0x1a21   : > { %v4268_v29 = vpop.f32.mrf.mxu1 }
0x1a22   : > { %v12650_v30 = vadd.f32 %v4268_v29, %v4015_v28 }
0x1a23   : > { %4538 = vrot.lane.b32.xlu0 %v12524_v49, %s11932_s16  ;;  %v10786_v31 = vpop.f32.mrf.mxu1 }
0x1a25   : > { %v4271_v34 = vpop.f32.mrf.mxu1 }
0x1a26   : > { %v12656_v35 = vadd.f32 %v4271_v34, %v4016_v33 }
0x1a27   : > { %v10787_v36 = vpop.f32.mrf.mxu1 }
0x1a28   : > { %v11342_v36 = vld [vmem:[#allocation5 + $0x58] sm:$0xff]  }
0x1a8e   : > { %v4387_v37 = vpop.xlane.xlu0 %4386 }
0x1a8f   : > { %11631 = vrcp.f32 %v4387_v37 }
0x1a92   : > { %v4384_v45 = vpop.xlane.xlu0 %4383 }
0x1a93   : > { %11633 = vrcp.f32 %v4384_v45 }
0x1a96   : > { %v4393_v53 = vpop.permute.xlu0 %4392 }
0x1a97   : > { %10797 = vmatprep.subr.mxu1 %v4393_v53 }
0x1a98   : > { %10798 = vmatpush3.msra.mxu1 %v4393_v53 }
0x1a99   : > { %10808 = vmatprep.subr.msk.mxu1 %vm792_vm3, %v4545_v40 }
0x1a9a   : > { %v4539_v41 = vpop.permute.xlu0 %4538 }
0x1a9c   : > { %v11632_v55 = vpop.eup %11631 }
0x1a9d   : > { %v4391_v39 = vmul.f32 %v11632_v55, %v11628_v24 }
0x1aa0   : > { %v11634_v47 = vpop.eup %11633 }
0x1aa1   : > { %v4390_v38 = vmul.f32 %v11634_v47, %v11630_v26 }
0x1aa3   : > { %10799 = vmatprep.mubr.msk.f32.mxu1 %vm880_vm6, %v4390_v38 }
0x1aa4   : > { %10800 = vmatmul.mubr.msk.f32.vlgmr.msra.gmra.mxu1 %vm880_vm6, %v4391_v39 }
0x1aa5   : > { %10809 = vmatpush3.xpose.msk.msra.mxu1 %vm792_vm3, %v4545_v40  ;;  %10812 = vmatprep.mubr.msk.f32.mxu1 %vm792_vm3, %v4539_v41  ;;  %v4796_v40 = vld [vmem:[%s13305_s9 + $0x8] sm:$0x3] }
0x1aa6   : > { %10810 = vmatprep.subr.msk.mxu1 %vm792_vm3, %v4543_v56 }
0x1aa9   : > { %10811 = vmatpush3.xpose.msk.msra.mxu1 %vm792_vm3, %v4543_v56 }
0x1aaa   : > { %10822 = vmatprep.subr.bf16.mxu1 %v11927_v0 }
0x1aac   : > { %10813 = vmatmul.mubr.msk.f32.vlgmr.msra.gmra.mxu1 %vm792_vm3, %v4541_v59 }
0x1aad   : > { %10824 = vmatprep.mubr.msk.bf16.mxu1 %vm11928_vm0, %v11927_v0  ;;  %10823 = vmatpush3.bf16.msra.mxu1 %v11342_v36 }
0x1b64   : > { %v10801_v61 = vpop.f32.mrf.mxu1 }
0x1b66   : > { %v4471_v62 = vpop.f32.mrf.mxu1 }
0x1b67   : > { %v4480_v63 = vpack.c.bf16 %v10801_v61, %v4471_v62 }
0x1b69   : > { %10805 = vmatmul.mubr.msk.bf16.vlgmr.msra.gmra.mxu0 %vm792_vm3, %v4480_v63 }
0x1b6c   : > { %v10814_v2 = vpop.f32.mrf.mxu1 }
0x1b6d   : > { %v4626_v43 = vadd.f32 %v10814_v2, %v4537_v1 }
0x1b6e   : > { %v4620_v3 = vpop.f32.mrf.mxu1 }
0x1b6f   : > { %v4621_v4 = vadd.f32 %v4620_v3, %v12563_v58  ;;  %v4632_v5 = vsel %vm884_vm5, %v4626_v43, -inf }
0x1b70   : > { %4633 = vmax.xlane.f32.xlu1 %v4632_v5 }
0x1b71   : > { %v4629_v6 = vsel %vm880_vm6, %v4621_v4, -inf }
0x1b72   : > { %4630 = vmax.xlane.f32.xlu0 %v4629_v6 }
0x1b81   : > { %4653 = vrot.lane.b32.xlu1 %v12534_v57, %s11932_s16 }
0x1b85   : > { %4803 = vrot.lane.b32.xlu1 %v12538_v54, %s11933_s19 }
0x1b89   : > { %4801 = vrot.lane.b32.xlu1 %v12530_v50, %s11933_s19 }
0x1b8d   : > { %4799 = vrot.lane.b32.xlu1 %v12532_v51, %s11933_s19 }
0x1bf9   : > { %v4634_v7 = vpop.xlane.xlu1 %4633 }
0x1bfa   : > { %v4636_v8 = vsub.f32 %v4626_v43, %v4634_v7 }
0x1bfb   : > { %v4631_v9 = vpop.xlane.xlu0 %4630 }
0x1bfc   : > { %v4639_v48 = vmul.f32 1.442695, %v4636_v8  ;;  %v4635_v10 = vsub.f32 %v4621_v4, %v4631_v9 }
0x1bfd   : > { %v4654_v44 = vpop.permute.xlu1 %4653 }
0x1bfe   : > { %11635 = vpow2.f32 %v4639_v48  ;;  %v4637_v46 = vmul.f32 1.442695, %v4635_v10  ;;  %10815 = vmatprep.subr.msk.mxu0 %vm910_vm4, %v4654_v44 }
0x1bff   : > { %10816 = vmatpush3.msk.msra.mxu0 %vm910_vm4, %v4654_v44 }
0x1c00   : > { %11637 = vpow2.f32 %v4637_v46 }
0x1c01   : > { %v4804_v27 = vpop.permute.xlu1 %4803 }
0x1c05   : > { %v4802_v34 = vpop.permute.xlu1 %4801 }
0x1c0b   : > { %v11636_v11 = vpop.eup %11635 }
0x1c0c   : > { %v4644_v12 = vsel %vm884_vm5, %v11636_v11, 0.0 }
0x1c0d   : > { %v11638_v13 = vpop.eup %11637  ;;  %4645 = vadd.xlane.f32.xlu0 %v4644_v12 }
0x1c0e   : > { %v4641_v14 = vsel %vm880_vm6, %v11638_v13, 0.0 }
0x1c11   : > { %4642 = vadd.xlane.f32.xlu0 %v4641_v14 }
0x1c27   : > { %4651 = vrot.lane.b32.xlu0 %v12526_v52, %s11932_s16 }
0x1c29   : > { %v4527_v15 = vpop.f32.mrf.mxu0 }
0x1c2a   : > { %v12691_v16 = vadd.f32 %v4527_v15, %v12650_v30 }
0x1c2b   : > { %4797 = vrot.lane.b32.xlu0 %v12524_v49, %s11933_s19  ;;  %v10806_v21 = vpop.f32.mrf.mxu0 }
0x1c2d   : > { %v4530_v22 = vpop.f32.mrf.mxu0 }
0x1c2e   : > { %v12696_v23 = vadd.f32 %v4530_v22, %v12656_v35  ;;  %v4800_v35 = vpop.permute.xlu1 %4799 }
0x1c2f   : > { %v10807_v42 = vpop.f32.mrf.mxu0 }
0x1c30   : > { %v11343_v42 = vld [vmem:[#allocation5 + $0x60] sm:$0xff]  }
0x1c96   : > { %v4646_v24 = vpop.xlane.xlu0 %4645 }
0x1c97   : > { %11639 = vrcp.f32 %v4646_v24 }
0x1c9a   : > { %v4643_v25 = vpop.xlane.xlu0 %4642 }
0x1c9b   : > { %11641 = vrcp.f32 %v4643_v25 }
0x1c9e   : > { %v4652_v26 = vpop.permute.xlu0 %4651 }
0x1c9f   : > { %10817 = vmatprep.subr.mxu0 %v4652_v26 }
0x1ca0   : > { %10818 = vmatpush3.msra.mxu0 %v4652_v26 }
0x1ca1   : > { %10828 = vmatprep.subr.msk.mxu0 %vm792_vm3, %v4804_v27 }
0x1ca2   : > { %v4798_v33 = vpop.permute.xlu0 %4797 }
0x1ca4   : > { %v11640_v28 = vpop.eup %11639 }
0x1ca5   : > { %v4650_v31 = vmul.f32 %v11640_v28, %v11636_v11 }
0x1ca8   : > { %v11642_v29 = vpop.eup %11641 }
0x1ca9   : > { %v4649_v30 = vmul.f32 %v11642_v29, %v11638_v13 }
0x1cab   : > { %10819 = vmatprep.mubr.msk.f32.mxu0 %vm880_vm6, %v4649_v30 }
0x1cac   : > { %10820 = vmatmul.mubr.msk.f32.vlgmr.msra.gmra.mxu0 %vm880_vm6, %v4650_v31 }
0x1cad   : > { %10829 = vmatpush3.xpose.msk.msra.mxu0 %vm792_vm3, %v4804_v27  ;;  %10832 = vmatprep.mubr.msk.f32.mxu0 %vm792_vm3, %v4798_v33  ;;  %v5055_v27 = vld [vmem:[%s13305_s9 + $0x8] sm:$0x3] }
0x1cae   : > { %10830 = vmatprep.subr.msk.mxu0 %vm792_vm3, %v4802_v34 }
0x1cb1   : > { %10831 = vmatpush3.xpose.msk.msra.mxu0 %vm792_vm3, %v4802_v34 }
0x1cb2   : > { %10842 = vmatprep.subr.bf16.mxu0 %v11927_v0 }
0x1cb4   : > { %10833 = vmatmul.mubr.msk.f32.vlgmr.msra.gmra.mxu0 %vm792_vm3, %v4800_v35 }
0x1cb5   : > { %10844 = vmatprep.mubr.msk.bf16.mxu0 %vm11928_vm0, %v11927_v0  ;;  %10843 = vmatpush3.bf16.msra.mxu0 %v11343_v42 }
0x1d6c   : > { %v10821_v37 = vpop.f32.mrf.mxu0 }
0x1d6e   : > { %v4730_v45 = vpop.f32.mrf.mxu0 }
0x1d6f   : > { %v4739_v53 = vpack.c.bf16 %v10821_v37, %v4730_v45 }
0x1d71   : > { %10825 = vmatmul.mubr.msk.bf16.vlgmr.msra.gmra.mxu1 %vm792_vm3, %v4739_v53 }
0x1d74   : > { %v10834_v55 = vpop.f32.mrf.mxu0 }
0x1d75   : > { %v4885_v47 = vadd.f32 %v10834_v55, %v4796_v40 }
0x1d76   : > { %v4879_v38 = vpop.f32.mrf.mxu0 }
0x1d77   : > { %v4880_v39 = vadd.f32 %v4879_v38, %v12563_v58  ;;  %v4891_v41 = vsel %vm884_vm5, %v4885_v47, -inf }
0x1d78   : > { %4892 = vmax.xlane.f32.xlu1 %v4891_v41 }
0x1d79   : > { %v4888_v56 = vsel %vm880_vm6, %v4880_v39, -inf }
0x1d7a   : > { %4889 = vmax.xlane.f32.xlu0 %v4888_v56 }
0x1d89   : > { %4912 = vrot.lane.b32.xlu1 %v12534_v57, %s11933_s19 }
0x1d8d   : > { %5062 = vrot.lane.b32.xlu1 %v12538_v54, %s11934_s27 }
0x1d91   : > { %5060 = vrot.lane.b32.xlu1 %v12530_v50, %s11934_s27 }
0x1d95   : > { %5058 = vrot.lane.b32.xlu1 %v12532_v51, %s11934_s27 }
0x1e01   : > { %v4893_v59 = vpop.xlane.xlu1 %4892 }
0x1e02   : > { %v4895_v60 = vsub.f32 %v4885_v47, %v4893_v59 }
0x1e03   : > { %v4890_v61 = vpop.xlane.xlu0 %4889 }
0x1e04   : > { %v4898_v62 = vmul.f32 1.442695, %v4895_v60  ;;  %v4894_v63 = vsub.f32 %v4880_v39, %v4890_v61 }
0x1e05   : > { %v4913_v1 = vpop.permute.xlu1 %4912 }
0x1e06   : > { %11643 = vpow2.f32 %v4898_v62  ;;  %v4896_v2 = vmul.f32 1.442695, %v4894_v63  ;;  %10835 = vmatprep.subr.msk.mxu1 %vm910_vm4, %v4913_v1 }
0x1e07   : > { %10836 = vmatpush3.msk.msra.mxu1 %vm910_vm4, %v4913_v1 }
0x1e08   : > { %11645 = vpow2.f32 %v4896_v2 }
0x1e09   : > { %v5063_v12 = vpop.permute.xlu1 %5062 }
0x1e0d   : > { %v5061_v22 = vpop.permute.xlu1 %5060 }
0x1e13   : > { %v11644_v43 = vpop.eup %11643 }
0x1e14   : > { %v4903_v3 = vsel %vm884_vm5, %v11644_v43, 0.0 }
0x1e15   : > { %v11646_v4 = vpop.eup %11645  ;;  %4904 = vadd.xlane.f32.xlu0 %v4903_v3 }
0x1e16   : > { %v4900_v5 = vsel %vm880_vm6, %v11646_v4, 0.0 }
0x1e19   : > { %4901 = vadd.xlane.f32.xlu0 %v4900_v5 }
0x1e2f   : > { %4910 = vrot.lane.b32.xlu0 %v12526_v52, %s11933_s19 }
0x1e31   : > { %v4786_v6 = vpop.f32.mrf.mxu1 }
0x1e32   : > { %v12731_v7 = vadd.f32 %v4786_v6, %v12691_v16 }
0x1e33   : > { %5056 = vrot.lane.b32.xlu0 %v12524_v49, %s11934_s27  ;;  %v10826_v8 = vpop.f32.mrf.mxu1 }
0x1e35   : > { %v4789_v9 = vpop.f32.mrf.mxu1 }
0x1e36   : > { %v12736_v48 = vadd.f32 %v4789_v9, %v12696_v23  ;;  %v5059_v23 = vpop.permute.xlu1 %5058 }
0x1e37   : > { %v10827_v10 = vpop.f32.mrf.mxu1 }
0x1e38   : > { %v11344_v10 = vld [vmem:[#allocation5 + $0x68] sm:$0xff]  }
0x1e9e   : > { %v4905_v44 = vpop.xlane.xlu0 %4904 }
0x1e9f   : > { %11647 = vrcp.f32 %v4905_v44 }
0x1ea2   : > { %v4902_v46 = vpop.xlane.xlu0 %4901 }
0x1ea3   : > { %11649 = vrcp.f32 %v4902_v46 }
0x1ea6   : > { %v4911_v11 = vpop.permute.xlu0 %4910 }
0x1ea7   : > { %10837 = vmatprep.subr.mxu1 %v4911_v11 }
0x1ea8   : > { %10838 = vmatpush3.msra.mxu1 %v4911_v11 }
0x1ea9   : > { %10848 = vmatprep.subr.msk.mxu1 %vm792_vm3, %v5063_v12 }
0x1eaa   : > { %v5057_v21 = vpop.permute.xlu0 %5056 }
0x1eac   : > { %v11648_v13 = vpop.eup %11647 }
0x1ead   : > { %v4909_v16 = vmul.f32 %v11648_v13, %v11644_v43 }
0x1eb0   : > { %v11650_v14 = vpop.eup %11649 }
0x1eb1   : > { %v4908_v15 = vmul.f32 %v11650_v14, %v11646_v4 }
0x1eb3   : > { %10839 = vmatprep.mubr.msk.f32.mxu1 %vm880_vm6, %v4908_v15 }
0x1eb4   : > { %10840 = vmatmul.mubr.msk.f32.vlgmr.msra.gmra.mxu1 %vm880_vm6, %v4909_v16 }
0x1eb5   : > { %10849 = vmatpush3.xpose.msk.msra.mxu1 %vm792_vm3, %v5063_v12  ;;  %10852 = vmatprep.mubr.msk.f32.mxu1 %vm792_vm3, %v5057_v21  ;;  %v5314_v12 = vld [vmem:[%s13305_s9 + $0x8] sm:$0x3] }
0x1eb6   : > { %10850 = vmatprep.subr.msk.mxu1 %vm792_vm3, %v5061_v22 }
0x1eb9   : > { %10851 = vmatpush3.xpose.msk.msra.mxu1 %vm792_vm3, %v5061_v22 }
0x1eba   : > { %10862 = vmatprep.subr.bf16.mxu1 %v11927_v0 }
0x1ebc   : > { %10853 = vmatmul.mubr.msk.f32.vlgmr.msra.gmra.mxu1 %vm792_vm3, %v5059_v23 }
0x1ebd   : > { %10864 = vmatprep.mubr.msk.bf16.mxu1 %vm11928_vm0, %v11927_v0  ;;  %10863 = vmatpush3.bf16.msra.mxu1 %v11344_v10 }
0x1f74   : > { %v10841_v24 = vpop.f32.mrf.mxu1 }
0x1f76   : > { %v4989_v25 = vpop.f32.mrf.mxu1 }
0x1f77   : > { %v4998_v26 = vpack.c.bf16 %v10841_v24, %v4989_v25 }
0x1f79   : > { %10845 = vmatmul.mubr.msk.bf16.vlgmr.msra.gmra.mxu0 %vm792_vm3, %v4998_v26 }
0x1f7c   : > { %v10854_v28 = vpop.f32.mrf.mxu1 }
0x1f7d   : > { %v5144_v29 = vadd.f32 %v10854_v28, %v5055_v27 }
0x1f7e   : > { %v5138_v30 = vpop.f32.mrf.mxu1 }
0x1f7f   : > { %v5139_v31 = vadd.f32 %v5138_v30, %v12563_v58  ;;  %v5150_v33 = vsel %vm884_vm5, %v5144_v29, -inf }
0x1f80   : > { %5151 = vmax.xlane.f32.xlu1 %v5150_v33 }
0x1f81   : > { %v5147_v34 = vsel %vm880_vm6, %v5139_v31, -inf }
0x1f82   : > { %5148 = vmax.xlane.f32.xlu0 %v5147_v34 }
0x1f91   : > { %5171 = vrot.lane.b32.xlu1 %v12534_v57, %s11934_s27 }
0x1f95   : > { %5321 = vrot.lane.b32.xlu1 %v12538_v54, %s11935_s17 }
0x1f99   : > { %5319 = vrot.lane.b32.xlu1 %v12530_v50, %s11935_s17 }
0x1f9d   : > { %5317 = vrot.lane.b32.xlu1 %v12532_v51, %s11935_s17 }
0x2009   : > { %v5152_v35 = vpop.xlane.xlu1 %5151 }
0x200a   : > { %v5154_v36 = vsub.f32 %v5144_v29, %v5152_v35 }
0x200b   : > { %v5149_v37 = vpop.xlane.xlu0 %5148 }
0x200c   : > { %v5157_v45 = vmul.f32 1.442695, %v5154_v36  ;;  %v5153_v53 = vsub.f32 %v5139_v31, %v5149_v37 }
0x200d   : > { %v5172_v40 = vpop.permute.xlu1 %5171 }
0x200e   : > { %11651 = vpow2.f32 %v5157_v45  ;;  %v5155_v55 = vmul.f32 1.442695, %v5153_v53  ;;  %10855 = vmatprep.subr.msk.mxu0 %vm910_vm4, %v5172_v40 }
0x200f   : > { %10856 = vmatpush3.msk.msra.mxu0 %vm910_vm4, %v5172_v40 }
0x2010   : > { %11653 = vpow2.f32 %v5155_v55 }
0x2011   : > { %v5322_v3 = vpop.permute.xlu1 %5321 }
0x2015   : > { %v5320_v9 = vpop.permute.xlu1 %5319 }
0x201b   : > { %v11652_v47 = vpop.eup %11651 }
0x201c   : > { %v5162_v38 = vsel %vm884_vm5, %v11652_v47, 0.0 }
0x201d   : > { %v11654_v39 = vpop.eup %11653  ;;  %5163 = vadd.xlane.f32.xlu0 %v5162_v38 }
0x201e   : > { %v5159_v41 = vsel %vm880_vm6, %v11654_v39, 0.0 }
0x2021   : > { %5160 = vadd.xlane.f32.xlu0 %v5159_v41 }
0x2037   : > { %5169 = vrot.lane.b32.xlu0 %v12526_v52, %s11934_s27 }
0x2039   : > { %v5045_v56 = vpop.f32.mrf.mxu0 }
0x203a   : > { %v12771_v59 = vadd.f32 %v5045_v56, %v12731_v7 }
0x203b   : > { %5315 = vrot.lane.b32.xlu0 %v12524_v49, %s11935_s17  ;;  %v10846_v60 = vpop.f32.mrf.mxu0 }
0x203d   : > { %v5048_v61 = vpop.f32.mrf.mxu0 }
0x203e   : > { %v12776_v62 = vadd.f32 %v5048_v61, %v12736_v48  ;;  %v5318_v48 = vpop.permute.xlu1 %5317 }
0x203f   : > { %v10847_v63 = vpop.f32.mrf.mxu0 }
0x2040   : > { %v5573_v63 = vld [vmem:[%s13305_s9 + $0x8] sm:$0x3] }
0x20a6   : > { %v5164_v1 = vpop.xlane.xlu0 %5163 }
0x20a7   : > { %11655 = vrcp.f32 %v5164_v1 }
0x20aa   : > { %v5161_v2 = vpop.xlane.xlu0 %5160 }
0x20ab   : > { %11657 = vrcp.f32 %v5161_v2 }
0x20ae   : > { %v5170_v43 = vpop.permute.xlu0 %5169 }
0x20af   : > { %10857 = vmatprep.subr.mxu0 %v5170_v43 }
0x20b0   : > { %10858 = vmatpush3.msra.mxu0 %v5170_v43 }
0x20b1   : > { %10868 = vmatprep.subr.msk.mxu0 %vm792_vm3, %v5322_v3 }
0x20b2   : > { %v5316_v8 = vpop.permute.xlu0 %5315 }
0x20b4   : > { %v11656_v4 = vpop.eup %11655 }
0x20b5   : > { %v5168_v7 = vmul.f32 %v11656_v4, %v11652_v47 }
0x20b8   : > { %v11658_v5 = vpop.eup %11657 }
0x20b9   : > { %v5167_v6 = vmul.f32 %v11658_v5, %v11654_v39 }
0x20bb   : > { %10859 = vmatprep.mubr.msk.f32.mxu0 %vm880_vm6, %v5167_v6 }
0x20bc   : > { %10860 = vmatmul.mubr.msk.f32.vlgmr.msra.gmra.mxu0 %vm880_vm6, %v5168_v7 }
0x20bd   : > { %10869 = vmatpush3.xpose.msk.msra.mxu0 %vm792_vm3, %v5322_v3  ;;  %10872 = vmatprep.mubr.msk.f32.mxu0 %vm792_vm3, %v5316_v8 }
0x20be   : > { %10870 = vmatprep.subr.msk.mxu0 %vm792_vm3, %v5320_v9 }
0x20c1   : > { %10871 = vmatpush3.xpose.msk.msra.mxu0 %vm792_vm3, %v5320_v9 }
0x20c2   : > { %10882 = vmatprep.subr.bf16.mxu0 %v11927_v0 }
0x20c4   : > { %10873 = vmatmul.mubr.msk.f32.vlgmr.msra.gmra.mxu0 %vm792_vm3, %v5318_v48 }
0x20c5   : > { %10884 = vmatprep.mubr.msk.bf16.mxu0 %vm11928_vm0, %v11927_v0 }
0x217c   : > { %v10861_v44 = vpop.f32.mrf.mxu0 }
0x217e   : > { %v5248_v46 = vpop.f32.mrf.mxu0 }
0x217f   : > { %v5257_v11 = vpack.c.bf16 %v10861_v44, %v5248_v46 }
0x2181   : > { %10865 = vmatmul.mubr.msk.bf16.vlgmr.msra.gmra.mxu1 %vm792_vm3, %v5257_v11 }
0x2184   : > { %v10874_v13 = vpop.f32.mrf.mxu0 }
0x2185   : > { %v5403_v14 = vadd.f32 %v10874_v13, %v5314_v12 }
0x2186   : > { %v5397_v15 = vpop.f32.mrf.mxu0 }
0x2187   : > { %v5398_v16 = vadd.f32 %v5397_v15, %v12563_v58  ;;  %v5409_v21 = vsel %vm884_vm5, %v5403_v14, -inf }
0x2188   : > { %5410 = vmax.xlane.f32.xlu1 %v5409_v21 }
0x2189   : > { %v5406_v22 = vsel %vm880_vm6, %v5398_v16, -inf }
0x218a   : > { %5407 = vmax.xlane.f32.xlu0 %v5406_v22 }
0x2199   : > { %5430 = vrot.lane.b32.xlu1 %v12534_v57, %s11935_s17 }
0x219d   : > { %5580 = vrot.lane.b32.xlu1 %v12538_v54, %s11936_s18 }
0x21a1   : > { %5578 = vrot.lane.b32.xlu1 %v12530_v50, %s11936_s18 }
0x21a5   : > { %5576 = vrot.lane.b32.xlu1 %v12532_v51, %s11936_s18 }
0x2211   : > { %v5411_v23 = vpop.xlane.xlu1 %5410 }
0x2212   : > { %v5413_v42 = vsub.f32 %v5403_v14, %v5411_v23 }
0x2213   : > { %v5408_v24 = vpop.xlane.xlu0 %5407 }
0x2214   : > { %v5416_v25 = vmul.f32 1.442695, %v5413_v42  ;;  %v5412_v26 = vsub.f32 %v5398_v16, %v5408_v24 }
0x2215   : > { %v5431_v27 = vpop.permute.xlu1 %5430 }
0x2216   : > { %11659 = vpow2.f32 %v5416_v25  ;;  %v5414_v28 = vmul.f32 1.442695, %v5412_v26  ;;  %10875 = vmatprep.subr.msk.mxu1 %vm910_vm4, %v5431_v27 }
0x2217   : > { %10876 = vmatpush3.msk.msra.mxu1 %vm910_vm4, %v5431_v27  ;;  %v11346_v27 = vld [vmem:[#allocation5 + $0x78] sm:$0xff]  }
0x2218   : > { %11661 = vpow2.f32 %v5414_v28  ;;  %v11347_v28 = vld [vmem:[#allocation7 + $0x1e0] ss:$16 sps:$4 sm:$0xff]  }
0x2219   : > { %v5581_v40 = vpop.permute.xlu1 %5580 }
0x221d   : > { %v5579_v41 = vpop.permute.xlu1 %5578 }
0x2221   : > { %v5577_v56 = vpop.permute.xlu1 %5576 }
0x2223   : > { %v11660_v54 = vpop.eup %11659 }
0x2224   : > { %v5421_v29 = vsel %vm884_vm5, %v11660_v54, 0.0 }
0x2225   : > { %v11662_v50 = vpop.eup %11661  ;;  %5422 = vadd.xlane.f32.xlu0 %v5421_v29  ;;  %v11352_v29 = vld [vmem:[#allocation7 + $0x1ec] ss:$16 sps:$4 sm:$0xff]  }
0x2226   : > { %v5418_v51 = vsel %vm880_vm6, %v11662_v50, 0.0 }
0x2229   : > { %5419 = vadd.xlane.f32.xlu0 %v5418_v51  ;;  %v11353_v51 = vld [vmem:[#allocation7 + $0x1c0] ss:$16 sps:$4 sm:$0xff]  }
0x223f   : > { %5428 = vrot.lane.b32.xlu0 %v12526_v52, %s11935_s17 }
0x2241   : > { %v5304_v30 = vpop.f32.mrf.mxu1 }
0x2242   : > { %v12811_v31 = vadd.f32 %v5304_v30, %v12771_v59  ;;  %v11345_v59 = vld [vmem:[#allocation5 + $0x70] sm:$0xff]  }
0x2243   : > { %5574 = vrot.lane.b32.xlu0 %v12524_v49, %s11936_s18  ;;  %v10866_v33 = vpop.f32.mrf.mxu1  ;;  %10883 = vmatpush3.bf16.msra.mxu0 %v11345_v59  ;;  %v11361_v30 = vld [vmem:[#allocation7 + $0x1a4] ss:$16 sps:$4 sm:$0xff]   ;;  %v11368_v59 = vld [vmem:[#allocation7 + $0x188] ss:$16 sps:$4 sm:$0xff]  }
0x2244   : > { %v11367_v33 = vld [vmem:[#allocation7 + $0x184] ss:$16 sps:$4 sm:$0xff]  }
0x2245   : > { %v5307_v34 = vpop.f32.mrf.mxu1 }
0x2246   : > { %v12816_v35 = vadd.f32 %v5307_v34, %v12776_v62  ;;  %v11365_v34 = vld [vmem:[#allocation7 + $0x180] ss:$16 sps:$4 sm:$0xff]  }
0x2247   : > { %v10867_v36 = vpop.f32.mrf.mxu1 }
0x2248   : > { %v11371_v36 = vld [vmem:[#allocation7 + $0x160] ss:$16 sps:$4 sm:$0xff]  }
0x22ae   : > { %v5423_v37 = vpop.xlane.xlu0 %5422 }
0x22af   : > { %11663 = vrcp.f32 %v5423_v37  ;;  %v11379_v37 = vld [vmem:[#allocation7 + $0x144] ss:$16 sps:$4 sm:$0xff]  }
0x22b2   : > { %v5420_v45 = vpop.xlane.xlu0 %5419 }
0x22b3   : > { %11665 = vrcp.f32 %v5420_v45  ;;  %v11377_v45 = vld [vmem:[#allocation7 + $0x140] ss:$16 sps:$4 sm:$0xff]  }
0x22b6   : > { %v5429_v53 = vpop.permute.xlu0 %5428 }
0x22b7   : > { %10877 = vmatprep.subr.mxu1 %v5429_v53 }
0x22b8   : > { %10878 = vmatpush3.msra.mxu1 %v5429_v53 }
0x22b9   : > { %10888 = vmatprep.subr.msk.mxu1 %vm792_vm3, %v5581_v40 }
0x22ba   : > { %v5575_v39 = vpop.permute.xlu0 %5574 }
0x22bc   : > { %v11664_v55 = vpop.eup %11663 }
0x22bd   : > { %v5427_v49 = vmul.f32 %v11664_v55, %v11660_v54  ;;  %v11349_v54 = vld [vmem:[#allocation7 + $0x1e4] ss:$16 sps:$4 sm:$0xff]   ;;  %v11350_v55 = vld [vmem:[#allocation7 + $0x1e8] ss:$16 sps:$4 sm:$0xff]  }
0x22c0   : > { %v11666_v47 = vpop.eup %11665 }
0x22c1   : > { %v5426_v38 = vmul.f32 %v11666_v47, %v11662_v50  ;;  %v11355_v50 = vld [vmem:[#allocation7 + $0x1c4] ss:$16 sps:$4 sm:$0xff]  }
0x22c3   : > { %10879 = vmatprep.mubr.msk.f32.mxu1 %vm880_vm6, %v5426_v38  ;;  %v11358_v38 = vld [vmem:[#allocation7 + $0x1cc] ss:$16 sps:$4 sm:$0xff]  }
0x22c4   : > { %10880 = vmatmul.mubr.msk.f32.vlgmr.msra.gmra.mxu1 %vm880_vm6, %v5427_v49  ;;  %v11356_v49 = vld [vmem:[#allocation7 + $0x1c8] ss:$16 sps:$4 sm:$0xff]  }
0x22c5   : > { %10889 = vmatpush3.xpose.msk.msra.mxu1 %vm792_vm3, %v5581_v40  ;;  %10892 = vmatprep.mubr.msk.f32.mxu1 %vm792_vm3, %v5575_v39  ;;  %v11364_v39 = vld [vmem:[#allocation7 + $0x1ac] ss:$16 sps:$4 sm:$0xff]  }
0x22c6   : > { %10890 = vmatprep.subr.msk.mxu1 %vm792_vm3, %v5579_v41 }
0x22c9   : > { %10891 = vmatpush3.xpose.msk.msra.mxu1 %vm792_vm3, %v5579_v41  ;;  %v11362_v41 = vld [vmem:[#allocation7 + $0x1a8] ss:$16 sps:$4 sm:$0xff]  }
0x22ca   : > { %10902 = vmatprep.subr.bf16.mxu1 %v11927_v0 }
0x22cc   : > { %10893 = vmatmul.mubr.msk.f32.vlgmr.msra.gmra.mxu1 %vm792_vm3, %v5577_v56  ;;  %v11370_v56 = vld [vmem:[#allocation7 + $0x18c] ss:$16 sps:$4 sm:$0xff]  }
0x22cd   : > { %10904 = vmatprep.mubr.msk.bf16.mxu1 %vm11928_vm0, %v11927_v0  ;;  %10903 = vmatpush3.bf16.msra.mxu1 %v11346_v27  ;;  %v11410_v27 = vld [vmem:[#allocation8 + $0x1a0] sm:$0xff]  }
0x22ce   : > { %6091 = vmatprep.subr.bf16.mxu1 %v11352_v29  ;;  %v11413_v29 = vld [vmem:[#allocation8 + $0x118] sm:$0xff]  }
0x2384   : > { %v10881_v60 = vpop.f32.mrf.mxu1 }
0x2386   : > { %v5507_v61 = vpop.f32.mrf.mxu1 }
0x2387   : > { %v5516_v62 = vpack.c.bf16 %v10881_v60, %v5507_v61  ;;  %v11376_v60 = vld [vmem:[#allocation7 + $0x16c] ss:$16 sps:$4 sm:$0xff]   ;;  %v11374_v61 = vld [vmem:[#allocation7 + $0x168] ss:$16 sps:$4 sm:$0xff]  }
0x2389   : > { %10885 = vmatmul.mubr.msk.bf16.vlgmr.msra.gmra.mxu0 %vm792_vm3, %v5516_v62  ;;  %v11382_v62 = vld [vmem:[#allocation7 + $0x14c] ss:$16 sps:$4 sm:$0xff]  }
0x238c   : > { %v10894_v1 = vpop.f32.mrf.mxu1 }
0x238d   : > { %v5662_v2 = vadd.f32 %v10894_v1, %v5573_v63  ;;  %v11380_v63 = vld [vmem:[#allocation7 + $0x148] ss:$16 sps:$4 sm:$0xff]   ;;  %v11385_v1 = vld [vmem:[#allocation7 + $0x124] ss:$16 sps:$4 sm:$0xff]  }
0x238e   : > { %v5656_v43 = vpop.f32.mrf.mxu1 }
0x238f   : > { %v5657_v3 = vadd.f32 %v5656_v43, %v12563_v58  ;;  %v5668_v4 = vsel %vm884_vm5, %v5662_v2, -inf  ;;  %v11383_v43 = vld [vmem:[#allocation7 + $0x120] ss:$16 sps:$4 sm:$0xff]  }
0x2390   : > { %5669 = vmax.xlane.f32.xlu1 %v5668_v4  ;;  %v11391_v4 = vld [vmem:[#allocation7 + $0x104] ss:$16 sps:$4 sm:$0xff]  }
0x2391   : > { %v5665_v5 = vsel %vm880_vm6, %v5657_v3, -inf }
0x2392   : > { %5666 = vmax.xlane.f32.xlu0 %v5665_v5  ;;  %v11394_v5 = vld [vmem:[#allocation7 + $0x10c] ss:$16 sps:$4 sm:$0xff]  }
0x23a1   : > { %5689 = vrot.lane.b32.xlu1 %v12534_v57, %s11936_s18 }
0x2419   : > { %v5670_v6 = vpop.xlane.xlu1 %5669 }
0x241a   : > { %v5672_v7 = vsub.f32 %v5662_v2, %v5670_v6  ;;  %v11388_v2 = vld [vmem:[#allocation7 + $0x12c] ss:$16 sps:$4 sm:$0xff]   ;;  %v11389_v6 = vld [vmem:[#allocation7 + $0x100] ss:$16 sps:$4 sm:$0xff]  }
0x241b   : > { %v5667_v8 = vpop.xlane.xlu0 %5666 }
0x241c   : > { %v5675_v9 = vmul.f32 1.442695, %v5672_v7  ;;  %v5671_v48 = vsub.f32 %v5657_v3, %v5667_v8  ;;  %v11386_v3 = vld [vmem:[#allocation7 + $0x128] ss:$16 sps:$4 sm:$0xff]  }
0x241d   : > { %v5690_v10 = vpop.permute.xlu1 %5689  ;;  %v11392_v7 = vld [vmem:[#allocation7 + $0x108] ss:$16 sps:$4 sm:$0xff]  }
0x241e   : > { %11667 = vpow2.f32 %v5675_v9  ;;  %v5673_v44 = vmul.f32 1.442695, %v5671_v48  ;;  %10895 = vmatprep.subr.msk.mxu0 %vm910_vm4, %v5690_v10  ;;  %v11395_v8 = vld [vmem:[#allocation8 + $0x178] sm:$0xff]  }
0x241f   : > { %10896 = vmatpush3.msk.msra.mxu0 %vm910_vm4, %v5690_v10  ;;  %v11396_v9 = vld [vmem:[#allocation8 + $0x1f8] sm:$0xff]  }
0x2420   : > { %11669 = vpow2.f32 %v5673_v44 }
0x242b   : > { %v11668_v58 = vpop.eup %11667 }
0x242c   : > { %v5680_v46 = vsel %vm884_vm5, %v11668_v58, 0.0 }
0x242d   : > { %v11670_v11 = vpop.eup %11669  ;;  %5681 = vadd.xlane.f32.xlu0 %v5680_v46 }
0x242e   : > { %v5677_v57 = vsel %vm880_vm6, %v11670_v11, 0.0 }
0x2431   : > { %5678 = vadd.xlane.f32.xlu0 %v5677_v57  ;;  %v11397_v57 = vld [vmem:[#allocation8 + $0x138] sm:$0xff]  }
0x2447   : > { %5687 = vrot.lane.b32.xlu0 %v12526_v52, %s11936_s18 }
0x2449   : > { %v5563_v12 = vpop.f32.mrf.mxu0 }
0x244a   : > { %v12845_v13 = vadd.f32 %v5563_v12, %v12811_v31  ;;  %v11359_v31 = vld [vmem:[#allocation7 + $0x1a0] ss:$16 sps:$4 sm:$0xff]   ;;  %v11398_v12 = vld [vmem:[#allocation8 + $0x1b8] sm:$0xff]  }
0x244b   : > { %v10886_v14 = vpop.f32.mrf.mxu0 }
0x244d   : > { %v5566_v15 = vpop.f32.mrf.mxu0 }
0x244e   : > { %v12848_v16 = vadd.f32 %v5566_v15, %v12816_v35  ;;  %v11373_v35 = vld [vmem:[#allocation7 + $0x164] ss:$16 sps:$4 sm:$0xff]  }
0x244f   : > { %v10887_v21 = vpop.f32.mrf.mxu0  ;;  %v11399_v15 = vld [vmem:[#allocation8 + $0x170] sm:$0xff]  }
0x2450   : > { %v11400_v21 = vld [vmem:[#allocation8 + $0x1f0] sm:$0xff]  }
0x24b6   : > { %v5682_v22 = vpop.xlane.xlu0 %5681 }
0x24b7   : > { %11671 = vrcp.f32 %v5682_v22  ;;  %v11401_v22 = vld [vmem:[#allocation8 + $0x130] sm:$0xff]  }
0x24ba   : > { %v5679_v23 = vpop.xlane.xlu0 %5678 }
0x24bb   : > { %11673 = vrcp.f32 %v5679_v23  ;;  %v11402_v23 = vld [vmem:[#allocation8 + $0x1b0] sm:$0xff]  }
0x24be   : > { %v5688_v42 = vpop.permute.xlu0 %5687 }
0x24bf   : > { %10897 = vmatprep.subr.mxu0 %v5688_v42 }
0x24c0   : > { %10898 = vmatpush3.msra.mxu0 %v5688_v42  ;;  %v11404_v42 = vld [vmem:[#allocation8 + $0x1e8] sm:$0xff]  }
0x24c1   : > { %6048 = vmatprep.subr.bf16.mxu0 %v11349_v54  ;;  %v11412_v54 = vld [vmem:[#allocation8 + $0x1d8] sm:$0xff]  }
0x24c4   : > { %v11672_v24 = vpop.eup %11671 }
0x24c5   : > { %v5686_v26 = vmul.f32 %v11672_v24, %v11668_v58  ;;  %v11406_v24 = vld [vmem:[#allocation8 + $0x1a8] sm:$0xff]  }
0x24c8   : > { %v11674_v25 = vpop.eup %11673 }
0x24c9   : > { %v5685_v52 = vmul.f32 %v11674_v25, %v11670_v11  ;;  %v11407_v25 = vld [vmem:[#allocation8 + $0x160] sm:$0xff]  }
0x24cb   : > { %10899 = vmatprep.mubr.msk.f32.mxu0 %vm880_vm6, %v5685_v52  ;;  %v11408_v52 = vld [vmem:[#allocation8 + $0x1e0] sm:$0xff]  }
0x24cc   : > { %10900 = vmatmul.mubr.msk.f32.vlgmr.msra.gmra.mxu0 %vm880_vm6, %v5686_v26  ;;  %v11409_v26 = vld [vmem:[#allocation8 + $0x120] sm:$0xff]  }
0x24cd   : > { %6080 = vmatprep.mubr.bf16.mxu0 %v11929_v32  ;;  %6049 = vmatpush1.bf16.msra.mxu0 %v11347_v28  ;;  %v11411_v28 = vld [vmem:[#allocation8 + $0x158] sm:$0xff]  }
0x24ce   : > { %6050 = vmatprep.subr.bf16.mxu0 %v11355_v50  ;;  %v11414_v50 = vld [vmem:[#allocation8 + $0x198] sm:$0xff]  }
0x24d1   : > { %6051 = vmatpush1.bf16.msra.mxu0 %v11353_v51  ;;  %v11415_v51 = vld [vmem:[#allocation8 + $0x150] sm:$0xff]  }
0x24d2   : > { %6052 = vmatprep.subr.bf16.mxu0 %v11361_v30  ;;  %v11416_v30 = vld [vmem:[#allocation8 + $0x1d0] sm:$0xff]  }
0x24d5   : > { %6053 = vmatpush1.bf16.msra.mxu0 %v11359_v31  ;;  %v11417_v31 = vld [vmem:[#allocation8 + $0x110] sm:$0xff]  }
0x24d6   : > { %6054 = vmatprep.subr.bf16.mxu0 %v11367_v33  ;;  %v11418_v33 = vld [vmem:[#allocation8 + $0x190] sm:$0xff]  }
0x24d9   : > { %6055 = vmatpush1.bf16.msra.mxu0 %v11365_v34  ;;  %v11419_v34 = vld [vmem:[#allocation8 + $0x148] sm:$0xff]  }
0x24da   : > { %6056 = vmatprep.subr.bf16.mxu0 %v11373_v35  ;;  %v11420_v35 = vld [vmem:[#allocation8 + $0x1c8] sm:$0xff]  }
0x24dd   : > { %6057 = vmatpush1.bf16.msra.mxu0 %v11371_v36  ;;  %v11421_v36 = vld [vmem:[#allocation8 + $0x108] sm:$0xff]  }
0x24de   : > { %6058 = vmatprep.subr.bf16.mxu0 %v11379_v37  ;;  %v11422_v37 = vld [vmem:[#allocation8 + $0x188] sm:$0xff]  }
0x24e1   : > { %6059 = vmatpush1.bf16.msra.mxu0 %v11377_v45  ;;  %v11423_v45 = vld [vmem:[#allocation8 + $0x140] sm:$0xff]  }
0x24e2   : > { %6060 = vmatprep.subr.bf16.mxu0 %v11385_v1 }
0x24e5   : > { %6061 = vmatpush1.bf16.msra.mxu0 %v11383_v43 }
0x24e6   : > { %6062 = vmatprep.subr.bf16.mxu0 %v11391_v4 }
0x24e9   : > { %6063 = vmatpush1.bf16.msra.mxu0 %v11389_v6 }
0x24ea   : > { %10361 = vmatprep.subr.bf16.mxu0 %v11395_v8 }
0x258c   : > { %v10901_v53 = vpop.f32.mrf.mxu0 }
0x258e   : > { %v5766_v40 = vpop.f32.mrf.mxu0 }
0x258f   : > { %v5775_v47 = vpack.c.bf16 %v10901_v53, %v5766_v40  ;;  %v11424_v53 = vld [vmem:[#allocation8 + $0x1c0] sm:$0xff]  }
0x2590   : > { %v11425_v40 = vld [vmem:[#allocation8 + $0x100] sm:$0xff]  }
0x2591   : > { %10905 = vmatmul.mubr.msk.bf16.vlgmr.msra.gmra.mxu1 %vm792_vm3, %v5775_v47  ;;  %v11429_v47 = vld [vmem:[#allocation2 + $0x22c] ss:$12 sps:$4 sm:$0xff]  }
0x2592   : > { %6092 = vmatpush1.bf16.msra.mxu1 %v11350_v55  ;;  %6123 = vmatprep.mubr.bf16.mxu1 %v11929_v32  ;;  %v11426_v55 = vld [vmem:[#allocation8 + $0x180] sm:$0xff]  }
0x2593   : > { %6093 = vmatprep.subr.bf16.mxu1 %v11358_v38  ;;  %v9899_v38 = vld [vmem:[%s13302_s6 + $0x4] sm:$0xf] }
0x2596   : > { %6094 = vmatpush1.bf16.msra.mxu1 %v11356_v49 }
0x2597   : > { %6095 = vmatprep.subr.bf16.mxu1 %v11364_v39 }
0x259a   : > { %6096 = vmatpush1.bf16.msra.mxu1 %v11362_v41  ;;  %v5875_v41 = vrot.slane %v9899_v38, %v12488_v17 }
0x259b   : > { %6097 = vmatprep.subr.bf16.mxu1 %v11370_v56  ;;  %v5883_v56 = vrot.slane %v9899_v38, %v12490_v18 }
0x259e   : > { %6098 = vmatpush1.bf16.msra.mxu1 %v11368_v59  ;;  %v5871_v59 = vrot.slane %v9899_v38, %v12492_v19 }
0x259f   : > { %6099 = vmatprep.subr.bf16.mxu1 %v11376_v60  ;;  %v5879_v60 = vrot.slane %v9899_v38, %v12494_v20 }
0x25a2   : > { %6100 = vmatpush1.bf16.msra.mxu1 %v11374_v61 }
0x25a3   : > { %6101 = vmatprep.subr.bf16.mxu1 %v11382_v62 }
0x25a6   : > { %6102 = vmatpush1.bf16.msra.mxu1 %v11380_v63 }
0x25a7   : > { %6103 = vmatprep.subr.bf16.mxu1 %v11388_v2 }
0x25aa   : > { %6104 = vmatpush1.bf16.msra.mxu1 %v11386_v3 }
0x25ab   : > { %6105 = vmatprep.subr.bf16.mxu1 %v11394_v5 }
0x25ae   : > { %6106 = vmatpush1.bf16.msra.mxu1 %v11392_v7 }
0x25af   : > { %10383 = vmatprep.subr.bf16.mxu1 %v11396_v9 }
0x2651   : > { %v5822_v48 = vpop.f32.mrf.mxu1 }
0x2652   : > { %v12856_v58 = vadd.f32 %v5822_v48, %v12845_v13  ;;  %v11403_v13 = vld [vmem:[#allocation8 + $0x168] sm:$0xff]  }
0x2653   : > { %v10906_v10 = vpop.f32.mrf.mxu1 }
0x2655   : > { %v5825_v44 = vpop.f32.mrf.mxu1 }
0x2656   : > { %v12859_v46 = vadd.f32 %v5825_v44, %v12848_v16  ;;  %v11405_v16 = vld [vmem:[#allocation8 + $0x128] sm:$0xff]  }
0x2657   : > { %v10907_v11 = vpop.f32.mrf.mxu1 }
0x2658   : > { %v5831_v14 = vpack.c.bf16 %v12859_v46, %v12856_v58 }
0x265a   : > { %6081 = vmatmul.mubr.bf16.vlgmr.msra.gmra.mxu0 %v5831_v14  ;;  %6124 = vmatmul.mubr.bf16.vlgmr.msra.gmra.mxu1 %v5831_v14 }
0x265b   : > { %10362 = vmatpush3.bf16.msra.mxu0 %v11397_v57  ;;  %10384 = vmatpush3.bf16.msra.mxu1 %v11398_v12 }
0x265c   : > { %10363 = vmatprep.subr.bf16.mxu0 %v11399_v15  ;;  %10385 = vmatprep.subr.bf16.mxu1 %v11400_v21 }
0x265f   : > { %10364 = vmatpush3.bf16.msra.mxu0 %v11401_v22  ;;  %10386 = vmatpush3.bf16.msra.mxu1 %v11402_v23 }
0x2660   : > { %10365 = vmatprep.subr.bf16.mxu0 %v11403_v13  ;;  %10387 = vmatprep.subr.bf16.mxu1 %v11404_v42  ;;  %v11427_v13 = vld [vmem:[#allocation2 + $0x228] ss:$12 sps:$4 sm:$0xff]   ;;  %v11430_v42 = vld [vmem:[#allocation2 + $0x230] ss:$12 sps:$4 sm:$0xff]  }
0x2663   : > { %10366 = vmatpush3.bf16.msra.mxu0 %v11405_v16  ;;  %10388 = vmatpush3.bf16.msra.mxu1 %v11406_v24 }
0x2664   : > { %10367 = vmatprep.subr.bf16.mxu0 %v11407_v25  ;;  %10389 = vmatprep.subr.bf16.mxu1 %v11408_v52  ;;  %v11433_v25 = vld [vmem:[#allocation2 + $0x214] ss:$12 sps:$4 sm:$0xff]   ;;  %v11431_v52 = vld [vmem:[#allocation2 + $0x210] ss:$12 sps:$4 sm:$0xff]  }
0x2667   : > { %10368 = vmatpush3.bf16.msra.mxu0 %v11409_v26  ;;  %10390 = vmatpush3.bf16.msra.mxu1 %v11410_v27  ;;  %v11434_v26 = vld [vmem:[#allocation2 + $0x218] ss:$12 sps:$4 sm:$0xff]   ;;  %v11437_v27 = vld [vmem:[#allocation2 + $0x1fc] ss:$12 sps:$4 sm:$0xff]  }
0x2668   : > { %10369 = vmatprep.subr.bf16.mxu0 %v11411_v28  ;;  %10391 = vmatprep.subr.bf16.mxu1 %v11412_v54  ;;  %v11435_v28 = vld [vmem:[#allocation2 + $0x1f8] ss:$12 sps:$4 sm:$0xff]   ;;  %v11438_v54 = vld [vmem:[#allocation2 + $0x200] ss:$12 sps:$4 sm:$0xff]  }
0x266b   : > { %10370 = vmatpush3.bf16.msra.mxu0 %v11413_v29  ;;  %10392 = vmatpush3.bf16.msra.mxu1 %v11414_v50  ;;  %v11441_v29 = vld [vmem:[#allocation2 + $0x1e4] ss:$12 sps:$4 sm:$0xff]   ;;  %v11439_v50 = vld [vmem:[#allocation2 + $0x1e0] ss:$12 sps:$4 sm:$0xff]  }
0x266c   : > { %10371 = vmatprep.subr.bf16.mxu0 %v11415_v51  ;;  %10393 = vmatprep.subr.bf16.mxu1 %v11416_v30  ;;  %v11442_v51 = vld [vmem:[#allocation2 + $0x1e8] ss:$12 sps:$4 sm:$0xff]   ;;  %v11445_v30 = vld [vmem:[#allocation2 + $0x1cc] ss:$12 sps:$4 sm:$0xff]  }
0x266f   : > { %10372 = vmatpush3.bf16.msra.mxu0 %v11417_v31  ;;  %10394 = vmatpush3.bf16.msra.mxu1 %v11418_v33  ;;  %v11443_v31 = vld [vmem:[#allocation2 + $0x1c8] ss:$12 sps:$4 sm:$0xff]   ;;  %v11446_v33 = vld [vmem:[#allocation2 + $0x1d0] ss:$12 sps:$4 sm:$0xff]  }
0x2670   : > { %10373 = vmatprep.subr.bf16.mxu0 %v11419_v34  ;;  %10395 = vmatprep.subr.bf16.mxu1 %v11420_v35  ;;  %v11449_v34 = vld [vmem:[#allocation2 + $0x1b4] ss:$12 sps:$4 sm:$0xff]   ;;  %v11447_v35 = vld [vmem:[#allocation2 + $0x1b0] ss:$12 sps:$4 sm:$0xff]  }
0x2673   : > { %10374 = vmatpush3.bf16.msra.mxu0 %v11421_v36  ;;  %10396 = vmatpush3.bf16.msra.mxu1 %v11422_v37  ;;  %v11450_v36 = vld [vmem:[#allocation2 + $0x1b8] ss:$12 sps:$4 sm:$0xff]   ;;  %v11453_v37 = vld [vmem:[#allocation2 + $0x19c] ss:$12 sps:$4 sm:$0xff]  }
0x2674   : > { %10375 = vmatprep.subr.bf16.mxu0 %v11423_v45  ;;  %10397 = vmatprep.subr.bf16.mxu1 %v11424_v53  ;;  %v11451_v45 = vld [vmem:[#allocation2 + $0x198] ss:$12 sps:$4 sm:$0xff]   ;;  %v11454_v53 = vld [vmem:[#allocation2 + $0x1a0] ss:$12 sps:$4 sm:$0xff]  }
0x2677   : > { %10376 = vmatpush3.bf16.msra.mxu0 %v11425_v40  ;;  %10398 = vmatpush3.bf16.msra.mxu1 %v11426_v55  ;;  %v11457_v40 = vld [vmem:[#allocation2 + $0x184] ss:$12 sps:$4 sm:$0xff]   ;;  %v11455_v55 = vld [vmem:[#allocation2 + $0x180] ss:$12 sps:$4 sm:$0xff]  }
0x2678   : > { %10908 = vmatprep.subr.bf16.mxu1 %v11927_v0  ;;  %6659 = vmatprep.subr.bf16.mxu0 %v11429_v47  ;;  %v11458_v47 = vld [vmem:[#allocation2 + $0x188] ss:$12 sps:$4 sm:$0xff]  }
0x271a   : > { %v6082_v49 = vpop.f32.mrf.mxu0  ;;  %v6125_v39 = vpop.f32.mrf.mxu1 }
0x271b   : > { %v6083_v5 = vadd.f32 %v6082_v49, %v5871_v59  ;;  %v6126_v6 = vadd.f32 %v6125_v39, %v5879_v60 }
0x271c   : > { %v6084_v61 = vpop.f32.mrf.mxu0  ;;  %v6127_v62 = vpop.f32.mrf.mxu1 }
0x271d   : > { %v6085_v2 = vadd.f32 %v6084_v61, %v5875_v41  ;;  %v6128_v43 = vadd.f32 %v6127_v62, %v5883_v56  ;;  %v6134_v15 = vmax.f32 %v6083_v5, 0.0  ;;  %v6136_v21 = vmax.f32 %v6126_v6, 0.0  ;;  %v9965_v5 = vld [vmem:[%s13304_s8 + $0x1] ss:$0 sm:$0xff] }
0x271e   : > { %v6086_v63 = vpop.f32.mrf.mxu0  ;;  %v6129_v1 = vpop.f32.mrf.mxu1 }
0x271f   : > { %v6087_v3 = vadd.f32 %v6086_v63, %v5871_v59  ;;  %v6130_v4 = vadd.f32 %v6129_v1, %v5879_v60  ;;  %v6135_v11 = vmax.f32 %v6085_v2, 0.0  ;;  %v6137_v57 = vmax.f32 %v6128_v43, 0.0 }
0x2720   : > { %v6088_v7 = vpop.f32.mrf.mxu0  ;;  %v6131_v8 = vpop.f32.mrf.mxu1 }
0x2721   : > { %v6089_v9 = vadd.f32 %v6088_v7, %v5875_v41  ;;  %v6132_v48 = vadd.f32 %v6131_v8, %v5883_v56  ;;  %v6138_v10 = vmax.f32 %v6087_v3, 0.0  ;;  %v6140_v44 = vmax.f32 %v6130_v4, 0.0 }
0x2723   : > { %v6139_v12 = vmax.f32 %v6089_v9, 0.0  ;;  %v6141_v14 = vmax.f32 %v6132_v48, 0.0  ;;  %v6142_v16 = vpack.c.bf16 %v6138_v10, %v6134_v15  ;;  %v6144_v24 = vpack.c.bf16 %v6140_v44, %v6136_v21  ;;  %v12931_v21 = vld [vmem:[%s13305_s9] sm:$0xff] }
0x2725   : > { %v6143_v22 = vpack.c.bf16 %v6139_v12, %v6135_v11  ;;  %v6145_v23 = vpack.c.bf16 %v6141_v14, %v6137_v57  ;;  %v6744_v14 = vld [vmem:[%s13305_s9 + $0x8] sm:$0x3] }
0x2727   : > { %6435 = vmatprep.mubr.bf16.mxu0 %v6143_v22  ;;  %6476 = vmatprep.mubr.bf16.mxu1 %v6145_v23 }
0x2728   : > { %6436 = vmatmul.mubr.bf16.vlgmr.msra.gmra.mxu0 %v6142_v16  ;;  %6477 = vmatmul.mubr.bf16.vlgmr.msra.gmra.mxu1 %v6144_v24 }
0x2729   : > { %6660 = vmatpush1.bf16.msra.mxu0 %v11427_v13  ;;  %10909 = vmatpush3.bf16.msra.mxu1 %v11430_v42 }
0x272a   : > { %6661 = vmatprep.subr.bf16.mxu0 %v11433_v25  ;;  %10910 = vmatprep.subr.bf16.mxu1 %v11927_v0 }
0x272b   : > { %6691 = vmatprep.mubr.bf16.mxu0 %v11929_v32  ;;  %10924 = vmatprep.mubr.msk.bf16.mxu1 %vm11928_vm0, %v11927_v0 }
0x272d   : > { %6662 = vmatpush1.bf16.msra.mxu0 %v11431_v52  ;;  %10911 = vmatpush3.bf16.msra.mxu1 %v11434_v26 }
0x272e   : > { %6663 = vmatprep.subr.bf16.mxu0 %v11437_v27  ;;  %10912 = vmatprep.subr.bf16.mxu1 %v11927_v0 }
0x2731   : > { %6664 = vmatpush1.bf16.msra.mxu0 %v11435_v28  ;;  %10913 = vmatpush3.bf16.msra.mxu1 %v11438_v54 }
0x2732   : > { %6665 = vmatprep.subr.bf16.mxu0 %v11441_v29  ;;  %10914 = vmatprep.subr.bf16.mxu1 %v11927_v0 }
0x2735   : > { %6666 = vmatpush1.bf16.msra.mxu0 %v11439_v50  ;;  %10915 = vmatpush3.bf16.msra.mxu1 %v11442_v51 }
0x2736   : > { %10916 = vmatprep.subr.bf16.mxu1 %v11927_v0  ;;  %6667 = vmatprep.subr.bf16.mxu0 %v11445_v30 }
0x2739   : > { %6668 = vmatpush1.bf16.msra.mxu0 %v11443_v31  ;;  %10917 = vmatpush3.bf16.msra.mxu1 %v11446_v33 }
0x273a   : > { %10918 = vmatprep.subr.bf16.mxu1 %v11927_v0  ;;  %6669 = vmatprep.subr.bf16.mxu0 %v11449_v34 }
0x273d   : > { %6670 = vmatpush1.bf16.msra.mxu0 %v11447_v35  ;;  %10919 = vmatpush3.bf16.msra.mxu1 %v11450_v36 }
0x273e   : > { %10920 = vmatprep.subr.bf16.mxu1 %v11927_v0  ;;  %6671 = vmatprep.subr.bf16.mxu0 %v11453_v37 }
0x2741   : > { %6672 = vmatpush1.bf16.msra.mxu0 %v11451_v45  ;;  %10921 = vmatpush3.bf16.msra.mxu1 %v11454_v53 }
0x2742   : > { %10922 = vmatprep.subr.bf16.mxu1 %v11927_v0  ;;  %6673 = vmatprep.subr.bf16.mxu0 %v11457_v40 }
0x2745   : > { %6674 = vmatpush1.bf16.msra.mxu0 %v11455_v55  ;;  %10923 = vmatpush3.bf16.msra.mxu1 %v11458_v47  ;;  %v11459_v55 = vld [vmem:[#allocation5 + $0x80] sm:$0xff]  }
0x27e8   : > { %v10377_v38 = vpop.f32.mrf.mxu0  ;;  %v10399_v49 = vpop.f32.mrf.mxu1 }
0x27ea   : > { %v10378_v39 = vpop.f32.mrf.mxu0  ;;  %v10400_v41 = vpop.f32.mrf.mxu1 }
0x27eb   : > { %v10379_v56 = vadd.f32 %v10378_v39, %v10377_v38  ;;  %v10401_v59 = vadd.f32 %v10400_v41, %v10399_v49  ;;  %v6995_v39 = vld [vmem:[%s13305_s9 + $0x8] sm:$0x3] }
0x27ec   : > { %v10380_v60 = vpop.f32.mrf.mxu0  ;;  %v10402_v61 = vpop.f32.mrf.mxu1 }
0x27ed   : > { %v6479_v62 = vadd.f32 %v10401_v59, %v10379_v56 }
0x27ee   : > { %v10381_v63 = vpop.f32.mrf.mxu0  ;;  %v10403_v1 = vpop.f32.mrf.mxu1 }
0x27ef   : > { %v10382_v2 = vadd.f32 %v10381_v63, %v10380_v60  ;;  %v10404_v43 = vadd.f32 %v10403_v1, %v10402_v61  ;;  %v6485_v3 = vadd.f32 %v6479_v62, %v12856_v58 }
0x27f1   : > { %v6482_v4 = vadd.f32 %v10404_v43, %v10382_v2  ;;  %v12886_v7 = vadd.f32 %v9965_v5, %v6485_v3 }
0x27f3   : > { %v6486_v6 = vadd.f32 %v6482_v4, %v12859_v46 }
0x27f5   : > { %v12888_v8 = vadd.f32 %v9965_v5, %v6486_v6 }
0x27f7   : > { %v6497_v9 = vpack.c.bf16 %v12888_v8, %v12886_v7 }
0x27f9   : > { %6692 = vmatmul.mubr.bf16.vlgmr.msra.gmra.mxu0 %v6497_v9  ;;  %10925 = vmatmul.mubr.bf16.vlgmr.msra.gmra.mxu1 %v6497_v9 }
0x28b9   : > { %v12892_v48 = vpop.f32.mrf.mxu0  ;;  %v12894_v10 = vpop.f32.mrf.mxu1 }
0x28ba   : > { %10932 = vmatprep.mubr.msk.f32.mxu0 %vm792_vm3, %v12892_v48 }
0x28bb   : > { %v12898_v58 = vpop.f32.mrf.mxu0  ;;  %v10926_v44 = vpop.f32.mrf.mxu1 }
0x28bd   : > { %v12900_v46 = vpop.f32.mrf.mxu0  ;;  %v12902_v11 = vpop.f32.mrf.mxu1 }
0x28be   : > { %10935 = vmatprep.subr.msk.mxu1 %vm910_vm4, %v12902_v11 }
0x28bf   : > { %v12906_v57 = vpop.f32.mrf.mxu0  ;;  %v10927_v12 = vpop.f32.mrf.mxu1  ;;  %10936 = vmatpush3.msk.msra.mxu1 %vm910_vm4, %v12902_v11 }
0x28c0   : > { %10928 = vmatprep.subr.msk.mxu0 %vm792_vm3, %v12906_v57  ;;  %10937 = vmatprep.subr.mxu1 %v12894_v10 }
0x28c1   : > { %10929 = vmatpush3.xpose.msk.msra.mxu0 %vm792_vm3, %v12906_v57  ;;  %10938 = vmatpush3.msra.mxu1 %v12894_v10 }
0x28c2   : > { %10930 = vmatprep.subr.msk.mxu0 %vm792_vm3, %v12898_v58 }
0x28c5   : > { %10931 = vmatpush3.xpose.msk.msra.mxu0 %vm792_vm3, %v12898_v58 }
0x28c6   : > { %10942 = vmatprep.subr.bf16.mxu0 %v11927_v0 }
0x28c8   : > { %10933 = vmatmul.mubr.msk.f32.vlgmr.msra.gmra.mxu0 %vm792_vm3, %v12900_v46 }
0x28c9   : > { %10944 = vmatprep.mubr.msk.bf16.mxu0 %vm11928_vm0, %v11927_v0  ;;  %10943 = vmatpush3.bf16.msra.mxu0 %v11459_v55 }
0x2988   : > { %v10934_v15 = vpop.f32.mrf.mxu0 }
0x2989   : > { %v6829_v22 = vadd.f32 %v10934_v15, %v6744_v14 }
0x298a   : > { %v6823_v23 = vpop.f32.mrf.mxu0 }
0x298b   : > { %v6824_v13 = vadd.f32 %v6823_v23, %v12931_v21  ;;  %v6835_v42 = vsel %vm884_vm5, %v6829_v22, -inf }
0x298c   : > { %6836 = vmax.xlane.f32.xlu0 %v6835_v42 }
0x298d   : > { %v6832_v16 = vsel %vm880_vm6, %v6824_v13, -inf }
0x298e   : > { %6833 = vmax.xlane.f32.xlu1 %v6832_v16 }
0x299f   : > { %7002 = vrot.lane.b32.xlu1 %v12906_v57, %s11930_s29 }
0x29a3   : > { %6996 = vrot.lane.b32.xlu1 %v12892_v48, %s11930_s29 }
0x2a15   : > { %v6837_v24 = vpop.xlane.xlu0 %6836 }
0x2a16   : > { %v6839_v25 = vsub.f32 %v6829_v22, %v6837_v24 }
0x2a17   : > { %v6834_v52 = vpop.xlane.xlu1 %6833 }
0x2a18   : > { %v6842_v26 = vmul.f32 1.442695, %v6839_v25  ;;  %v6838_v27 = vsub.f32 %v6824_v13, %v6834_v52 }
0x2a1a   : > { %11675 = vpow2.f32 %v6842_v26  ;;  %v6840_v28 = vmul.f32 1.442695, %v6838_v27 }
0x2a1b   : > { %v7003_v54 = vpop.permute.xlu1 %7002 }
0x2a1c   : > { %11677 = vpow2.f32 %v6840_v28  ;;  %10948 = vmatprep.subr.msk.mxu1 %vm792_vm3, %v7003_v54 }
0x2a1f   : > { %v6997_v31 = vpop.permute.xlu1 %6996 }
0x2a27   : > { %v11676_v29 = vpop.eup %11675 }
0x2a28   : > { %v6847_v50 = vsel %vm884_vm5, %v11676_v29, 0.0 }
0x2a29   : > { %v11678_v51 = vpop.eup %11677  ;;  %6848 = vadd.xlane.f32.xlu0 %v6847_v50  ;;  %v11460_v50 = vld [vmem:[#allocation5 + $0x88] sm:$0xff]  }
0x2a2a   : > { %v6844_v30 = vsel %vm880_vm6, %v11678_v51, 0.0 }
0x2a2b   : > { %6845 = vadd.xlane.f32.xlu1 %v6844_v30 }
0x2a3c   : > { %6998 = vrot.lane.b32.xlu1 %v12900_v46, %s11930_s29 }
0x2a3f   : > { %7000 = vrot.lane.b32.xlu0 %v12898_v58, %s11930_s29 }
0x2ab2   : > { %v6849_v33 = vpop.xlane.xlu0 %6848 }
0x2ab3   : > { %11679 = vrcp.f32 %v6849_v33  ;;  %v7255_v33 = vld [vmem:[%s13305_s9 + $0x8] sm:$0x3] }
0x2ab4   : > { %v6846_v34 = vpop.xlane.xlu1 %6845 }
0x2ab5   : > { %11681 = vrcp.f32 %v6846_v34 }
0x2ab6   : > { %v7001_v53 = vpop.permute.xlu0 %7000 }
0x2ab8   : > { %v6999_v40 = vpop.permute.xlu1 %6998 }
0x2ac0   : > { %v11680_v35 = vpop.eup %11679 }
0x2ac1   : > { %v6853_v45 = vmul.f32 %v11680_v35, %v11676_v29 }
0x2ac2   : > { %v11682_v36 = vpop.eup %11681 }
0x2ac3   : > { %v6852_v37 = vmul.f32 %v11682_v36, %v11678_v51 }
0x2ac5   : > { %10939 = vmatprep.mubr.msk.f32.mxu1 %vm880_vm6, %v6852_v37 }
0x2ac6   : > { %10940 = vmatmul.mubr.msk.f32.vlgmr.msra.gmra.mxu1 %vm880_vm6, %v6853_v45 }
0x2ac7   : > { %10949 = vmatpush3.xpose.msk.msra.mxu1 %vm792_vm3, %v7003_v54  ;;  %10952 = vmatprep.mubr.msk.f32.mxu1 %vm792_vm3, %v6997_v31 }
0x2ac8   : > { %10950 = vmatprep.subr.msk.mxu1 %vm792_vm3, %v7001_v53 }
0x2acb   : > { %10951 = vmatpush3.xpose.msk.msra.mxu1 %vm792_vm3, %v7001_v53 }
0x2acc   : > { %10962 = vmatprep.subr.bf16.mxu1 %v11927_v0 }
0x2ace   : > { %10953 = vmatmul.mubr.msk.f32.vlgmr.msra.gmra.mxu1 %vm792_vm3, %v6999_v40 }
0x2acf   : > { %10964 = vmatprep.mubr.msk.bf16.mxu1 %vm11928_vm0, %v11927_v0  ;;  %10963 = vmatpush3.bf16.msra.mxu1 %v11460_v50 }
0x2b86   : > { %v10941_v47 = vpop.f32.mrf.mxu1 }
0x2b88   : > { %v6929_v38 = vpop.f32.mrf.mxu1 }
0x2b89   : > { %v6938_v49 = vpack.c.bf16 %v10941_v47, %v6929_v38 }
0x2b8b   : > { %10945 = vmatmul.mubr.msk.bf16.vlgmr.msra.gmra.mxu0 %vm792_vm3, %v6938_v49 }
0x2b8e   : > { %v10954_v41 = vpop.f32.mrf.mxu1 }
0x2b8f   : > { %v7084_v56 = vadd.f32 %v10954_v41, %v6995_v39 }
0x2b90   : > { %v7078_v59 = vpop.f32.mrf.mxu1 }
0x2b91   : > { %v7079_v60 = vadd.f32 %v7078_v59, %v12931_v21  ;;  %v7090_v61 = vsel %vm884_vm5, %v7084_v56, -inf }
0x2b92   : > { %7091 = vmax.xlane.f32.xlu1 %v7090_v61 }
0x2b93   : > { %v7087_v62 = vsel %vm880_vm6, %v7079_v60, -inf }
0x2b94   : > { %7088 = vmax.xlane.f32.xlu0 %v7087_v62 }
0x2ba3   : > { %7112 = vrot.lane.b32.xlu1 %v12902_v11, %s11930_s29 }
0x2ba7   : > { %7262 = vrot.lane.b32.xlu1 %v12906_v57, %s11931_s14 }
0x2bab   : > { %7260 = vrot.lane.b32.xlu1 %v12898_v58, %s11931_s14 }
0x2baf   : > { %7258 = vrot.lane.b32.xlu1 %v12900_v46, %s11931_s14 }
0x2c1b   : > { %v7092_v63 = vpop.xlane.xlu1 %7091 }
0x2c1c   : > { %v7094_v1 = vsub.f32 %v7084_v56, %v7092_v63 }
0x2c1d   : > { %v7089_v2 = vpop.xlane.xlu0 %7088 }
0x2c1e   : > { %v7097_v43 = vmul.f32 1.442695, %v7094_v1  ;;  %v7093_v3 = vsub.f32 %v7079_v60, %v7089_v2 }
0x2c1f   : > { %v7113_v4 = vpop.permute.xlu1 %7112 }
0x2c20   : > { %11683 = vpow2.f32 %v7097_v43  ;;  %v7095_v5 = vmul.f32 1.442695, %v7093_v3  ;;  %10955 = vmatprep.subr.msk.mxu0 %vm910_vm4, %v7113_v4 }
0x2c21   : > { %10956 = vmatpush3.msk.msra.mxu0 %vm910_vm4, %v7113_v4 }
0x2c22   : > { %11685 = vpow2.f32 %v7095_v5 }
0x2c23   : > { %v7263_v24 = vpop.permute.xlu1 %7262 }
0x2c27   : > { %v7261_v54 = vpop.permute.xlu1 %7260 }
0x2c2b   : > { %v7259_v29 = vpop.permute.xlu1 %7258 }
0x2c2d   : > { %v11684_v6 = vpop.eup %11683 }
0x2c2e   : > { %v7102_v9 = vsel %vm884_vm5, %v11684_v6, 0.0 }
0x2c2f   : > { %v11686_v44 = vpop.eup %11685  ;;  %7103 = vadd.xlane.f32.xlu0 %v7102_v9 }
0x2c30   : > { %v7099_v12 = vsel %vm880_vm6, %v11686_v44, 0.0 }
0x2c33   : > { %7100 = vadd.xlane.f32.xlu0 %v7099_v12 }
0x2c49   : > { %7110 = vrot.lane.b32.xlu0 %v12894_v10, %s11930_s29 }
0x2c4b   : > { %v12978_v14 = vpop.f32.mrf.mxu0 }
0x2c4c   : > { %v6992_v62 = vadd.f32 %v12978_v14, %v12886_v7 }
0x2c4d   : > { %7256 = vrot.lane.b32.xlu0 %v12892_v48, %s11931_s14  ;;  %v10946_v15 = vpop.f32.mrf.mxu0 }
0x2c4f   : > { %v12982_v22 = vpop.f32.mrf.mxu0 }
0x2c50   : > { %v6993_v43 = vadd.f32 %v12982_v22, %v12888_v8 }
0x2c51   : > { %v10947_v23 = vpop.f32.mrf.mxu0 }
0x2cb8   : > { %v7104_v13 = vpop.xlane.xlu0 %7103 }
0x2cb9   : > { %11687 = vrcp.f32 %v7104_v13 }
0x2cbc   : > { %v7101_v42 = vpop.xlane.xlu0 %7100 }
0x2cbd   : > { %11689 = vrcp.f32 %v7101_v42  ;;  %v11461_v42 = vld [vmem:[#allocation5 + $0x90] sm:$0xff]  }
0x2cc0   : > { %v7111_v16 = vpop.permute.xlu0 %7110 }
0x2cc1   : > { %10957 = vmatprep.subr.mxu0 %v7111_v16 }
0x2cc2   : > { %10958 = vmatpush3.msra.mxu0 %v7111_v16 }
0x2cc3   : > { %10968 = vmatprep.subr.msk.mxu0 %vm792_vm3, %v7263_v24 }
0x2cc4   : > { %v7257_v28 = vpop.permute.xlu0 %7256 }
0x2cc6   : > { %v11688_v25 = vpop.eup %11687 }
0x2cc7   : > { %v7108_v27 = vmul.f32 %v11688_v25, %v11684_v6 }
0x2cca   : > { %v11690_v52 = vpop.eup %11689 }
0x2ccb   : > { %v7107_v26 = vmul.f32 %v11690_v52, %v11686_v44  ;;  %v7514_v52 = vld [vmem:[%s13305_s9 + $0x8] sm:$0x3] }
0x2ccd   : > { %10959 = vmatprep.mubr.msk.f32.mxu0 %vm880_vm6, %v7107_v26 }
0x2cce   : > { %10960 = vmatmul.mubr.msk.f32.vlgmr.msra.gmra.mxu0 %vm880_vm6, %v7108_v27 }
0x2ccf   : > { %10969 = vmatpush3.xpose.msk.msra.mxu0 %vm792_vm3, %v7263_v24  ;;  %10972 = vmatprep.mubr.msk.f32.mxu0 %vm792_vm3, %v7257_v28 }
0x2cd0   : > { %10970 = vmatprep.subr.msk.mxu0 %vm792_vm3, %v7261_v54 }
0x2cd3   : > { %10971 = vmatpush3.xpose.msk.msra.mxu0 %vm792_vm3, %v7261_v54 }
0x2cd4   : > { %10982 = vmatprep.subr.bf16.mxu0 %v11927_v0 }
0x2cd6   : > { %10973 = vmatmul.mubr.msk.f32.vlgmr.msra.gmra.mxu0 %vm792_vm3, %v7259_v29 }
0x2cd7   : > { %10984 = vmatprep.mubr.msk.bf16.mxu0 %vm11928_vm0, %v11927_v0  ;;  %10983 = vmatpush3.bf16.msra.mxu0 %v11461_v42 }
0x2d8e   : > { %v10961_v51 = vpop.f32.mrf.mxu0 }
0x2d90   : > { %v7189_v30 = vpop.f32.mrf.mxu0 }
0x2d91   : > { %v7198_v31 = vpack.c.bf16 %v10961_v51, %v7189_v30 }
0x2d93   : > { %10965 = vmatmul.mubr.msk.bf16.vlgmr.msra.gmra.mxu1 %vm792_vm3, %v7198_v31 }
0x2d96   : > { %v10974_v34 = vpop.f32.mrf.mxu0 }
0x2d97   : > { %v7344_v35 = vadd.f32 %v10974_v34, %v7255_v33 }
0x2d98   : > { %v7338_v36 = vpop.f32.mrf.mxu0 }
0x2d99   : > { %v7339_v37 = vadd.f32 %v7338_v36, %v12931_v21  ;;  %v7350_v45 = vsel %vm884_vm5, %v7344_v35, -inf }
0x2d9a   : > { %7351 = vmax.xlane.f32.xlu1 %v7350_v45 }
0x2d9b   : > { %v7347_v53 = vsel %vm880_vm6, %v7339_v37, -inf }
0x2d9c   : > { %7348 = vmax.xlane.f32.xlu0 %v7347_v53 }
0x2dab   : > { %7371 = vrot.lane.b32.xlu1 %v12902_v11, %s11931_s14 }
0x2daf   : > { %7521 = vrot.lane.b32.xlu1 %v12906_v57, %s11932_s16 }
0x2db3   : > { %7519 = vrot.lane.b32.xlu1 %v12898_v58, %s11932_s16 }
0x2db7   : > { %7517 = vrot.lane.b32.xlu1 %v12900_v46, %s11932_s16 }
0x2e23   : > { %v7352_v40 = vpop.xlane.xlu1 %7351 }
0x2e24   : > { %v7354_v55 = vsub.f32 %v7344_v35, %v7352_v40 }
0x2e25   : > { %v7349_v47 = vpop.xlane.xlu0 %7348 }
0x2e26   : > { %v7357_v38 = vmul.f32 1.442695, %v7354_v55  ;;  %v7353_v49 = vsub.f32 %v7339_v37, %v7349_v47 }
0x2e27   : > { %v7372_v39 = vpop.permute.xlu1 %7371 }
0x2e28   : > { %11691 = vpow2.f32 %v7357_v38  ;;  %v7355_v41 = vmul.f32 1.442695, %v7353_v49  ;;  %10975 = vmatprep.subr.msk.mxu1 %vm910_vm4, %v7372_v39 }
0x2e29   : > { %10976 = vmatpush3.msk.msra.mxu1 %vm910_vm4, %v7372_v39 }
0x2e2a   : > { %11693 = vpow2.f32 %v7355_v41 }
0x2e2b   : > { %v7522_v7 = vpop.permute.xlu1 %7521 }
0x2e2f   : > { %v7520_v22 = vpop.permute.xlu1 %7519 }
0x2e33   : > { %v7518_v13 = vpop.permute.xlu1 %7517 }
0x2e35   : > { %v11692_v56 = vpop.eup %11691 }
0x2e36   : > { %v7362_v59 = vsel %vm884_vm5, %v11692_v56, 0.0 }
0x2e37   : > { %v11694_v60 = vpop.eup %11693  ;;  %7363 = vadd.xlane.f32.xlu0 %v7362_v59 }
0x2e38   : > { %v7359_v61 = vsel %vm880_vm6, %v11694_v60, 0.0 }
0x2e3b   : > { %7360 = vadd.xlane.f32.xlu0 %v7359_v61 }
0x2e51   : > { %7369 = vrot.lane.b32.xlu0 %v12894_v10, %s11931_s14  ;;  %s464_s14 = scalar_lea.vmem [#allocation10], %s463_s26 }
0x2e52   : > { %s9528_s15 = sshll.u32 %s464_s14, 4  ;;  %s9529_s15 = int_to_ptr.vmem [resolvable:$true] %s9528_s15 }
0x2e53   : > { %v7245_v63 = vpop.f32.mrf.mxu1 }
0x2e54   : > { %v13018_v1 = vadd.f32 %v7245_v63, %v6992_v62 }
0x2e55   : > { %7515 = vrot.lane.b32.xlu0 %v12892_v48, %s11932_s16  ;;  %v10966_v2 = vpop.f32.mrf.mxu1 }
0x2e57   : > { %v7248_v3 = vpop.f32.mrf.mxu1 }
0x2e58   : > { %v13024_v4 = vadd.f32 %v7248_v3, %v6993_v43 }
0x2e59   : > { %v10967_v5 = vpop.f32.mrf.mxu1 }
0x2e5a   : > { %v11462_v5 = vld [vmem:[#allocation5 + $0x98] sm:$0xff]  }
0x2ec0   : > { %v7364_v6 = vpop.xlane.xlu0 %7363 }
0x2ec1   : > { %11695 = vrcp.f32 %v7364_v6 }
0x2ec4   : > { %v7361_v9 = vpop.xlane.xlu0 %7360 }
0x2ec5   : > { %11697 = vrcp.f32 %v7361_v9 }
0x2ec8   : > { %v7370_v44 = vpop.permute.xlu0 %7369 }
0x2ec9   : > { %10977 = vmatprep.subr.mxu1 %v7370_v44 }
0x2eca   : > { %10978 = vmatpush3.msra.mxu1 %v7370_v44 }
0x2ecb   : > { %10988 = vmatprep.subr.msk.mxu1 %vm792_vm3, %v7522_v7 }
0x2ecc   : > { %v7516_v8 = vpop.permute.xlu0 %7515 }
0x2ece   : > { %v11696_v12 = vpop.eup %11695 }
0x2ecf   : > { %v7368_v23 = vmul.f32 %v11696_v12, %v11692_v56 }
0x2ed2   : > { %v11698_v14 = vpop.eup %11697 }
0x2ed3   : > { %v7367_v15 = vmul.f32 %v11698_v14, %v11694_v60 }
0x2ed5   : > { %10979 = vmatprep.mubr.msk.f32.mxu1 %vm880_vm6, %v7367_v15 }
0x2ed6   : > { %10980 = vmatmul.mubr.msk.f32.vlgmr.msra.gmra.mxu1 %vm880_vm6, %v7368_v23 }
0x2ed7   : > { %10989 = vmatpush3.xpose.msk.msra.mxu1 %vm792_vm3, %v7522_v7  ;;  %10992 = vmatprep.mubr.msk.f32.mxu1 %vm792_vm3, %v7516_v8  ;;  %v7773_v7 = vld [vmem:[%s13305_s9 + $0x8] sm:$0x3] }
0x2ed8   : > { %10990 = vmatprep.subr.msk.mxu1 %vm792_vm3, %v7520_v22 }
0x2edb   : > { %10991 = vmatpush3.xpose.msk.msra.mxu1 %vm792_vm3, %v7520_v22 }
0x2edc   : > { %11002 = vmatprep.subr.bf16.mxu1 %v11927_v0 }
0x2ede   : > { %10993 = vmatmul.mubr.msk.f32.vlgmr.msra.gmra.mxu1 %vm792_vm3, %v7518_v13 }
0x2edf   : > { %11004 = vmatprep.mubr.msk.bf16.mxu1 %vm11928_vm0, %v11927_v0  ;;  %11003 = vmatpush3.bf16.msra.mxu1 %v11462_v5 }
0x2f96   : > { %v10981_v16 = vpop.f32.mrf.mxu1 }
0x2f98   : > { %v7448_v24 = vpop.f32.mrf.mxu1 }
0x2f99   : > { %v7457_v25 = vpack.c.bf16 %v10981_v16, %v7448_v24 }
0x2f9b   : > { %10985 = vmatmul.mubr.msk.bf16.vlgmr.msra.gmra.mxu0 %vm792_vm3, %v7457_v25 }
0x2f9e   : > { %v10994_v26 = vpop.f32.mrf.mxu1 }
0x2f9f   : > { %v7603_v27 = vadd.f32 %v10994_v26, %v7514_v52 }
0x2fa0   : > { %v7597_v28 = vpop.f32.mrf.mxu1 }
0x2fa1   : > { %v7598_v54 = vadd.f32 %v7597_v28, %v12931_v21  ;;  %v7609_v29 = vsel %vm884_vm5, %v7603_v27, -inf }
0x2fa2   : > { %7610 = vmax.xlane.f32.xlu1 %v7609_v29 }
0x2fa3   : > { %v7606_v50 = vsel %vm880_vm6, %v7598_v54, -inf }
0x2fa4   : > { %7607 = vmax.xlane.f32.xlu0 %v7606_v50 }
0x2fb3   : > { %7630 = vrot.lane.b32.xlu1 %v12902_v11, %s11932_s16 }
0x2fb7   : > { %7780 = vrot.lane.b32.xlu1 %v12906_v57, %s11933_s19 }
0x2fbb   : > { %7778 = vrot.lane.b32.xlu1 %v12898_v58, %s11933_s19 }
0x2fbf   : > { %7776 = vrot.lane.b32.xlu1 %v12900_v46, %s11933_s19 }
0x302b   : > { %v7611_v51 = vpop.xlane.xlu1 %7610 }
0x302c   : > { %v7613_v30 = vsub.f32 %v7603_v27, %v7611_v51 }
0x302d   : > { %v7608_v31 = vpop.xlane.xlu0 %7607 }
0x302e   : > { %v7616_v33 = vmul.f32 1.442695, %v7613_v30  ;;  %v7612_v34 = vsub.f32 %v7598_v54, %v7608_v31 }
0x302f   : > { %v7631_v35 = vpop.permute.xlu1 %7630 }
0x3030   : > { %11699 = vpow2.f32 %v7616_v33  ;;  %v7614_v36 = vmul.f32 1.442695, %v7612_v34  ;;  %10995 = vmatprep.subr.msk.mxu0 %vm910_vm4, %v7631_v35 }
0x3031   : > { %10996 = vmatpush3.msk.msra.mxu0 %vm910_vm4, %v7631_v35 }
0x3032   : > { %11701 = vpow2.f32 %v7614_v36 }
0x3033   : > { %v7781_v61 = vpop.permute.xlu1 %7780 }
0x3037   : > { %v7779_v3 = vpop.permute.xlu1 %7778 }
0x303d   : > { %v11700_v37 = vpop.eup %11699 }
0x303e   : > { %v7621_v45 = vsel %vm884_vm5, %v11700_v37, 0.0 }
0x303f   : > { %v11702_v53 = vpop.eup %11701  ;;  %7622 = vadd.xlane.f32.xlu0 %v7621_v45 }
0x3040   : > { %v7618_v40 = vsel %vm880_vm6, %v11702_v53, 0.0 }
0x3043   : > { %7619 = vadd.xlane.f32.xlu0 %v7618_v40 }
0x3059   : > { %7628 = vrot.lane.b32.xlu0 %v12894_v10, %s11932_s16 }
0x305b   : > { %v7504_v55 = vpop.f32.mrf.mxu0 }
0x305c   : > { %v13059_v47 = vadd.f32 %v7504_v55, %v13018_v1 }
0x305d   : > { %7774 = vrot.lane.b32.xlu0 %v12892_v48, %s11933_s19  ;;  %v10986_v38 = vpop.f32.mrf.mxu0 }
0x305f   : > { %v7507_v49 = vpop.f32.mrf.mxu0 }
0x3060   : > { %v13064_v39 = vadd.f32 %v7507_v49, %v13024_v4  ;;  %v7777_v4 = vpop.permute.xlu1 %7776 }
0x3061   : > { %v10987_v41 = vpop.f32.mrf.mxu0 }
0x3062   : > { %v11463_v41 = vld [vmem:[#allocation5 + $0xa0] sm:$0xff]  }
0x30c8   : > { %v7623_v56 = vpop.xlane.xlu0 %7622 }
0x30c9   : > { %11703 = vrcp.f32 %v7623_v56 }
0x30cc   : > { %v7620_v59 = vpop.xlane.xlu0 %7619 }
0x30cd   : > { %11705 = vrcp.f32 %v7620_v59 }
0x30d0   : > { %v7629_v60 = vpop.permute.xlu0 %7628 }
0x30d1   : > { %10997 = vmatprep.subr.mxu0 %v7629_v60 }
0x30d2   : > { %10998 = vmatpush3.msra.mxu0 %v7629_v60 }
0x30d3   : > { %11008 = vmatprep.subr.msk.mxu0 %vm792_vm3, %v7781_v61 }
0x30d4   : > { %v7775_v43 = vpop.permute.xlu0 %7774 }
0x30d6   : > { %v11704_v62 = vpop.eup %11703 }
0x30d7   : > { %v7627_v2 = vmul.f32 %v11704_v62, %v11700_v37 }
0x30da   : > { %v11706_v63 = vpop.eup %11705 }
0x30db   : > { %v7626_v1 = vmul.f32 %v11706_v63, %v11702_v53 }
0x30dd   : > { %10999 = vmatprep.mubr.msk.f32.mxu0 %vm880_vm6, %v7626_v1 }
0x30de   : > { %11000 = vmatmul.mubr.msk.f32.vlgmr.msra.gmra.mxu0 %vm880_vm6, %v7627_v2 }
0x30df   : > { %11009 = vmatpush3.xpose.msk.msra.mxu0 %vm792_vm3, %v7781_v61  ;;  %11012 = vmatprep.mubr.msk.f32.mxu0 %vm792_vm3, %v7775_v43  ;;  %v8032_v61 = vld [vmem:[%s13305_s9 + $0x8] sm:$0x3] }
0x30e0   : > { %11010 = vmatprep.subr.msk.mxu0 %vm792_vm3, %v7779_v3 }
0x30e3   : > { %11011 = vmatpush3.xpose.msk.msra.mxu0 %vm792_vm3, %v7779_v3 }
0x30e4   : > { %11022 = vmatprep.subr.bf16.mxu0 %v11927_v0 }
0x30e6   : > { %11013 = vmatmul.mubr.msk.f32.vlgmr.msra.gmra.mxu0 %vm792_vm3, %v7777_v4 }
0x30e7   : > { %11024 = vmatprep.mubr.msk.bf16.mxu0 %vm11928_vm0, %v11927_v0  ;;  %11023 = vmatpush3.bf16.msra.mxu0 %v11463_v41 }
0x319e   : > { %v11001_v6 = vpop.f32.mrf.mxu0 }
0x31a0   : > { %v7707_v9 = vpop.f32.mrf.mxu0 }
0x31a1   : > { %v7716_v44 = vpack.c.bf16 %v11001_v6, %v7707_v9 }
0x31a3   : > { %11005 = vmatmul.mubr.msk.bf16.vlgmr.msra.gmra.mxu1 %vm792_vm3, %v7716_v44 }
0x31a6   : > { %v11014_v12 = vpop.f32.mrf.mxu0 }
0x31a7   : > { %v7862_v14 = vadd.f32 %v11014_v12, %v7773_v7 }
0x31a8   : > { %v7856_v15 = vpop.f32.mrf.mxu0 }
0x31a9   : > { %v7857_v23 = vadd.f32 %v7856_v15, %v12931_v21  ;;  %v7868_v8 = vsel %vm884_vm5, %v7862_v14, -inf }
0x31aa   : > { %7869 = vmax.xlane.f32.xlu1 %v7868_v8 }
0x31ab   : > { %v7865_v22 = vsel %vm880_vm6, %v7857_v23, -inf }
0x31ac   : > { %7866 = vmax.xlane.f32.xlu0 %v7865_v22 }
0x31bb   : > { %7889 = vrot.lane.b32.xlu1 %v12902_v11, %s11933_s19 }
0x31bf   : > { %8039 = vrot.lane.b32.xlu1 %v12906_v57, %s11934_s27 }
0x31c3   : > { %8037 = vrot.lane.b32.xlu1 %v12898_v58, %s11934_s27 }
0x31c7   : > { %8035 = vrot.lane.b32.xlu1 %v12900_v46, %s11934_s27 }
0x3233   : > { %v7870_v13 = vpop.xlane.xlu1 %7869 }
0x3234   : > { %v7872_v42 = vsub.f32 %v7862_v14, %v7870_v13 }
0x3235   : > { %v7867_v16 = vpop.xlane.xlu0 %7866 }
0x3236   : > { %v7875_v24 = vmul.f32 1.442695, %v7872_v42  ;;  %v7871_v25 = vsub.f32 %v7857_v23, %v7867_v16 }
0x3237   : > { %v7890_v52 = vpop.permute.xlu1 %7889 }
0x3238   : > { %11707 = vpow2.f32 %v7875_v24  ;;  %v7873_v26 = vmul.f32 1.442695, %v7871_v25  ;;  %11015 = vmatprep.subr.msk.mxu1 %vm910_vm4, %v7890_v52 }
0x3239   : > { %11016 = vmatpush3.msk.msra.mxu1 %vm910_vm4, %v7890_v52 }
0x323a   : > { %11709 = vpow2.f32 %v7873_v26 }
0x323b   : > { %v8040_v45 = vpop.permute.xlu1 %8039 }
0x323f   : > { %v8038_v49 = vpop.permute.xlu1 %8037 }
0x3245   : > { %v11708_v27 = vpop.eup %11707 }
0x3246   : > { %v7880_v28 = vsel %vm884_vm5, %v11708_v27, 0.0 }
0x3247   : > { %v11710_v54 = vpop.eup %11709  ;;  %7881 = vadd.xlane.f32.xlu0 %v7880_v28 }
0x3248   : > { %v7877_v29 = vsel %vm880_vm6, %v11710_v54, 0.0 }
0x324b   : > { %7878 = vadd.xlane.f32.xlu0 %v7877_v29 }
0x3261   : > { %7887 = vrot.lane.b32.xlu0 %v12894_v10, %s11933_s19  ;;  %s9526_s19 = scalar_lea.hbm %s13308_s12, %s10131_s28 }
0x3263   : > { %v7763_v50 = vpop.f32.mrf.mxu1 }
0x3264   : > { %v13099_v51 = vadd.f32 %v7763_v50, %v13059_v47 }
0x3265   : > { %8033 = vrot.lane.b32.xlu0 %v12892_v48, %s11934_s27  ;;  %v11006_v30 = vpop.f32.mrf.mxu1 }
0x3267   : > { %v7766_v31 = vpop.f32.mrf.mxu1 }
0x3268   : > { %v13104_v33 = vadd.f32 %v7766_v31, %v13064_v39  ;;  %v8036_v39 = vpop.permute.xlu1 %8035 }
0x3269   : > { %v11007_v34 = vpop.f32.mrf.mxu1 }
0x326a   : > { %v11464_v34 = vld [vmem:[#allocation5 + $0xa8] sm:$0xff]  }
0x32d0   : > { %v7882_v35 = vpop.xlane.xlu0 %7881 }
0x32d1   : > { %11711 = vrcp.f32 %v7882_v35 }
0x32d4   : > { %v7879_v36 = vpop.xlane.xlu0 %7878 }
0x32d5   : > { %11713 = vrcp.f32 %v7879_v36 }
0x32d8   : > { %v7888_v37 = vpop.permute.xlu0 %7887 }
0x32d9   : > { %11017 = vmatprep.subr.mxu1 %v7888_v37 }
0x32da   : > { %11018 = vmatpush3.msra.mxu1 %v7888_v37 }
0x32db   : > { %11028 = vmatprep.subr.msk.mxu1 %vm792_vm3, %v8040_v45 }
0x32dc   : > { %v8034_v38 = vpop.permute.xlu0 %8033 }
0x32de   : > { %v11712_v53 = vpop.eup %11711 }
0x32df   : > { %v7886_v47 = vmul.f32 %v11712_v53, %v11708_v27 }
0x32e2   : > { %v11714_v40 = vpop.eup %11713 }
0x32e3   : > { %v7885_v55 = vmul.f32 %v11714_v40, %v11710_v54 }
0x32e5   : > { %11019 = vmatprep.mubr.msk.f32.mxu1 %vm880_vm6, %v7885_v55 }
0x32e6   : > { %11020 = vmatmul.mubr.msk.f32.vlgmr.msra.gmra.mxu1 %vm880_vm6, %v7886_v47 }
0x32e7   : > { %11029 = vmatpush3.xpose.msk.msra.mxu1 %vm792_vm3, %v8040_v45  ;;  %11032 = vmatprep.mubr.msk.f32.mxu1 %vm792_vm3, %v8034_v38  ;;  %v8291_v45 = vld [vmem:[%s13305_s9 + $0x8] sm:$0x3] }
0x32e8   : > { %11030 = vmatprep.subr.msk.mxu1 %vm792_vm3, %v8038_v49 }
0x32eb   : > { %11031 = vmatpush3.xpose.msk.msra.mxu1 %vm792_vm3, %v8038_v49 }
0x32ec   : > { %11042 = vmatprep.subr.bf16.mxu1 %v11927_v0 }
0x32ee   : > { %11033 = vmatmul.mubr.msk.f32.vlgmr.msra.gmra.mxu1 %vm792_vm3, %v8036_v39 }
0x32ef   : > { %11044 = vmatprep.mubr.msk.bf16.mxu1 %vm11928_vm0, %v11927_v0  ;;  %11043 = vmatpush3.bf16.msra.mxu1 %v11464_v34 }
0x33a6   : > { %v11021_v56 = vpop.f32.mrf.mxu1 }
0x33a8   : > { %v7966_v59 = vpop.f32.mrf.mxu1 }
0x33a9   : > { %v7975_v60 = vpack.c.bf16 %v11021_v56, %v7966_v59 }
0x33ab   : > { %11025 = vmatmul.mubr.msk.bf16.vlgmr.msra.gmra.mxu0 %vm792_vm3, %v7975_v60 }
0x33ae   : > { %v11034_v62 = vpop.f32.mrf.mxu1 }
0x33af   : > { %v8121_v63 = vadd.f32 %v11034_v62, %v8032_v61 }
0x33b0   : > { %v8115_v1 = vpop.f32.mrf.mxu1 }
0x33b1   : > { %v8116_v2 = vadd.f32 %v8115_v1, %v12931_v21  ;;  %v8127_v43 = vsel %vm884_vm5, %v8121_v63, -inf }
0x33b2   : > { %8128 = vmax.xlane.f32.xlu1 %v8127_v43 }
0x33b3   : > { %v8124_v3 = vsel %vm880_vm6, %v8116_v2, -inf }
0x33b4   : > { %8125 = vmax.xlane.f32.xlu0 %v8124_v3 }
0x33c3   : > { %8148 = vrot.lane.b32.xlu1 %v12902_v11, %s11934_s27 }
0x33c7   : > { %8298 = vrot.lane.b32.xlu1 %v12906_v57, %s11935_s17 }
0x33cb   : > { %8296 = vrot.lane.b32.xlu1 %v12898_v58, %s11935_s17 }
0x33cf   : > { %8294 = vrot.lane.b32.xlu1 %v12900_v46, %s11935_s17 }
0x343b   : > { %v8129_v4 = vpop.xlane.xlu1 %8128 }
0x343c   : > { %v8131_v5 = vsub.f32 %v8121_v63, %v8129_v4 }
0x343d   : > { %v8126_v6 = vpop.xlane.xlu0 %8125 }
0x343e   : > { %v8134_v9 = vmul.f32 1.442695, %v8131_v5  ;;  %v8130_v44 = vsub.f32 %v8116_v2, %v8126_v6 }
0x343f   : > { %v8149_v7 = vpop.permute.xlu1 %8148 }
0x3440   : > { %11715 = vpow2.f32 %v8134_v9  ;;  %v8132_v12 = vmul.f32 1.442695, %v8130_v44  ;;  %11035 = vmatprep.subr.msk.mxu0 %vm910_vm4, %v8149_v7 }
0x3441   : > { %11036 = vmatpush3.msk.msra.mxu0 %vm910_vm4, %v8149_v7 }
0x3442   : > { %11717 = vpow2.f32 %v8132_v12 }
0x3443   : > { %v8299_v28 = vpop.permute.xlu1 %8298 }
0x3447   : > { %v8297_v31 = vpop.permute.xlu1 %8296 }
0x344d   : > { %v11716_v14 = vpop.eup %11715 }
0x344e   : > { %v8139_v15 = vsel %vm884_vm5, %v11716_v14, 0.0 }
0x344f   : > { %v11718_v23 = vpop.eup %11717  ;;  %8140 = vadd.xlane.f32.xlu0 %v8139_v15 }
0x3450   : > { %v8136_v8 = vsel %vm880_vm6, %v11718_v23, 0.0 }
0x3453   : > { %8137 = vadd.xlane.f32.xlu0 %v8136_v8 }
0x3469   : > { %8146 = vrot.lane.b32.xlu0 %v12894_v10, %s11934_s27  ;;  %s11843_s27 = scalar_lea.vmem %s9529_s15, 16 }
0x346a   : > { %p11844_p9 = scmp.ne.s32.totalorder %s9529_s15, %s11843_s27 }
0x346b   : > { %v8022_v22 = vpop.f32.mrf.mxu0 }
0x346c   : > { %v13139_v13 = vadd.f32 %v8022_v22, %v13099_v51  ;;  %p11845_p12 = pnand %p11844_p9, %p12041_p5 }
0x346d   : > { %8292 = vrot.lane.b32.xlu0 %v12892_v48, %s11935_s17  ;;  %v11026_v42 = vpop.f32.mrf.mxu0 }
0x346e   : > { %p11846_p13 = pneg %p11845_p12 }
0x346f   : > { %v8025_v16 = vpop.f32.mrf.mxu0 }
0x3470   : > { %v13144_v24 = vadd.f32 %v8025_v16, %v13104_v33  ;;  %v8295_v33 = vpop.permute.xlu1 %8294 }
0x3471   : > { %v11027_v25 = vpop.f32.mrf.mxu0 }
0x3472   : > { %v8550_v25 = vld [vmem:[%s13305_s9 + $0x8] sm:$0x3] }
0x34d8   : > { %v8141_v52 = vpop.xlane.xlu0 %8140 }
0x34d9   : > { %11719 = vrcp.f32 %v8141_v52 }
0x34dc   : > { %v8138_v26 = vpop.xlane.xlu0 %8137 }
0x34dd   : > { %11721 = vrcp.f32 %v8138_v26 }
0x34e0   : > { %v8147_v27 = vpop.permute.xlu0 %8146 }
0x34e1   : > { %11037 = vmatprep.subr.mxu0 %v8147_v27 }
0x34e2   : > { %11038 = vmatpush3.msra.mxu0 %v8147_v27 }
0x34e3   : > { %11048 = vmatprep.subr.msk.mxu0 %vm792_vm3, %v8299_v28 }
0x34e4   : > { %v8293_v30 = vpop.permute.xlu0 %8292 }
0x34e6   : > { %v11720_v54 = vpop.eup %11719 }
0x34e7   : > { %v8145_v51 = vmul.f32 %v11720_v54, %v11716_v14 }
0x34ea   : > { %v11722_v29 = vpop.eup %11721 }
0x34eb   : > { %v8144_v50 = vmul.f32 %v11722_v29, %v11718_v23 }
0x34ed   : > { %11039 = vmatprep.mubr.msk.f32.mxu0 %vm880_vm6, %v8144_v50 }
0x34ee   : > { %11040 = vmatmul.mubr.msk.f32.vlgmr.msra.gmra.mxu0 %vm880_vm6, %v8145_v51 }
0x34ef   : > { %11049 = vmatpush3.xpose.msk.msra.mxu0 %vm792_vm3, %v8299_v28  ;;  %11052 = vmatprep.mubr.msk.f32.mxu0 %vm792_vm3, %v8293_v30 }
0x34f0   : > { %11050 = vmatprep.subr.msk.mxu0 %vm792_vm3, %v8297_v31 }
0x34f3   : > { %11051 = vmatpush3.xpose.msk.msra.mxu0 %vm792_vm3, %v8297_v31 }
0x34f4   : > { %11062 = vmatprep.subr.bf16.mxu0 %v11927_v0 }
0x34f6   : > { %11053 = vmatmul.mubr.msk.f32.vlgmr.msra.gmra.mxu0 %vm792_vm3, %v8295_v33 }
0x34f7   : > { %11064 = vmatprep.mubr.msk.bf16.mxu0 %vm11928_vm0, %v11927_v0 }
0x35ae   : > { %v11041_v35 = vpop.f32.mrf.mxu0 }
0x35b0   : > { %v8225_v36 = vpop.f32.mrf.mxu0 }
0x35b1   : > { %v8234_v37 = vpack.c.bf16 %v11041_v35, %v8225_v36 }
0x35b3   : > { %11045 = vmatmul.mubr.msk.bf16.vlgmr.msra.gmra.mxu1 %vm792_vm3, %v8234_v37 }
0x35b6   : > { %v11054_v53 = vpop.f32.mrf.mxu0 }
0x35b7   : > { %v8380_v40 = vadd.f32 %v11054_v53, %v8291_v45 }
0x35b8   : > { %v8374_v55 = vpop.f32.mrf.mxu0 }
0x35b9   : > { %v8375_v47 = vadd.f32 %v8374_v55, %v12931_v21  ;;  %v8386_v38 = vsel %vm884_vm5, %v8380_v40, -inf }
0x35ba   : > { %8387 = vmax.xlane.f32.xlu1 %v8386_v38 }
0x35bb   : > { %v8383_v49 = vsel %vm880_vm6, %v8375_v47, -inf }
0x35bc   : > { %8384 = vmax.xlane.f32.xlu0 %v8383_v49 }
0x35cb   : > { %8407 = vrot.lane.b32.xlu1 %v12902_v11, %s11935_s17 }
0x35cf   : > { %8557 = vrot.lane.b32.xlu1 %v12906_v57, %s11936_s18 }
0x35d3   : > { %8555 = vrot.lane.b32.xlu1 %v12898_v58, %s11936_s18 }
0x35d7   : > { %8553 = vrot.lane.b32.xlu1 %v12900_v46, %s11936_s18 }
0x3643   : > { %v8388_v39 = vpop.xlane.xlu1 %8387 }
0x3644   : > { %v8390_v41 = vsub.f32 %v8380_v40, %v8388_v39 }
0x3645   : > { %v8385_v56 = vpop.xlane.xlu0 %8384 }
0x3646   : > { %v8393_v59 = vmul.f32 1.442695, %v8390_v41  ;;  %v8389_v60 = vsub.f32 %v8375_v47, %v8385_v56 }
0x3647   : > { %v8408_v61 = vpop.permute.xlu1 %8407 }
0x3648   : > { %11723 = vpow2.f32 %v8393_v59  ;;  %v8391_v62 = vmul.f32 1.442695, %v8389_v60  ;;  %11055 = vmatprep.subr.msk.mxu1 %vm910_vm4, %v8408_v61  ;;  %v11466_v60 = vld [vmem:[#allocation5 + $0xb8] sm:$0xff]  }
0x3649   : > { %11056 = vmatpush3.msk.msra.mxu1 %vm910_vm4, %v8408_v61  ;;  %v11467_v61 = vld [vmem:[#allocation7 + $0x2e0] ss:$16 sps:$4 sm:$0xff]  }
0x364a   : > { %11725 = vpow2.f32 %v8391_v62  ;;  %v11469_v62 = vld [vmem:[#allocation7 + $0x2e4] ss:$16 sps:$4 sm:$0xff]  }
0x364b   : > { %v8558_v7 = vpop.permute.xlu1 %8557 }
0x364f   : > { %v8556_v8 = vpop.permute.xlu1 %8555 }
0x3653   : > { %v8554_v22 = vpop.permute.xlu1 %8553 }
0x3655   : > { %v11724_v57 = vpop.eup %11723 }
0x3656   : > { %v8398_v63 = vsel %vm884_vm5, %v11724_v57, 0.0 }
0x3657   : > { %v11726_v58 = vpop.eup %11725  ;;  %8399 = vadd.xlane.f32.xlu0 %v8398_v63  ;;  %v11475_v63 = vld [vmem:[#allocation7 + $0x2c4] ss:$16 sps:$4 sm:$0xff]  }
0x3658   : > { %v8395_v46 = vsel %vm880_vm6, %v11726_v58, 0.0 }
0x365b   : > { %8396 = vadd.xlane.f32.xlu0 %v8395_v46  ;;  %v11481_v46 = vld [vmem:[#allocation7 + $0x2a4] ss:$16 sps:$4 sm:$0xff]  }
0x3671   : > { %8405 = vrot.lane.b32.xlu0 %v12894_v10, %s11935_s17  ;;  %s11847_s17 = sshll.u32 %s11937_s20, 4  ;;  %s11848_s17 = int_to_ptr.vmem [resolvable:$false] %s11847_s17 }
0x3672   : > { %s11849_s25 = scalar_lea.vmem %s11848_s17, 32  ;;  %p11850_p4 = scmp.lt.s32.totalorder %s9529_s15, %s11848_s17 }
0x3673   : > { %v8281_v1 = vpop.f32.mrf.mxu1  ;;  %p11851_p7 = scmp.lt.s32.totalorder %s11849_s25, %s11843_s27 }
0x3674   : > { %v13179_v2 = vadd.f32 %v8281_v1, %v13139_v13  ;;  %v11465_v13 = vld [vmem:[#allocation5 + $0xb0] sm:$0xff]  }
0x3675   : > { %8551 = vrot.lane.b32.xlu0 %v12892_v48, %s11936_s18  ;;  %v11046_v43 = vpop.f32.mrf.mxu1  ;;  %11063 = vmatpush3.bf16.msra.mxu0 %v11465_v13  ;;  %v11479_v1 = vld [vmem:[#allocation7 + $0x2a0] ss:$16 sps:$4 sm:$0xff]   ;;  %v11496_v13 = vld [vmem:[#allocation7 + $0x26c] ss:$16 sps:$4 sm:$0xff]   ;;  %p11852_p8 = por %p11851_p7, %p11850_p4 }
0x3676   : > { %v11485_v43 = vld [vmem:[#allocation7 + $0x280] ss:$16 sps:$4 sm:$0xff]  }
0x3677   : > { %v8284_v3 = vpop.f32.mrf.mxu1  ;;  %p11853_p11 = pnand %p11852_p8, %p11846_p13 }
0x3678   : > { %v13184_v4 = vadd.f32 %v8284_v3, %v13144_v24  ;;  %v11493_v3 = vld [vmem:[#allocation7 + $0x264] ss:$16 sps:$4 sm:$0xff]  }
0x3679   : > { %v11047_v5 = vpop.f32.mrf.mxu1 }
0x367a   : > { %v11499_v5 = vld [vmem:[#allocation7 + $0x244] ss:$16 sps:$4 sm:$0xff]  }
0x36e0   : > { %v8400_v6 = vpop.xlane.xlu0 %8399 }
0x36e1   : > { %11727 = vrcp.f32 %v8400_v6  ;;  %v11497_v6 = vld [vmem:[#allocation7 + $0x240] ss:$16 sps:$4 sm:$0xff]  }
0x36e4   : > { %v8397_v9 = vpop.xlane.xlu0 %8396 }
0x36e5   : > { %11729 = vrcp.f32 %v8397_v9 }
0x36e8   : > { %v8406_v44 = vpop.permute.xlu0 %8405 }
0x36e9   : > { %11057 = vmatprep.subr.mxu1 %v8406_v44 }
0x36ea   : > { %11058 = vmatpush3.msra.mxu1 %v8406_v44 }
0x36eb   : > { %11068 = vmatprep.subr.msk.mxu1 %vm792_vm3, %v8558_v7 }
0x36ec   : > { %v8552_v23 = vpop.permute.xlu0 %8551 }
0x36ee   : > { %v11728_v12 = vpop.eup %11727 }
0x36ef   : > { %v8404_v48 = vmul.f32 %v11728_v12, %v11724_v57  ;;  %v11472_v57 = vld [vmem:[#allocation7 + $0x2ec] ss:$16 sps:$4 sm:$0xff]  }
0x36f2   : > { %v11730_v14 = vpop.eup %11729 }
0x36f3   : > { %v8403_v15 = vmul.f32 %v11730_v14, %v11726_v58  ;;  %v11473_v58 = vld [vmem:[#allocation7 + $0x2c0] ss:$16 sps:$4 sm:$0xff]   ;;  %v11478_v14 = vld [vmem:[#allocation7 + $0x2cc] ss:$16 sps:$4 sm:$0xff]  }
0x36f5   : > { %11059 = vmatprep.mubr.msk.f32.mxu1 %vm880_vm6, %v8403_v15  ;;  %v11476_v15 = vld [vmem:[#allocation7 + $0x2c8] ss:$16 sps:$4 sm:$0xff]  }
0x36f6   : > { %11060 = vmatmul.mubr.msk.f32.vlgmr.msra.gmra.mxu1 %vm880_vm6, %v8404_v48  ;;  %v11484_v48 = vld [vmem:[#allocation7 + $0x2ac] ss:$16 sps:$4 sm:$0xff]  }
0x36f7   : > { %11069 = vmatpush3.xpose.msk.msra.mxu1 %vm792_vm3, %v8558_v7  ;;  %11072 = vmatprep.mubr.msk.f32.mxu1 %vm792_vm3, %v8552_v23  ;;  %v11470_v7 = vld [vmem:[#allocation7 + $0x2e8] ss:$16 sps:$4 sm:$0xff]  }
0x36f8   : > { %11070 = vmatprep.subr.msk.mxu1 %vm792_vm3, %v8556_v8  ;;  %v11482_v23 = vld [vmem:[#allocation7 + $0x2a8] ss:$16 sps:$4 sm:$0xff]  }
0x36fb   : > { %11071 = vmatpush3.xpose.msk.msra.mxu1 %vm792_vm3, %v8556_v8  ;;  %v11490_v8 = vld [vmem:[#allocation7 + $0x28c] ss:$16 sps:$4 sm:$0xff]  }
0x36fc   : > { %11082 = vmatprep.subr.bf16.mxu1 %v11927_v0 }
0x36fe   : > { %11073 = vmatmul.mubr.msk.f32.vlgmr.msra.gmra.mxu1 %vm792_vm3, %v8554_v22  ;;  %v11488_v22 = vld [vmem:[#allocation7 + $0x288] ss:$16 sps:$4 sm:$0xff]  }
0x36ff   : > { %11084 = vmatprep.mubr.msk.bf16.mxu1 %vm11928_vm0, %v11927_v0  ;;  %11083 = vmatpush3.bf16.msra.mxu1 %v11466_v60  ;;  %v11532_v60 = vld [vmem:[#allocation8 + $0x2d8] sm:$0xff]  }
0x3700   : > { %9068 = vmatprep.subr.bf16.mxu1 %v11472_v57  ;;  %v11535_v57 = vld [vmem:[#allocation8 + $0x250] sm:$0xff]  }
0x37b6   : > { %v11061_v42 = vpop.f32.mrf.mxu1 }
0x37b8   : > { %v8484_v16 = vpop.f32.mrf.mxu1 }
0x37b9   : > { %v8493_v24 = vpack.c.bf16 %v11061_v42, %v8484_v16  ;;  %v11494_v42 = vld [vmem:[#allocation7 + $0x268] ss:$16 sps:$4 sm:$0xff]   ;;  %v11502_v16 = vld [vmem:[#allocation7 + $0x24c] ss:$16 sps:$4 sm:$0xff]  }
0x37bb   : > { %11065 = vmatmul.mubr.msk.bf16.vlgmr.msra.gmra.mxu0 %vm792_vm3, %v8493_v24  ;;  %v11500_v24 = vld [vmem:[#allocation7 + $0x248] ss:$16 sps:$4 sm:$0xff]  }
0x37be   : > { %v11074_v52 = vpop.f32.mrf.mxu1 }
0x37bf   : > { %v8639_v26 = vadd.f32 %v11074_v52, %v8550_v25  ;;  %v11505_v25 = vld [vmem:[#allocation7 + $0x224] ss:$16 sps:$4 sm:$0xff]   ;;  %v11503_v52 = vld [vmem:[#allocation7 + $0x220] ss:$16 sps:$4 sm:$0xff]  }
0x37c0   : > { %v8633_v27 = vpop.f32.mrf.mxu1 }
0x37c1   : > { %v8634_v28 = vadd.f32 %v8633_v27, %v12931_v21  ;;  %v8645_v54 = vsel %vm884_vm5, %v8639_v26, -inf  ;;  %v11511_v27 = vld [vmem:[#allocation7 + $0x204] ss:$16 sps:$4 sm:$0xff]  }
0x37c2   : > { %8646 = vmax.xlane.f32.xlu1 %v8645_v54  ;;  %v11509_v54 = vld [vmem:[#allocation7 + $0x200] ss:$16 sps:$4 sm:$0xff]  }
0x37c3   : > { %v8642_v0 = vsel %vm880_vm6, %v8634_v28, -inf }
0x37c4   : > { %8643 = vmax.xlane.f32.xlu0 %v8642_v0  ;;  %v11512_v0 = vld [vmem:[#allocation7 + $0x208] ss:$16 sps:$4 sm:$0xff]  }
0x37d3   : > { %8666 = vrot.lane.b32.xlu1 %v12902_v11, %s11936_s18 }
0x384b   : > { %v8647_v29 = vpop.xlane.xlu1 %8646 }
0x384c   : > { %v8649_v50 = vsub.f32 %v8639_v26, %v8647_v29  ;;  %v11506_v26 = vld [vmem:[#allocation7 + $0x228] ss:$16 sps:$4 sm:$0xff]  }
0x384d   : > { %v8644_v51 = vpop.xlane.xlu0 %8643  ;;  %v11515_v29 = vld [vmem:[#allocation8 + $0x278] sm:$0xff]  }
0x384e   : > { %v8652_v30 = vmul.f32 1.442695, %v8649_v50  ;;  %v8648_v31 = vsub.f32 %v8634_v28, %v8644_v51  ;;  %v11514_v28 = vld [vmem:[#allocation7 + $0x20c] ss:$16 sps:$4 sm:$0xff]  }
0x384f   : > { %v8667_v33 = vpop.permute.xlu1 %8666  ;;  %v11516_v50 = vld [vmem:[#allocation8 + $0x2f8] sm:$0xff]  }
0x3850   : > { %11731 = vpow2.f32 %v8652_v30  ;;  %v8650_v34 = vmul.f32 1.442695, %v8648_v31  ;;  %11075 = vmatprep.subr.msk.mxu0 %vm910_vm4, %v8667_v33 }
0x3851   : > { %11076 = vmatpush3.msk.msra.mxu0 %vm910_vm4, %v8667_v33 }
0x3852   : > { %11733 = vpow2.f32 %v8650_v34 }
0x385d   : > { %v11732_v21 = vpop.eup %11731 }
0x385e   : > { %v8657_v35 = vsel %vm884_vm5, %v11732_v21, 0.0 }
0x385f   : > { %v11734_v36 = vpop.eup %11733  ;;  %8658 = vadd.xlane.f32.xlu0 %v8657_v35  ;;  %v11517_v35 = vld [vmem:[#allocation8 + $0x238] sm:$0xff]  }
0x3860   : > { %v8654_v11 = vsel %vm880_vm6, %v11734_v36, 0.0 }
0x3863   : > { %8655 = vadd.xlane.f32.xlu0 %v8654_v11 }
0x3879   : > { %8664 = vrot.lane.b32.xlu0 %v12894_v10, %s11936_s18 }
0x387b   : > { %v8540_v37 = vpop.f32.mrf.mxu0 }
0x387c   : > { %v13213_v45 = vadd.f32 %v8540_v37, %v13179_v2  ;;  %v11487_v2 = vld [vmem:[#allocation7 + $0x284] ss:$16 sps:$4 sm:$0xff]  }
0x387d   : > { %v11066_v53 = vpop.f32.mrf.mxu0  ;;  %v11519_v37 = vld [vmem:[#allocation8 + $0x270] sm:$0xff]  }
0x387e   : > { %v11520_v53 = vld [vmem:[#allocation8 + $0x2f0] sm:$0xff]  }
0x387f   : > { %v8543_v40 = vpop.f32.mrf.mxu0 }
0x3880   : > { %v13216_v55 = vadd.f32 %v8543_v40, %v13184_v4  ;;  %v11491_v4 = vld [vmem:[#allocation7 + $0x260] ss:$16 sps:$4 sm:$0xff]  }
0x3881   : > { %v11067_v47 = vpop.f32.mrf.mxu0  ;;  %v11521_v40 = vld [vmem:[#allocation8 + $0x230] sm:$0xff]  }
0x3882   : > { %v11522_v47 = vld [vmem:[#allocation8 + $0x2b0] sm:$0xff]  }
0x38e8   : > { %v8659_v38 = vpop.xlane.xlu0 %8658 }
0x38e9   : > { %11735 = vrcp.f32 %v8659_v38  ;;  %v11524_v38 = vld [vmem:[#allocation8 + $0x2e8] sm:$0xff]  }
0x38ec   : > { %v8656_v49 = vpop.xlane.xlu0 %8655 }
0x38ed   : > { %11737 = vrcp.f32 %v8656_v49  ;;  %v11526_v49 = vld [vmem:[#allocation8 + $0x2a8] sm:$0xff]  }
0x38f0   : > { %v8665_v39 = vpop.permute.xlu0 %8664 }
0x38f1   : > { %11077 = vmatprep.subr.mxu0 %v8665_v39 }
0x38f2   : > { %11078 = vmatpush3.msra.mxu0 %v8665_v39  ;;  %v11527_v39 = vld [vmem:[#allocation8 + $0x260] sm:$0xff]  }
0x38f3   : > { %9025 = vmatprep.subr.bf16.mxu0 %v11469_v62  ;;  %v11534_v62 = vld [vmem:[#allocation8 + $0x298] sm:$0xff]  }
0x38f6   : > { %v11736_v41 = vpop.eup %11735 }
0x38f7   : > { %v8663_v59 = vmul.f32 %v11736_v41, %v11732_v21  ;;  %v11528_v41 = vld [vmem:[#allocation8 + $0x2e0] sm:$0xff]  }
0x38fa   : > { %v11738_v56 = vpop.eup %11737 }
0x38fb   : > { %v8662_v10 = vmul.f32 %v11738_v56, %v11734_v36  ;;  %v11518_v36 = vld [vmem:[#allocation8 + $0x2b8] sm:$0xff]   ;;  %v11529_v56 = vld [vmem:[#allocation8 + $0x220] sm:$0xff]  }
0x38fd   : > { %11079 = vmatprep.mubr.msk.f32.mxu0 %vm880_vm6, %v8662_v10  ;;  %v11530_v10 = vld [vmem:[#allocation8 + $0x2a0] sm:$0xff]  }
0x38fe   : > { %11080 = vmatmul.mubr.msk.f32.vlgmr.msra.gmra.mxu0 %vm880_vm6, %v8663_v59  ;;  %v11531_v59 = vld [vmem:[#allocation8 + $0x258] sm:$0xff]  }
0x38ff   : > { %9057 = vmatprep.mubr.bf16.mxu0 %v11929_v32  ;;  %9026 = vmatpush1.bf16.msra.mxu0 %v11467_v61  ;;  %v11533_v61 = vld [vmem:[#allocation8 + $0x218] sm:$0xff]  }
0x3900   : > { %9027 = vmatprep.subr.bf16.mxu0 %v11475_v63  ;;  %v11536_v63 = vld [vmem:[#allocation8 + $0x2d0] sm:$0xff]  }
0x3903   : > { %9028 = vmatpush1.bf16.msra.mxu0 %v11473_v58  ;;  %v11537_v58 = vld [vmem:[#allocation8 + $0x210] sm:$0xff]  }
0x3904   : > { %9029 = vmatprep.subr.bf16.mxu0 %v11481_v46  ;;  %v11538_v46 = vld [vmem:[#allocation8 + $0x290] sm:$0xff]  }
0x3907   : > { %9030 = vmatpush1.bf16.msra.mxu0 %v11479_v1  ;;  %v11539_v1 = vld [vmem:[#allocation8 + $0x248] sm:$0xff]  }
0x3908   : > { %9031 = vmatprep.subr.bf16.mxu0 %v11487_v2  ;;  %v11540_v2 = vld [vmem:[#allocation8 + $0x2c8] sm:$0xff]  }
0x390b   : > { %9032 = vmatpush1.bf16.msra.mxu0 %v11485_v43  ;;  %v11541_v43 = vld [vmem:[#allocation8 + $0x208] sm:$0xff]  }
0x390c   : > { %9033 = vmatprep.subr.bf16.mxu0 %v11493_v3  ;;  %v11542_v3 = vld [vmem:[#allocation8 + $0x288] sm:$0xff]  }
0x390f   : > { %9034 = vmatpush1.bf16.msra.mxu0 %v11491_v4  ;;  %v11543_v4 = vld [vmem:[#allocation8 + $0x240] sm:$0xff]  }
0x3910   : > { %9035 = vmatprep.subr.bf16.mxu0 %v11499_v5  ;;  %v11544_v5 = vld [vmem:[#allocation8 + $0x2c0] sm:$0xff]  }
0x3913   : > { %9036 = vmatpush1.bf16.msra.mxu0 %v11497_v6  ;;  %v11545_v6 = vld [vmem:[#allocation8 + $0x200] sm:$0xff]  }
0x3914   : > { %9037 = vmatprep.subr.bf16.mxu0 %v11505_v25 }
0x3917   : > { %9038 = vmatpush1.bf16.msra.mxu0 %v11503_v52 }
0x3918   : > { %9039 = vmatprep.subr.bf16.mxu0 %v11511_v27 }
0x391b   : > { %9040 = vmatpush1.bf16.msra.mxu0 %v11509_v54 }
0x391c   : > { %10494 = vmatprep.subr.bf16.mxu0 %v11515_v29 }
0x39be   : > { %v11081_v9 = vpop.f32.mrf.mxu0 }
0x39c0   : > { %v8743_v44 = vpop.f32.mrf.mxu0 }
0x39c1   : > { %v8752_v12 = vpack.c.bf16 %v11081_v9, %v8743_v44  ;;  %v11546_v9 = vld [vmem:[#allocation8 + $0x280] sm:$0xff]   ;;  %v10062_v44 = vld [vmem:[%s13302_s6 + $0x8] sm:$0xf] }
0x39c3   : > { %11085 = vmatmul.mubr.msk.bf16.vlgmr.msra.gmra.mxu1 %vm792_vm3, %v8752_v12 }
0x39c4   : > { %9069 = vmatpush1.bf16.msra.mxu1 %v11470_v7  ;;  %9100 = vmatprep.mubr.bf16.mxu1 %v11929_v32  ;;  %v11508_v32 = vld [vmem:[#allocation7 + $0x22c] ss:$16 sps:$4 sm:$0xff]  }
0x39c5   : > { %9070 = vmatprep.subr.bf16.mxu1 %v11478_v14  ;;  %v8852_v14 = vrot.slane %v10062_v44, %v12488_v17 }
0x39c8   : > { %9071 = vmatpush1.bf16.msra.mxu1 %v11476_v15  ;;  %v8860_v15 = vrot.slane %v10062_v44, %v12490_v18 }
0x39c9   : > { %9072 = vmatprep.subr.bf16.mxu1 %v11484_v48  ;;  %v8848_v48 = vrot.slane %v10062_v44, %v12492_v19 }
0x39cc   : > { %9073 = vmatpush1.bf16.msra.mxu1 %v11482_v23  ;;  %v8856_v23 = vrot.slane %v10062_v44, %v12494_v20 }
0x39cd   : > { %9074 = vmatprep.subr.bf16.mxu1 %v11490_v8 }
0x39d0   : > { %9075 = vmatpush1.bf16.msra.mxu1 %v11488_v22 }
0x39d1   : > { %9076 = vmatprep.subr.bf16.mxu1 %v11496_v13 }
0x39d4   : > { %9077 = vmatpush1.bf16.msra.mxu1 %v11494_v42 }
0x39d5   : > { %9078 = vmatprep.subr.bf16.mxu1 %v11502_v16 }
0x39d8   : > { %9079 = vmatpush1.bf16.msra.mxu1 %v11500_v24 }
0x39d9   : > { %9080 = vmatprep.subr.bf16.mxu1 %v11508_v32 }
0x39dc   : > { %9081 = vmatpush1.bf16.msra.mxu1 %v11506_v26 }
0x39dd   : > { %9082 = vmatprep.subr.bf16.mxu1 %v11514_v28 }
0x39e0   : > { %9083 = vmatpush1.bf16.msra.mxu1 %v11512_v0 }
0x39e1   : > { %10516 = vmatprep.subr.bf16.mxu1 %v11516_v50 }
0x3a83   : > { %v8799_v51 = vpop.f32.mrf.mxu1 }
0x3a84   : > { %v13224_v33 = vadd.f32 %v8799_v51, %v13213_v45  ;;  %v11523_v45 = vld [vmem:[#allocation8 + $0x268] sm:$0xff]  }
0x3a85   : > { %v11086_v30 = vpop.f32.mrf.mxu1 }
0x3a87   : > { %v8802_v31 = vpop.f32.mrf.mxu1 }
0x3a88   : > { %v13227_v34 = vadd.f32 %v8802_v31, %v13216_v55  ;;  %v11525_v55 = vld [vmem:[#allocation8 + $0x228] sm:$0xff]  }
0x3a89   : > { %v11087_v21 = vpop.f32.mrf.mxu1 }
0x3a8a   : > { %v8808_v11 = vpack.c.bf16 %v13227_v34, %v13224_v33 }
0x3a8c   : > { %9058 = vmatmul.mubr.bf16.vlgmr.msra.gmra.mxu0 %v8808_v11  ;;  %9101 = vmatmul.mubr.bf16.vlgmr.msra.gmra.mxu1 %v8808_v11 }
0x3a8d   : > { %10495 = vmatpush3.bf16.msra.mxu0 %v11517_v35  ;;  %10517 = vmatpush3.bf16.msra.mxu1 %v11518_v36 }
0x3a8e   : > { %10496 = vmatprep.subr.bf16.mxu0 %v11519_v37  ;;  %10518 = vmatprep.subr.bf16.mxu1 %v11520_v53 }
0x3a91   : > { %10497 = vmatpush3.bf16.msra.mxu0 %v11521_v40  ;;  %10519 = vmatpush3.bf16.msra.mxu1 %v11522_v47 }
0x3a92   : > { %10498 = vmatprep.subr.bf16.mxu0 %v11523_v45  ;;  %10520 = vmatprep.subr.bf16.mxu1 %v11524_v38 }
0x3a95   : > { %10499 = vmatpush3.bf16.msra.mxu0 %v11525_v55  ;;  %10521 = vmatpush3.bf16.msra.mxu1 %v11526_v49 }
0x3a96   : > { %10500 = vmatprep.subr.bf16.mxu0 %v11527_v39  ;;  %10522 = vmatprep.subr.bf16.mxu1 %v11528_v41 }
0x3a99   : > { %10501 = vmatpush3.bf16.msra.mxu0 %v11529_v56  ;;  %10523 = vmatpush3.bf16.msra.mxu1 %v11530_v10 }
0x3a9a   : > { %10502 = vmatprep.subr.bf16.mxu0 %v11531_v59  ;;  %10524 = vmatprep.subr.bf16.mxu1 %v11532_v60 }
0x3a9d   : > { %10503 = vmatpush3.bf16.msra.mxu0 %v11533_v61  ;;  %10525 = vmatpush3.bf16.msra.mxu1 %v11534_v62  ;;  %v10128_v62 = vld [vmem:[%s13304_s8 + $0x2] ss:$0 sm:$0xff] }
0x3a9e   : > { %10504 = vmatprep.subr.bf16.mxu0 %v11535_v57  ;;  %10526 = vmatprep.subr.bf16.mxu1 %v11536_v63  ;;  %v10130_v57 = vld [vmem:[%s13306_s10 + $0x18] sm:$0x3]  ;;  %v9476_v63 = vld [vmem:[%s13306_s10 + $0x8] sm:$0x3] }
0x3aa1   : > { %10505 = vmatpush3.bf16.msra.mxu0 %v11537_v58  ;;  %10527 = vmatpush3.bf16.msra.mxu1 %v11538_v46 }
0x3aa2   : > { %10506 = vmatprep.subr.bf16.mxu0 %v11539_v1  ;;  %10528 = vmatprep.subr.bf16.mxu1 %v11540_v2 }
0x3aa5   : > { %10507 = vmatpush3.bf16.msra.mxu0 %v11541_v43  ;;  %10529 = vmatpush3.bf16.msra.mxu1 %v11542_v3  ;;  %v10129_v43 = vld [vmem:[%s13306_s10 + $0x10] sm:$0xff]  ;;  %v9475_v3 = vld [vmem:[%s13306_s10] sm:$0xff] }
0x3aa6   : > { %10508 = vmatprep.subr.bf16.mxu0 %v11543_v4  ;;  %10530 = vmatprep.subr.bf16.mxu1 %v11544_v5 }
0x3aa9   : > { %10509 = vmatpush3.bf16.msra.mxu0 %v11545_v6  ;;  %10531 = vmatpush3.bf16.msra.mxu1 %v11546_v9 }
0x3b4c   : > { %v9059_v7 = vpop.f32.mrf.mxu0  ;;  %v9102_v12 = vpop.f32.mrf.mxu1 }
0x3b4d   : > { %v9060_v52 = vadd.f32 %v9059_v7, %v8848_v48  ;;  %v9103_v26 = vadd.f32 %v9102_v12, %v8856_v23 }
0x3b4e   : > { %v9061_v8 = vpop.f32.mrf.mxu0  ;;  %v9104_v22 = vpop.f32.mrf.mxu1 }
0x3b4f   : > { %v9062_v16 = vadd.f32 %v9061_v8, %v8852_v14  ;;  %v9105_v24 = vadd.f32 %v9104_v22, %v8860_v15  ;;  %v9111_v51 = vmax.f32 %v9060_v52, 0.0  ;;  %v9113_v30 = vmax.f32 %v9103_v26, 0.0 }
0x3b50   : > { %v9063_v13 = vpop.f32.mrf.mxu0  ;;  %v9106_v42 = vpop.f32.mrf.mxu1 }
0x3b51   : > { %v9064_v25 = vadd.f32 %v9063_v13, %v8848_v48  ;;  %v9107_v32 = vadd.f32 %v9106_v42, %v8856_v23  ;;  %v9112_v29 = vmax.f32 %v9062_v16, 0.0  ;;  %v9114_v19 = vmax.f32 %v9105_v24, 0.0 }
0x3b52   : > { %v9065_v27 = vpop.f32.mrf.mxu0  ;;  %v9108_v28 = vpop.f32.mrf.mxu1 }
0x3b53   : > { %v9066_v54 = vadd.f32 %v9065_v27, %v8852_v14  ;;  %v9109_v17 = vadd.f32 %v9108_v28, %v8860_v15  ;;  %v9115_v0 = vmax.f32 %v9064_v25, 0.0  ;;  %v9117_v18 = vmax.f32 %v9107_v32, 0.0  ;;  %v9474_v27 = vld [vmem:[%s13307_s11] sm:$0x1] }
0x3b55   : > { %v9116_v50 = vmax.f32 %v9066_v54, 0.0  ;;  %v9118_v20 = vmax.f32 %v9109_v17, 0.0  ;;  %v9119_v35 = vpack.c.bf16 %v9115_v0, %v9111_v51  ;;  %v9121_v36 = vpack.c.bf16 %v9117_v18, %v9113_v30 }
0x3b57   : > { %v9120_v31 = vpack.c.bf16 %v9116_v50, %v9112_v29  ;;  %v9122_v21 = vpack.c.bf16 %v9118_v20, %v9114_v19 }
0x3b59   : > { %9412 = vmatprep.mubr.bf16.mxu0 %v9120_v31  ;;  %9453 = vmatprep.mubr.bf16.mxu1 %v9122_v21 }
0x3b5a   : > { %9413 = vmatmul.mubr.bf16.vlgmr.msra.gmra.mxu0 %v9119_v35  ;;  %9454 = vmatmul.mubr.bf16.vlgmr.msra.gmra.mxu1 %v9121_v36 }
0x3c1a   : > { %v10510_v11 = vpop.f32.mrf.mxu0  ;;  %v10532_v37 = vpop.f32.mrf.mxu1 }
0x3c1c   : > { %v10511_v53 = vpop.f32.mrf.mxu0  ;;  %v10533_v40 = vpop.f32.mrf.mxu1 }
0x3c1d   : > { %v10512_v47 = vadd.f32 %v10511_v53, %v10510_v11  ;;  %v10534_v45 = vadd.f32 %v10533_v40, %v10532_v37 }
0x3c1e   : > { %v10513_v38 = vpop.f32.mrf.mxu0  ;;  %v10535_v55 = vpop.f32.mrf.mxu1 }
0x3c1f   : > { %v9456_v10 = vadd.f32 %v10534_v45, %v10512_v47 }
0x3c20   : > { %v10514_v49 = vpop.f32.mrf.mxu0  ;;  %v10536_v39 = vpop.f32.mrf.mxu1 }
0x3c21   : > { %v10515_v41 = vadd.f32 %v10514_v49, %v10513_v38  ;;  %v10537_v56 = vadd.f32 %v10536_v39, %v10535_v55  ;;  %v9462_v61 = vadd.f32 %v9456_v10, %v13224_v33 }
0x3c23   : > { %v9459_v59 = vadd.f32 %v10537_v56, %v10515_v41  ;;  %v9472_v2 = vadd.f32 %v10128_v62, %v9462_v61 }
0x3c25   : > { %v9463_v60 = vadd.f32 %v9459_v59, %v13227_v34  ;;  %v9495_v4 = vmul.f32 %v10129_v43, %v9472_v2  ;;  %v9477_v5 = vmul.f32 %v9475_v3, %v9472_v2 }
0x3c27   : > { %v9473_v58 = vadd.f32 %v10128_v62, %v9463_v60 }
0x3c29   : > { %v9496_v46 = vmul.f32 %v10130_v57, %v9473_v58  ;;  %v9478_v1 = vmul.f32 %v9476_v63, %v9473_v58 }
0x3c2b   : > { %v9499_v34 = vsel %vm910_vm4, %v9496_v46, 0.0  ;;  %v9481_v33 = vsel %vm910_vm4, %v9478_v1, 0.0 }
0x3c2c   : > { %9500 = vadd.xlane.f32.xlu0 %v9499_v34  ;;  %9482 = vadd.xlane.f32.xlu1 %v9481_v33 }
0x3c30   : > { %9497 = vadd.xlane.f32.xlu0 %v9495_v4  ;;  %9479 = vadd.xlane.f32.xlu1 %v9477_v5 }
0x3cb5   : > { %v9501_v6 = vpop.xlane.xlu0 %9500  ;;  %v9483_v9 = vpop.xlane.xlu1 %9482 }
0x3cb6   : > { %v9502_v44 = vsel %vm910_vm4, %v9501_v6, 0.0  ;;  %v9484_v7 = vsel %vm910_vm4, %v9483_v9, 0.0 }
0x3cb9   : > { %v9498_v12 = vpop.xlane.xlu0 %9497  ;;  %v9480_v14 = vpop.xlane.xlu1 %9479 }
0x3cba   : > { %v9503_v15 = vadd.f32 %v9502_v44, %v9498_v12  ;;  %v9485_v48 = vadd.f32 %v9484_v7, %v9480_v14 }
0x3cbc   : > { %v9504_v23 = vrot.slane %v9503_v15, 4  ;;  %v9486_v8 = vrot.slane %v9485_v48, 4 }
0x3cbe   : > { %v9505_v22 = vadd.f32 %v9504_v23, %v9503_v15  ;;  %v9487_v13 = vadd.f32 %v9486_v8, %v9485_v48 }
0x3cc0   : > { %v9506_v42 = vrot.slane %v9505_v22, 2  ;;  %v9488_v16 = vrot.slane %v9487_v13, 2 }
0x3cc2   : > { %v9507_v24 = vadd.f32 %v9506_v42, %v9505_v22  ;;  %v9489_v25 = vadd.f32 %v9488_v16, %v9487_v13 }
0x3cc4   : > { %v9508_v32 = vrot.slane %v9507_v24, 1  ;;  %v9490_v52 = vrot.slane %v9489_v25, 1 }
0x3cc6   : > { %v9509_v26 = vadd.f32 %v9508_v32, %v9507_v24  ;;  %v9491_v28 = vadd.f32 %v9490_v52, %v9489_v25 }
0x3cc8   : > { %v9511_v54 = vsel %vm9510_vm7, %v9491_v28, %v9509_v26 }
0x3cc9   : > { %v9512_v17 = vadd.f32 %v9511_v54, %v9474_v27 }
0x3ccb   : > { %9514 = vst.msk [vmem:[%s464_s14] sm:$0x1] %vm9513_vm8, %v9512_v17 }
0x3ccc   : > { %11856 = shalt.err (!%p11853_p11)
}
0x3ccd   : > { %s11857_s18 = scalar_lea.hbm %s9526_s19, 16  ;;  %s11861_s28 = scalar_lea.hbm %s13308_s12, 32 }
0x3cce   : > { %p11858_p0 = scmp.ne.s32.totalorder %s9526_s19, %s11857_s18  ;;  %p11862_p3 = scmp.lt.s32.totalorder %s9526_s19, %s13308_s12 }
0x3ccf   : > { %p11863_p10 = scmp.lt.s32.totalorder %s11861_s28, %s11857_s18 }
0x3cd0   : > { %p11859_p1 = pnand %p11858_p0, %p12041_p5 }
0x3cd1   : > { %p11864_p9 = por %p11863_p10, %p11862_p3 }
0x3cd2   : > { %p11860_p2 = pneg %p11859_p1 }
0x3cd4   : > { %p11865_p12 = pnand %p11864_p9, %p11860_p2 }
0x3cd6   : > { %11868 = shalt.err (!%p11865_p12)
}
0x3cd7   : > { %11104 = dma.vmem_to_hbm [thread:$0]  (%p12041_p5), %s9529_s15, 16, %s9526_s19, %s9516_s23  }
0x3cd8 PF: > { %p11131_p13 = scmp.ge.s32.totalorder %s11915_s24, 2  ;;  %s9540_s27 = sand.u32 1, %s11903_s21  }
0x3cd9   : > { %s9541_s20 = scalar_lea.sflag [#allocation4], %s9540_s27 }
0x3cda   : > { %p11120_p4 = pnand %p11131_p13, %p12045_p6 }
0x3cdc   : > { %p11121_p7 = pneg %p11120_p4 }
0x3cde   : > { %11898 = dma.done.wait (%p11121_p7), %s9541_s20, 16  }
0x3cdf   : > { %11900 = vsyncadd (%p11121_p7), %s9541_s20, 4294967280  ;;  %s13324_s24 = sld [smem:[#allocation16_spill]]  ;;  %s13327_s21 = smov %s11907_s22 }
0x3ce0   : > { %s13325_s17 = sld [smem:[#allocation15_spill]] }
0x3ce1   : > { %s13326_s23 = sld [smem:[#allocation17_spill]] }
0x3ce5   : > { %p25_p8 = scmp.ge.s32.totalorder %s13324_s24, 4  }
0x3ce6   : > { %s13328_s22 = smov %s13325_s17 }
0x3ce7   :  { %27 = sbr.rel (!%p25_p8) target bundleno = 6 (0x6), region = 154 }
0x3cec   :  { %9545 = vsyncpa [#allocation3], 1 }
0x3ced   :  { %9547 = vsyncpa [#allocation3 + $0x1], 1 }
0x3cee   :  { %9548 = vsyncpa [#allocation6], 1 }
0x3cef   :  { %9549 = vsyncpa [#allocation9], 1 }
0x3cf0   :  { %9550 = vsyncpa [#allocation4], 1 }
0x3cf1   :  { %9552 = vsyncpa [#allocation4 + $0x1], 1 }

</bundles_post_ra>
